<compile_context>
chip_gen: v5e
topology: v5e:2x2
jax: 0.10.0
libtpu: 0.0.40
codegen_flags: <defaults>
</compile_context>

<pallas_src>
import jax
import jax.numpy as jnp
from jax.experimental import pallas as pl
from jax.experimental.pallas import tpu as pltpu

# ----------------------------- model hyper-params ---------------------------
VOCAB_SIZE = 50
CHAR_ALPHABET = 30
WORD_EMB = 300
CHAR_EMB = 30
CHAR_HIDDEN = 50            # -> LSTM input dim 350
RNN_HIDDEN = 32             # H ; 2H = 64, 4H = 128, fwd|bwd gates = 256
LABEL_SIZE = 10

B = 2                       # batch
L = 8                       # sentence length (max_seq_length)
WORD_LEN = 8                # chars per word
TPAD = 16                   # conv time dim (1 left zero-pad + chars + right zero-pad)

VMEM = pltpu.MemorySpace.VMEM
SMEM = pltpu.MemorySpace.SMEM


# ------------------------------- fused kernel --------------------------------
def bilstmcrf_fused_kernel(wordf_ref, charx_ref, mask2d_ref, maskcol_ref, labels_ref,
                           convw_ref, convb_ref,
                           wihw_ref, wihc_ref, bcat_ref, whhf_ref, whhb_ref,
                           whw_ref, bhw_ref, wtag_ref, btag_ref,
                           loss_ref, logits_ref, lstm_buf):
    """Fused CharCNN -> BiLSTM (mask-gated packed semantics) -> Highway -> tag -> CE.

    wordf_ref : (B*L, 300)          word embeddings (already gathered)
    charx_ref : (B*L, TPAD, 30)     zero-padded char embeddings (valid rows 1..WORD_LEN)
    mask2d_ref: (B, L) f32          prefix-of-ones mask
    maskcol_ref:(B*L, 1) f32        same mask, row layout
    labels_ref: (B*L, 1) int32
    convw_ref : (3, 30, 50)         Conv1d taps     convb_ref: (1, 50)
    wihw_ref  : (300, 256)          word-part of W_ih, fwd|bwd gates concatenated
    wihc_ref  : (50, 256)           char-part of W_ih, fwd|bwd gates concatenated
    bcat_ref  : (1, 256)            combined LSTM biases, fwd|bwd
    whhf_ref/whhb_ref : (32, 128)   recurrent weights per direction
    whw_ref   : (64, 128)  bhw_ref: (1, 128)   Highway (nonlinear | gate)
    wtag_ref  : (64, 10)   btag_ref:(1, 10)
    loss_ref  : (1, 1) SMEM         logits_ref: (B, L, 10)
    lstm_buf  : (B, L, 2H) VMEM scratch (fwd in lanes 0:H, bwd in H:2H)
    """
    H = RNN_HIDDEN
    BL = B * L

    # ---------------- CharCNN.get_last_hiddens (matmul-first) ----------------
    x2 = charx_ref[...].reshape(BL * TPAD, CHAR_EMB)                       # (256, 30)
    y0 = jnp.dot(x2, convw_ref[0],
                 preferred_element_type=jnp.float32).reshape(BL, TPAD, CHAR_HIDDEN)
    y1 = jnp.dot(x2, convw_ref[1],
                 preferred_element_type=jnp.float32).reshape(BL, TPAD, CHAR_HIDDEN)
    y2 = jnp.dot(x2, convw_ref[2],
                 preferred_element_type=jnp.float32).reshape(BL, TPAD, CHAR_HIDDEN)
    conv = (y0[:, 0:WORD_LEN, :]
            + y1[:, 1:WORD_LEN + 1, :]
            + y2[:, 2:WORD_LEN + 2, :])                                    # (BL, 8, 50)
    # bias is constant over time -> add after the max-pool (equivalent)
    char_feats = jnp.max(conv, axis=1) + convb_ref[...]                    # (BL, 50)

    # -------- hoisted LSTM input projection (fwd|bwd gates, 256 wide) --------
    maskcol = maskcol_ref[...]                                             # (BL, 1)
    # (mask * x) @ W == mask * (x @ W) per row; bias added unmasked (as in nn.LSTM)
    g_in = maskcol * (
        jnp.dot(wordf_ref[...], wihw_ref[...], preferred_element_type=jnp.float32)
        + jnp.dot(char_feats, wihc_ref[...], preferred_element_type=jnp.float32))
    g_in = g_in + bcat_ref[...]                                            # (BL, 8H)
    g3 = g_in.reshape(B, L, 8 * H)                                         # (B, L, 256)

    mask2d = mask2d_ref[...]                                               # (B, L)
    whh_f = whhf_ref[...]
    whh_b = whhb_ref[...]

    def cell(g_pre, h, c, whh):
        gates = g_pre + jnp.dot(h, whh, preferred_element_type=jnp.float32)  # (B, 4H)
        sg = jax.nn.sigmoid(gates)     # single EUP pass over the whole gate vreg
        th = jnp.tanh(gates)
        i, f = sg[:, 0:H], sg[:, H:2 * H]
        gg, o = th[:, 2 * H:3 * H], sg[:, 3 * H:4 * H]
        c_new = f * c + i * gg
        h_new = o * jnp.tanh(c_new)
        return h_new, c_new

    zero = jnp.zeros((B, H), jnp.float32)
    hf, cf, hb, cb = zero, zero, zero, zero

    # Fully unrolled; forward step s and backward step L-1-s interleaved so the two
    # independent dependency chains overlap.  Padded steps (mask==0): state frozen,
    # output zero  ==  pack_padded_sequence / pad_packed_sequence semantics.
    for s in range(L):
        tb = L - 1 - s

        mf = mask2d[:, s:s + 1]                                            # (B, 1)
        hn, cn = cell(g3[:, s, 0:4 * H], hf, cf, whh_f)
        hf = mf * hn + (1.0 - mf) * hf
        cf = mf * cn + (1.0 - mf) * cf
        lstm_buf[:, s, 0:H] = mf * hf

        mb = mask2d[:, tb:tb + 1]
        hn_b, cn_b = cell(g3[:, tb, 4 * H:8 * H], hb, cb, whh_b)
        hb = mb * hn_b + (1.0 - mb) * hb
        cb = mb * cn_b + (1.0 - mb) * cb
        lstm_buf[:, tb, H:2 * H] = mb * hb

    # ------------------------ Highway + hidden2tag ---------------------------
    yh = lstm_buf[...].reshape(BL, 2 * H)                                  # (16, 64)
    proj = jnp.dot(yh, whw_ref[...], preferred_element_type=jnp.float32) + bhw_ref[...]
    nonlin = jax.nn.relu(proj[:, 0:2 * H])
    gate = jax.nn.sigmoid(proj[:, 2 * H:4 * H])
    hw = gate * yh + (1.0 - gate) * nonlin          # gate*linear + (1-gate)*nonlinear (as in reference)
    logits = jnp.dot(hw, wtag_ref[...], preferred_element_type=jnp.float32) + btag_ref[...]
    logits_ref[...] = logits.reshape(B, L, LABEL_SIZE)

    # ------------- CrossEntropyLoss(ignore_index=0) over mask==1 -------------
    labels = labels_ref[...]                                               # (BL, 1) int32
    mx = jnp.max(logits, axis=-1, keepdims=True)
    lse = mx + jnp.log(jnp.sum(jnp.exp(logits - mx), axis=-1, keepdims=True))
    cls = jax.lax.broadcasted_iota(jnp.int32, (BL, LABEL_SIZE), 1)
    onehot = (cls == labels).astype(jnp.float32)
    picked = jnp.sum(logits * onehot, axis=-1, keepdims=True)
    valid = maskcol * (labels != 0).astype(jnp.float32)
    loss_ref[0, 0] = jnp.sum((lse - picked) * valid) / jnp.sum(valid)


# ------------------------------- wrapper --------------------------------------
def _vmem(n):
    return [pl.BlockSpec(memory_space=VMEM) for _ in range(n)]


@jax.jit
def bilstmcrf_forward(params, word_input, input_mask, labels, char_input):
    # Embedding lookups (gathers) stay in XLA; everything dense is fused below.
    word_flat = jnp.take(params["word_emb"], word_input.reshape(-1), axis=0)        # (B*L, 300)
    char_embeds = jnp.take(params["char_emb"],
                           char_input.reshape(-1, WORD_LEN), axis=0)                # (B*L, Tc, 30)
    # left zero-pad 1 (Conv1d padding=1); right-pad so the time dim is tile aligned
    char_pad = jnp.pad(char_embeds, ((0, 0), (1, TPAD - WORD_LEN - 1), (0, 0)))     # (B*L, TPAD, 30)

    maskf = input_mask.astype(jnp.float32)                                          # (B, L)
    maskcol = maskf.reshape(B * L, 1)
    labels_col = labels.reshape(B * L, 1).astype(jnp.int32)

    # fwd|bwd gate concatenation -> 256-wide gate dim, split into word/char parts
    wih_word = jnp.concatenate([params["wih_f"][:WORD_EMB], params["wih_b"][:WORD_EMB]], axis=1)
    wih_char = jnp.concatenate([params["wih_f"][WORD_EMB:], params["wih_b"][WORD_EMB:]], axis=1)
    b_cat = jnp.concatenate([params["b_f"], params["b_b"]], axis=1)                 # (1, 256)

    loss, logits = pl.pallas_call(
        bilstmcrf_fused_kernel,
        out_shape=(jax.ShapeDtypeStruct((1, 1), jnp.float32),
                   jax.ShapeDtypeStruct((B, L, LABEL_SIZE), jnp.float32)),
        in_specs=_vmem(16),
        out_specs=(pl.BlockSpec(memory_space=SMEM),
                   pl.BlockSpec(memory_space=VMEM)),
        scratch_shapes=[pltpu.VMEM((B, L, 2 * RNN_HIDDEN), jnp.float32)],
    )(word_flat, char_pad, maskf, maskcol, labels_col,
      params["conv_w"], params["conv_b"],
      wih_word, wih_char, b_cat, params["whh_f"], params["whh_b"],
      params["w_hw"], params["b_hw"], params["w_tag"], params["b_tag"])

    return loss[0, 0], logits


# ------------------------------- parameter init ------------------------------
def init_params(key):
    ks = jax.random.split(key, 16)
    H, D = RNN_HIDDEN, WORD_EMB + CHAR_HIDDEN
    u = lambda k, shape, s: jax.random.uniform(k, shape, jnp.float32, -s, s)
    scale_char = (3.0 / CHAR_EMB) ** 0.5
    scale_conv = 1.0 / (CHAR_EMB * 3) ** 0.5
    scale_lstm = 1.0 / H ** 0.5
    scale_hw = 1.0 / (2 * H) ** 0.5
    scale_tag = 1.0 / (2 * H) ** 0.5

    b_hw = jnp.concatenate(
        [u(ks[12], (1, 2 * H), scale_hw),
         jnp.ones((1, 2 * H), jnp.float32)], axis=1)   # gate-half bias filled with 1

    return {
        "word_emb": jax.random.normal(ks[0], (VOCAB_SIZE, WORD_EMB), jnp.float32),
        "char_emb": u(ks[1], (CHAR_ALPHABET, CHAR_EMB), scale_char),
        "conv_w": u(ks[2], (3, CHAR_EMB, CHAR_HIDDEN), scale_conv),
        "conv_b": u(ks[3], (1, CHAR_HIDDEN), scale_conv),
        "wih_f": u(ks[4], (D, 4 * H), scale_lstm),
        "whh_f": u(ks[5], (H, 4 * H), scale_lstm),
        "b_f": u(ks[6], (1, 4 * H), scale_lstm),       # combined b_ih + b_hh (fwd)
        "wih_b": u(ks[7], (D, 4 * H), scale_lstm),
        "whh_b": u(ks[8], (H, 4 * H), scale_lstm),
        "b_b": u(ks[9], (1, 4 * H), scale_lstm),       # combined b_ih + b_hh (bwd)
        "w_hw": u(ks[10], (2 * H, 4 * H), scale_hw),
        "b_hw": b_hw,
        "w_tag": u(ks[13], (2 * H, LABEL_SIZE), scale_tag),
        "b_tag": u(ks[14], (1, LABEL_SIZE), scale_tag),
    }


# ------------------------------------ main ------------------------------------
if __name__ == "__main__":
    key = jax.random.PRNGKey(0)
    kp, kw, kc, kl = jax.random.split(key, 4)

    params = init_params(kp)

    word_input = jax.random.randint(kw, (B, L), 0, VOCAB_SIZE, jnp.int32)
    char_input = jax.random.randint(kc, (B, L, WORD_LEN), 0, CHAR_ALPHABET, jnp.int32)

    lengths = jnp.array([L, 5], jnp.int32)                       # prefix-of-ones masks
    input_mask = (jnp.arange(L)[None, :] < lengths[:, None]).astype(jnp.float32)

    labels = jax.random.randint(kl, (B, L), 1, LABEL_SIZE, jnp.int32)
    labels = labels * input_mask.astype(jnp.int32)               # padded label = 0 (ignored)

    loss, logits = bilstmcrf_forward(params, word_input, input_mask, labels, char_input)
    jax.block_until_ready((loss, logits))

    assert logits.shape == (B, L, LABEL_SIZE)
    assert jnp.isfinite(loss)
    # TODO(synk): CRF branch (use_crf=True) not implemented — CRF class is not
    # provided in the reference; the CrossEntropy branch is reproduced instead.
    print("KERNEL_OK")
</pallas_src>

<mosaic_0001>
module attributes {stable_mosaic.version = 11 : i64} {
  func.func @bilstmcrf_fused_kernel(%arg0: memref<16x300xf32, #tpu.memory_space<vmem>>, %arg1: memref<16x16x30xf32, #tpu.memory_space<vmem>>, %arg2: memref<2x8xf32, #tpu.memory_space<vmem>>, %arg3: memref<16x1xf32, #tpu.memory_space<vmem>>, %arg4: memref<16x1xi32, #tpu.memory_space<vmem>>, %arg5: memref<3x30x50xf32, #tpu.memory_space<vmem>>, %arg6: memref<1x50xf32, #tpu.memory_space<vmem>>, %arg7: memref<300x256xf32, #tpu.memory_space<vmem>>, %arg8: memref<50x256xf32, #tpu.memory_space<vmem>>, %arg9: memref<1x256xf32, #tpu.memory_space<vmem>>, %arg10: memref<32x128xf32, #tpu.memory_space<vmem>>, %arg11: memref<32x128xf32, #tpu.memory_space<vmem>>, %arg12: memref<64x128xf32, #tpu.memory_space<vmem>>, %arg13: memref<1x128xf32, #tpu.memory_space<vmem>>, %arg14: memref<64x10xf32, #tpu.memory_space<vmem>>, %arg15: memref<1x10xf32, #tpu.memory_space<vmem>>, %arg16: memref<1x1xf32, #tpu.memory_space<smem>>, %arg17: memref<2x8x10xf32, #tpu.memory_space<vmem>>, %arg18: memref<2x8x64xf32, #tpu.memory_space<vmem>>) attributes {dimension_semantics = [], scalar_prefetch = 0 : i64, scratch_operands = 1 : i64, tpu.core_type = #tpu.core_type<tc>} {
    %c0 = arith.constant 0 : index
    %c0_0 = arith.constant 0 : index
    %c0_1 = arith.constant 0 : index
    %0 = vector.load %arg1[%c0, %c0_0, %c0_1] : memref<16x16x30xf32, #tpu.memory_space<vmem>>, vector<16x16x30xf32>
    %1 = vector.shape_cast %0 : vector<16x16x30xf32> to vector<256x30xf32>
    %c0_2 = arith.constant 0 : index
    %c0_3 = arith.constant 0 : index
    %c0_4 = arith.constant 0 : index
    %2 = vector.load %arg5[%c0_2, %c0_3, %c0_4] : memref<3x30x50xf32, #tpu.memory_space<vmem>>, vector<1x30x50xf32>
    %3 = vector.shape_cast %2 : vector<1x30x50xf32> to vector<30x50xf32>
    %cst = arith.constant dense<0.000000e+00> : vector<256x50xf32>
    %4 = tpu.matmul %1, %3, %cst {dimension_numbers = #tpu.dot_dimension_numbers<[1], [0], [0], [1], [0, 0, 1, 1], [], []>} : vector<256x30xf32>, vector<30x50xf32>, vector<256x50xf32> -> vector<256x50xf32>
    %5 = vector.shape_cast %4 : vector<256x50xf32> to vector<16x16x50xf32>
    %c1 = arith.constant 1 : index
    %c0_5 = arith.constant 0 : index
    %c0_6 = arith.constant 0 : index
    %6 = vector.load %arg5[%c1, %c0_5, %c0_6] : memref<3x30x50xf32, #tpu.memory_space<vmem>>, vector<1x30x50xf32>
    %7 = vector.shape_cast %6 : vector<1x30x50xf32> to vector<30x50xf32>
    %cst_7 = arith.constant dense<0.000000e+00> : vector<256x50xf32>
    %8 = tpu.matmul %1, %7, %cst_7 {dimension_numbers = #tpu.dot_dimension_numbers<[1], [0], [0], [1], [0, 0, 1, 1], [], []>} : vector<256x30xf32>, vector<30x50xf32>, vector<256x50xf32> -> vector<256x50xf32>
    %9 = vector.shape_cast %8 : vector<256x50xf32> to vector<16x16x50xf32>
    %c2 = arith.constant 2 : index
    %c0_8 = arith.constant 0 : index
    %c0_9 = arith.constant 0 : index
    %10 = vector.load %arg5[%c2, %c0_8, %c0_9] : memref<3x30x50xf32, #tpu.memory_space<vmem>>, vector<1x30x50xf32>
    %11 = vector.shape_cast %10 : vector<1x30x50xf32> to vector<30x50xf32>
    %cst_10 = arith.constant dense<0.000000e+00> : vector<256x50xf32>
    %12 = tpu.matmul %1, %11, %cst_10 {dimension_numbers = #tpu.dot_dimension_numbers<[1], [0], [0], [1], [0, 0, 1, 1], [], []>} : vector<256x30xf32>, vector<30x50xf32>, vector<256x50xf32> -> vector<256x50xf32>
    %13 = vector.shape_cast %12 : vector<256x50xf32> to vector<16x16x50xf32>
    %14 = vector.extract_strided_slice %5 {offsets = [0, 0, 0], sizes = [16, 8, 50], strides = [1, 1, 1]} : vector<16x16x50xf32> to vector<16x8x50xf32>
    %15 = vector.extract_strided_slice %9 {offsets = [0, 1, 0], sizes = [16, 8, 50], strides = [1, 1, 1]} : vector<16x16x50xf32> to vector<16x8x50xf32>
    %16 = arith.addf %14, %15 : vector<16x8x50xf32>
    %17 = vector.extract_strided_slice %13 {offsets = [0, 2, 0], sizes = [16, 8, 50], strides = [1, 1, 1]} : vector<16x16x50xf32> to vector<16x8x50xf32>
    %18 = arith.addf %16, %17 : vector<16x8x50xf32>
    %cst_11 = arith.constant dense<0xFF800000> : vector<16x50xf32>
    %19 = vector.multi_reduction <maximumf>, %18, %cst_11 [1] : vector<16x8x50xf32> to vector<16x50xf32>
    %c0_12 = arith.constant 0 : index
    %c0_13 = arith.constant 0 : index
    %20 = vector.load %arg6[%c0_12, %c0_13] : memref<1x50xf32, #tpu.memory_space<vmem>>, vector<1x50xf32>
    %21 = vector.broadcast %20 : vector<1x50xf32> to vector<16x50xf32>
    %22 = arith.addf %19, %21 : vector<16x50xf32>
    %c0_14 = arith.constant 0 : index
    %c0_15 = arith.constant 0 : index
    %23 = vector.load %arg3[%c0_14, %c0_15] : memref<16x1xf32, #tpu.memory_space<vmem>>, vector<16x1xf32>
    %c0_16 = arith.constant 0 : index
    %c0_17 = arith.constant 0 : index
    %24 = vector.load %arg0[%c0_16, %c0_17] : memref<16x300xf32, #tpu.memory_space<vmem>>, vector<16x300xf32>
    %c0_18 = arith.constant 0 : index
    %c0_19 = arith.constant 0 : index
    %25 = vector.load %arg7[%c0_18, %c0_19] : memref<300x256xf32, #tpu.memory_space<vmem>>, vector<300x256xf32>
    %cst_20 = arith.constant dense<0.000000e+00> : vector<16x256xf32>
    %26 = tpu.matmul %24, %25, %cst_20 {dimension_numbers = #tpu.dot_dimension_numbers<[1], [0], [0], [1], [0, 0, 1, 1], [], []>} : vector<16x300xf32>, vector<300x256xf32>, vector<16x256xf32> -> vector<16x256xf32>
    %c0_21 = arith.constant 0 : index
    %c0_22 = arith.constant 0 : index
    %27 = vector.load %arg8[%c0_21, %c0_22] : memref<50x256xf32, #tpu.memory_space<vmem>>, vector<50x256xf32>
    %cst_23 = arith.constant dense<0.000000e+00> : vector<16x256xf32>
    %28 = tpu.matmul %22, %27, %cst_23 {dimension_numbers = #tpu.dot_dimension_numbers<[1], [0], [0], [1], [0, 0, 1, 1], [], []>} : vector<16x50xf32>, vector<50x256xf32>, vector<16x256xf32> -> vector<16x256xf32>
    %29 = arith.addf %26, %28 : vector<16x256xf32>
    %30 = vector.broadcast %23 : vector<16x1xf32> to vector<16x256xf32>
    %31 = arith.mulf %30, %29 : vector<16x256xf32>
    %c0_24 = arith.constant 0 : index
    %c0_25 = arith.constant 0 : index
    %32 = vector.load %arg9[%c0_24, %c0_25] : memref<1x256xf32, #tpu.memory_space<vmem>>, vector<1x256xf32>
    %33 = vector.broadcast %32 : vector<1x256xf32> to vector<16x256xf32>
    %34 = arith.addf %31, %33 : vector<16x256xf32>
    %35 = vector.shape_cast %34 : vector<16x256xf32> to vector<2x8x256xf32>
    %c0_26 = arith.constant 0 : index
    %c0_27 = arith.constant 0 : index
    %36 = vector.load %arg2[%c0_26, %c0_27] : memref<2x8xf32, #tpu.memory_space<vmem>>, vector<2x8xf32>
    %c0_28 = arith.constant 0 : index
    %c0_29 = arith.constant 0 : index
    %37 = vector.load %arg10[%c0_28, %c0_29] : memref<32x128xf32, #tpu.memory_space<vmem>>, vector<32x128xf32>
    %c0_30 = arith.constant 0 : index
    %c0_31 = arith.constant 0 : index
    %38 = vector.load %arg11[%c0_30, %c0_31] : memref<32x128xf32, #tpu.memory_space<vmem>>, vector<32x128xf32>
    %cst_32 = arith.constant 0.000000e+00 : f32
    %39 = vector.broadcast %cst_32 : f32 to vector<2x32xf32>
    %40 = vector.extract_strided_slice %36 {offsets = [0, 0], sizes = [2, 1], strides = [1, 1]} : vector<2x8xf32> to vector<2x1xf32>
    %41 = vector.extract_strided_slice %35 {offsets = [0, 0, 0], sizes = [2, 1, 128], strides = [1, 1, 1]} : vector<2x8x256xf32> to vector<2x1x128xf32>
    %42 = vector.shape_cast %41 : vector<2x1x128xf32> to vector<2x128xf32>
    %cst_33 = arith.constant dense<0.000000e+00> : vector<2x128xf32>
    %43 = tpu.matmul %39, %37, %cst_33 {dimension_numbers = #tpu.dot_dimension_numbers<[1], [0], [0], [1], [0, 0, 1, 1], [], []>} : vector<2x32xf32>, vector<32x128xf32>, vector<2x128xf32> -> vector<2x128xf32>
    %44 = arith.addf %42, %43 : vector<2x128xf32>
    %45 = arith.negf %44 : vector<2x128xf32>
    %46 = math.exp %45 : vector<2x128xf32>
    %cst_34 = arith.constant 1.000000e+00 : f32
    %47 = vector.broadcast %cst_34 : f32 to vector<2x128xf32>
    %48 = arith.addf %47, %46 : vector<2x128xf32>
    %49 = arith.divf %47, %48 : vector<2x128xf32>
    %50 = math.tanh %44 : vector<2x128xf32>
    %51 = vector.extract_strided_slice %49 {offsets = [0, 0], sizes = [2, 32], strides = [1, 1]} : vector<2x128xf32> to vector<2x32xf32>
    %52 = vector.extract_strided_slice %49 {offsets = [0, 32], sizes = [2, 32], strides = [1, 1]} : vector<2x128xf32> to vector<2x32xf32>
    %53 = vector.extract_strided_slice %50 {offsets = [0, 64], sizes = [2, 32], strides = [1, 1]} : vector<2x128xf32> to vector<2x32xf32>
    %54 = vector.extract_strided_slice %49 {offsets = [0, 96], sizes = [2, 32], strides = [1, 1]} : vector<2x128xf32> to vector<2x32xf32>
    %55 = arith.mulf %52, %39 : vector<2x32xf32>
    %56 = arith.mulf %51, %53 : vector<2x32xf32>
    %57 = arith.addf %55, %56 : vector<2x32xf32>
    %58 = math.tanh %57 : vector<2x32xf32>
    %59 = arith.mulf %54, %58 : vector<2x32xf32>
    %60 = vector.broadcast %40 : vector<2x1xf32> to vector<2x32xf32>
    %61 = arith.mulf %60, %59 : vector<2x32xf32>
    %cst_35 = arith.constant 1.000000e+00 : f32
    %62 = vector.broadcast %cst_35 : f32 to vector<2x1xf32>
    %63 = arith.subf %62, %40 : vector<2x1xf32>
    %64 = vector.broadcast %63 : vector<2x1xf32> to vector<2x32xf32>
    %65 = arith.mulf %64, %39 : vector<2x32xf32>
    %66 = arith.addf %61, %65 : vector<2x32xf32>
    %67 = vector.broadcast %40 : vector<2x1xf32> to vector<2x32xf32>
    %68 = arith.mulf %67, %57 : vector<2x32xf32>
    %cst_36 = arith.constant 1.000000e+00 : f32
    %69 = vector.broadcast %cst_36 : f32 to vector<2x1xf32>
    %70 = arith.subf %69, %40 : vector<2x1xf32>
    %71 = vector.broadcast %70 : vector<2x1xf32> to vector<2x32xf32>
    %72 = arith.mulf %71, %39 : vector<2x32xf32>
    %73 = arith.addf %68, %72 : vector<2x32xf32>
    %74 = vector.broadcast %40 : vector<2x1xf32> to vector<2x32xf32>
    %75 = arith.mulf %74, %66 : vector<2x32xf32>
    %c0_37 = arith.constant 0 : index
    %c0_38 = arith.constant 0 : index
    %c0_39 = arith.constant 0 : index
    %76 = vector.load %arg18[%c0_37, %c0_38, %c0_39] : memref<2x8x64xf32, #tpu.memory_space<vmem>>, vector<2x1x32xf32>
    %77 = vector.shape_cast %76 : vector<2x1x32xf32> to vector<2x32xf32>
    %78 = vector.shape_cast %75 : vector<2x32xf32> to vector<2x1x32xf32>
    tpu.vector_store %arg18[%c0_37, %c0_38, %c0_39], %78 {strides = array<i32>} : memref<2x8x64xf32, #tpu.memory_space<vmem>>, vector<2x1x32xf32>,
    %79 = vector.extract_strided_slice %36 {offsets = [0, 7], sizes = [2, 1], strides = [1, 1]} : vector<2x8xf32> to vector<2x1xf32>
    %80 = vector.extract_strided_slice %35 {offsets = [0, 7, 128], sizes = [2, 1, 128], strides = [1, 1, 1]} : vector<2x8x256xf32> to vector<2x1x128xf32>
    %81 = vector.shape_cast %80 : vector<2x1x128xf32> to vector<2x128xf32>
    %cst_40 = arith.constant dense<0.000000e+00> : vector<2x128xf32>
    %82 = tpu.matmul %39, %38, %cst_40 {dimension_numbers = #tpu.dot_dimension_numbers<[1], [0], [0], [1], [0, 0, 1, 1], [], []>} : vector<2x32xf32>, vector<32x128xf32>, vector<2x128xf32> -> vector<2x128xf32>
    %83 = arith.addf %81, %82 : vector<2x128xf32>
    %84 = arith.negf %83 : vector<2x128xf32>
    %85 = math.exp %84 : vector<2x128xf32>
    %cst_41 = arith.constant 1.000000e+00 : f32
    %86 = vector.broadcast %cst_41 : f32 to vector<2x128xf32>
    %87 = arith.addf %86, %85 : vector<2x128xf32>
    %88 = arith.divf %86, %87 : vector<2x128xf32>
    %89 = math.tanh %83 : vector<2x128xf32>
    %90 = vector.extract_strided_slice %88 {offsets = [0, 0], sizes = [2, 32], strides = [1, 1]} : vector<2x128xf32> to vector<2x32xf32>
    %91 = vector.extract_strided_slice %88 {offsets = [0, 32], sizes = [2, 32], strides = [1, 1]} : vector<2x128xf32> to vector<2x32xf32>
    %92 = vector.extract_strided_slice %89 {offsets = [0, 64], sizes = [2, 32], strides = [1, 1]} : vector<2x128xf32> to vector<2x32xf32>
    %93 = vector.extract_strided_slice %88 {offsets = [0, 96], sizes = [2, 32], strides = [1, 1]} : vector<2x128xf32> to vector<2x32xf32>
    %94 = arith.mulf %91, %39 : vector<2x32xf32>
    %95 = arith.mulf %90, %92 : vector<2x32xf32>
    %96 = arith.addf %94, %95 : vector<2x32xf32>
    %97 = math.tanh %96 : vector<2x32xf32>
    %98 = arith.mulf %93, %97 : vector<2x32xf32>
    %99 = vector.broadcast %79 : vector<2x1xf32> to vector<2x32xf32>
    %100 = arith.mulf %99, %98 : vector<2x32xf32>
    %cst_42 = arith.constant 1.000000e+00 : f32
    %101 = vector.broadcast %cst_42 : f32 to vector<2x1xf32>
    %102 = arith.subf %101, %79 : vector<2x1xf32>
    %103 = vector.broadcast %102 : vector<2x1xf32> to vector<2x32xf32>
    %104 = arith.mulf %103, %39 : vector<2x32xf32>
    %105 = arith.addf %100, %104 : vector<2x32xf32>
    %106 = vector.broadcast %79 : vector<2x1xf32> to vector<2x32xf32>
    %107 = arith.mulf %106, %96 : vector<2x32xf32>
    %cst_43 = arith.constant 1.000000e+00 : f32
    %108 = vector.broadcast %cst_43 : f32 to vector<2x1xf32>
    %109 = arith.subf %108, %79 : vector<2x1xf32>
    %110 = vector.broadcast %109 : vector<2x1xf32> to vector<2x32xf32>
    %111 = arith.mulf %110, %39 : vector<2x32xf32>
    %112 = arith.addf %107, %111 : vector<2x32xf32>
    %113 = vector.broadcast %79 : vector<2x1xf32> to vector<2x32xf32>
    %114 = arith.mulf %113, %105 : vector<2x32xf32>
    %c0_44 = arith.constant 0 : index
    %c7 = arith.constant 7 : index
    %c32 = arith.constant 32 : index
    %115 = vector.load %arg18[%c0_44, %c7, %c32] : memref<2x8x64xf32, #tpu.memory_space<vmem>>, vector<2x1x32xf32>
    %116 = vector.shape_cast %115 : vector<2x1x32xf32> to vector<2x32xf32>
    %117 = vector.shape_cast %114 : vector<2x32xf32> to vector<2x1x32xf32>
    tpu.vector_store %arg18[%c0_44, %c7, %c32], %117 {strides = array<i32>} : memref<2x8x64xf32, #tpu.memory_space<vmem>>, vector<2x1x32xf32>,
    %118 = vector.extract_strided_slice %36 {offsets = [0, 1], sizes = [2, 1], strides = [1, 1]} : vector<2x8xf32> to vector<2x1xf32>
    %119 = vector.extract_strided_slice %35 {offsets = [0, 1, 0], sizes = [2, 1, 128], strides = [1, 1, 1]} : vector<2x8x256xf32> to vector<2x1x128xf32>
    %120 = vector.shape_cast %119 : vector<2x1x128xf32> to vector<2x128xf32>
    %cst_45 = arith.constant dense<0.000000e+00> : vector<2x128xf32>
    %121 = tpu.matmul %66, %37, %cst_45 {dimension_numbers = #tpu.dot_dimension_numbers<[1], [0], [0], [1], [0, 0, 1, 1], [], []>} : vector<2x32xf32>, vector<32x128xf32>, vector<2x128xf32> -> vector<2x128xf32>
    %122 = arith.addf %120, %121 : vector<2x128xf32>
    %123 = arith.negf %122 : vector<2x128xf32>
    %124 = math.exp %123 : vector<2x128xf32>
    %cst_46 = arith.constant 1.000000e+00 : f32
    %125 = vector.broadcast %cst_46 : f32 to vector<2x128xf32>
    %126 = arith.addf %125, %124 : vector<2x128xf32>
    %127 = arith.divf %125, %126 : vector<2x128xf32>
    %128 = math.tanh %122 : vector<2x128xf32>
    %129 = vector.extract_strided_slice %127 {offsets = [0, 0], sizes = [2, 32], strides = [1, 1]} : vector<2x128xf32> to vector<2x32xf32>
    %130 = vector.extract_strided_slice %127 {offsets = [0, 32], sizes = [2, 32], strides = [1, 1]} : vector<2x128xf32> to vector<2x32xf32>
    %131 = vector.extract_strided_slice %128 {offsets = [0, 64], sizes = [2, 32], strides = [1, 1]} : vector<2x128xf32> to vector<2x32xf32>
    %132 = vector.extract_strided_slice %127 {offsets = [0, 96], sizes = [2, 32], strides = [1, 1]} : vector<2x128xf32> to vector<2x32xf32>
    %133 = arith.mulf %130, %73 : vector<2x32xf32>
    %134 = arith.mulf %129, %131 : vector<2x32xf32>
    %135 = arith.addf %133, %134 : vector<2x32xf32>
    %136 = math.tanh %135 : vector<2x32xf32>
    %137 = arith.mulf %132, %136 : vector<2x32xf32>
    %138 = vector.broadcast %118 : vector<2x1xf32> to vector<2x32xf32>
    %139 = arith.mulf %138, %137 : vector<2x32xf32>
    %cst_47 = arith.constant 1.000000e+00 : f32
    %140 = vector.broadcast %cst_47 : f32 to vector<2x1xf32>
    %141 = arith.subf %140, %118 : vector<2x1xf32>
    %142 = vector.broadcast %141 : vector<2x1xf32> to vector<2x32xf32>
    %143 = arith.mulf %142, %66 : vector<2x32xf32>
    %144 = arith.addf %139, %143 : vector<2x32xf32>
    %145 = vector.broadcast %118 : vector<2x1xf32> to vector<2x32xf32>
    %146 = arith.mulf %145, %135 : vector<2x32xf32>
    %cst_48 = arith.constant 1.000000e+00 : f32
    %147 = vector.broadcast %cst_48 : f32 to vector<2x1xf32>
    %148 = arith.subf %147, %118 : vector<2x1xf32>
    %149 = vector.broadcast %148 : vector<2x1xf32> to vector<2x32xf32>
    %150 = arith.mulf %149, %73 : vector<2x32xf32>
    %151 = arith.addf %146, %150 : vector<2x32xf32>
    %152 = vector.broadcast %118 : vector<2x1xf32> to vector<2x32xf32>
    %153 = arith.mulf %152, %144 : vector<2x32xf32>
    %c0_49 = arith.constant 0 : index
    %c1_50 = arith.constant 1 : index
    %c0_51 = arith.constant 0 : index
    %154 = vector.load %arg18[%c0_49, %c1_50, %c0_51] : memref<2x8x64xf32, #tpu.memory_space<vmem>>, vector<2x1x32xf32>
    %155 = vector.shape_cast %154 : vector<2x1x32xf32> to vector<2x32xf32>
    %156 = vector.shape_cast %153 : vector<2x32xf32> to vector<2x1x32xf32>
    tpu.vector_store %arg18[%c0_49, %c1_50, %c0_51], %156 {strides = array<i32>} : memref<2x8x64xf32, #tpu.memory_space<vmem>>, vector<2x1x32xf32>,
    %157 = vector.extract_strided_slice %36 {offsets = [0, 6], sizes = [2, 1], strides = [1, 1]} : vector<2x8xf32> to vector<2x1xf32>
    %158 = vector.extract_strided_slice %35 {offsets = [0, 6, 128], sizes = [2, 1, 128], strides = [1, 1, 1]} : vector<2x8x256xf32> to vector<2x1x128xf32>
    %159 = vector.shape_cast %158 : vector<2x1x128xf32> to vector<2x128xf32>
    %cst_52 = arith.constant dense<0.000000e+00> : vector<2x128xf32>
    %160 = tpu.matmul %105, %38, %cst_52 {dimension_numbers = #tpu.dot_dimension_numbers<[1], [0], [0], [1], [0, 0, 1, 1], [], []>} : vector<2x32xf32>, vector<32x128xf32>, vector<2x128xf32> -> vector<2x128xf32>
    %161 = arith.addf %159, %160 : vector<2x128xf32>
    %162 = arith.negf %161 : vector<2x128xf32>
    %163 = math.exp %162 : vector<2x128xf32>
    %cst_53 = arith.constant 1.000000e+00 : f32
    %164 = vector.broadcast %cst_53 : f32 to vector<2x128xf32>
    %165 = arith.addf %164, %163 : vector<2x128xf32>
    %166 = arith.divf %164, %165 : vector<2x128xf32>
    %167 = math.tanh %161 : vector<2x128xf32>
    %168 = vector.extract_strided_slice %166 {offsets = [0, 0], sizes = [2, 32], strides = [1, 1]} : vector<2x128xf32> to vector<2x32xf32>
    %169 = vector.extract_strided_slice %166 {offsets = [0, 32], sizes = [2, 32], strides = [1, 1]} : vector<2x128xf32> to vector<2x32xf32>
    %170 = vector.extract_strided_slice %167 {offsets = [0, 64], sizes = [2, 32], strides = [1, 1]} : vector<2x128xf32> to vector<2x32xf32>
    %171 = vector.extract_strided_slice %166 {offsets = [0, 96], sizes = [2, 32], strides = [1, 1]} : vector<2x128xf32> to vector<2x32xf32>
    %172 = arith.mulf %169, %112 : vector<2x32xf32>
    %173 = arith.mulf %168, %170 : vector<2x32xf32>
    %174 = arith.addf %172, %173 : vector<2x32xf32>
    %175 = math.tanh %174 : vector<2x32xf32>
    %176 = arith.mulf %171, %175 : vector<2x32xf32>
    %177 = vector.broadcast %157 : vector<2x1xf32> to vector<2x32xf32>
    %178 = arith.mulf %177, %176 : vector<2x32xf32>
    %cst_54 = arith.constant 1.000000e+00 : f32
    %179 = vector.broadcast %cst_54 : f32 to vector<2x1xf32>
    %180 = arith.subf %179, %157 : vector<2x1xf32>
    %181 = vector.broadcast %180 : vector<2x1xf32> to vector<2x32xf32>
    %182 = arith.mulf %181, %105 : vector<2x32xf32>
    %183 = arith.addf %178, %182 : vector<2x32xf32>
    %184 = vector.broadcast %157 : vector<2x1xf32> to vector<2x32xf32>
    %185 = arith.mulf %184, %174 : vector<2x32xf32>
    %cst_55 = arith.constant 1.000000e+00 : f32
    %186 = vector.broadcast %cst_55 : f32 to vector<2x1xf32>
    %187 = arith.subf %186, %157 : vector<2x1xf32>
    %188 = vector.broadcast %187 : vector<2x1xf32> to vector<2x32xf32>
    %189 = arith.mulf %188, %112 : vector<2x32xf32>
    %190 = arith.addf %185, %189 : vector<2x32xf32>
    %191 = vector.broadcast %157 : vector<2x1xf32> to vector<2x32xf32>
    %192 = arith.mulf %191, %183 : vector<2x32xf32>
    %c0_56 = arith.constant 0 : index
    %c6 = arith.constant 6 : index
    %c32_57 = arith.constant 32 : index
    %193 = vector.load %arg18[%c0_56, %c6, %c32_57] : memref<2x8x64xf32, #tpu.memory_space<vmem>>, vector<2x1x32xf32>
    %194 = vector.shape_cast %193 : vector<2x1x32xf32> to vector<2x32xf32>
    %195 = vector.shape_cast %192 : vector<2x32xf32> to vector<2x1x32xf32>
    tpu.vector_store %arg18[%c0_56, %c6, %c32_57], %195 {strides = array<i32>} : memref<2x8x64xf32, #tpu.memory_space<vmem>>, vector<2x1x32xf32>,
    %196 = vector.extract_strided_slice %36 {offsets = [0, 2], sizes = [2, 1], strides = [1, 1]} : vector<2x8xf32> to vector<2x1xf32>
    %197 = vector.extract_strided_slice %35 {offsets = [0, 2, 0], sizes = [2, 1, 128], strides = [1, 1, 1]} : vector<2x8x256xf32> to vector<2x1x128xf32>
    %198 = vector.shape_cast %197 : vector<2x1x128xf32> to vector<2x128xf32>
    %cst_58 = arith.constant dense<0.000000e+00> : vector<2x128xf32>
    %199 = tpu.matmul %144, %37, %cst_58 {dimension_numbers = #tpu.dot_dimension_numbers<[1], [0], [0], [1], [0, 0, 1, 1], [], []>} : vector<2x32xf32>, vector<32x128xf32>, vector<2x128xf32> -> vector<2x128xf32>
    %200 = arith.addf %198, %199 : vector<2x128xf32>
    %201 = arith.negf %200 : vector<2x128xf32>
    %202 = math.exp %201 : vector<2x128xf32>
    %cst_59 = arith.constant 1.000000e+00 : f32
    %203 = vector.broadcast %cst_59 : f32 to vector<2x128xf32>
    %204 = arith.addf %203, %202 : vector<2x128xf32>
    %205 = arith.divf %203, %204 : vector<2x128xf32>
    %206 = math.tanh %200 : vector<2x128xf32>
    %207 = vector.extract_strided_slice %205 {offsets = [0, 0], sizes = [2, 32], strides = [1, 1]} : vector<2x128xf32> to vector<2x32xf32>
    %208 = vector.extract_strided_slice %205 {offsets = [0, 32], sizes = [2, 32], strides = [1, 1]} : vector<2x128xf32> to vector<2x32xf32>
    %209 = vector.extract_strided_slice %206 {offsets = [0, 64], sizes = [2, 32], strides = [1, 1]} : vector<2x128xf32> to vector<2x32xf32>
    %210 = vector.extract_strided_slice %205 {offsets = [0, 96], sizes = [2, 32], strides = [1, 1]} : vector<2x128xf32> to vector<2x32xf32>
    %211 = arith.mulf %208, %151 : vector<2x32xf32>
    %212 = arith.mulf %207, %209 : vector<2x32xf32>
    %213 = arith.addf %211, %212 : vector<2x32xf32>
    %214 = math.tanh %213 : vector<2x32xf32>
    %215 = arith.mulf %210, %214 : vector<2x32xf32>
    %216 = vector.broadcast %196 : vector<2x1xf32> to vector<2x32xf32>
    %217 = arith.mulf %216, %215 : vector<2x32xf32>
    %cst_60 = arith.constant 1.000000e+00 : f32
    %218 = vector.broadcast %cst_60 : f32 to vector<2x1xf32>
    %219 = arith.subf %218, %196 : vector<2x1xf32>
    %220 = vector.broadcast %219 : vector<2x1xf32> to vector<2x32xf32>
    %221 = arith.mulf %220, %144 : vector<2x32xf32>
    %222 = arith.addf %217, %221 : vector<2x32xf32>
    %223 = vector.broadcast %196 : vector<2x1xf32> to vector<2x32xf32>
    %224 = arith.mulf %223, %213 : vector<2x32xf32>
    %cst_61 = arith.constant 1.000000e+00 : f32
    %225 = vector.broadcast %cst_61 : f32 to vector<2x1xf32>
    %226 = arith.subf %225, %196 : vector<2x1xf32>
    %227 = vector.broadcast %226 : vector<2x1xf32> to vector<2x32xf32>
    %228 = arith.mulf %227, %151 : vector<2x32xf32>
    %229 = arith.addf %224, %228 : vector<2x32xf32>
    %230 = vector.broadcast %196 : vector<2x1xf32> to vector<2x32xf32>
    %231 = arith.mulf %230, %222 : vector<2x32xf32>
    %c0_62 = arith.constant 0 : index
    %c2_63 = arith.constant 2 : index
    %c0_64 = arith.constant 0 : index
    %232 = vector.load %arg18[%c0_62, %c2_63, %c0_64] : memref<2x8x64xf32, #tpu.memory_space<vmem>>, vector<2x1x32xf32>
    %233 = vector.shape_cast %232 : vector<2x1x32xf32> to vector<2x32xf32>
    %234 = vector.shape_cast %231 : vector<2x32xf32> to vector<2x1x32xf32>
    tpu.vector_store %arg18[%c0_62, %c2_63, %c0_64], %234 {strides = array<i32>} : memref<2x8x64xf32, #tpu.memory_space<vmem>>, vector<2x1x32xf32>,
    %235 = vector.extract_strided_slice %36 {offsets = [0, 5], sizes = [2, 1], strides = [1, 1]} : vector<2x8xf32> to vector<2x1xf32>
    %236 = vector.extract_strided_slice %35 {offsets = [0, 5, 128], sizes = [2, 1, 128], strides = [1, 1, 1]} : vector<2x8x256xf32> to vector<2x1x128xf32>
    %237 = vector.shape_cast %236 : vector<2x1x128xf32> to vector<2x128xf32>
    %cst_65 = arith.constant dense<0.000000e+00> : vector<2x128xf32>
    %238 = tpu.matmul %183, %38, %cst_65 {dimension_numbers = #tpu.dot_dimension_numbers<[1], [0], [0], [1], [0, 0, 1, 1], [], []>} : vector<2x32xf32>, vector<32x128xf32>, vector<2x128xf32> -> vector<2x128xf32>
    %239 = arith.addf %237, %238 : vector<2x128xf32>
    %240 = arith.negf %239 : vector<2x128xf32>
    %241 = math.exp %240 : vector<2x128xf32>
    %cst_66 = arith.constant 1.000000e+00 : f32
    %242 = vector.broadcast %cst_66 : f32 to vector<2x128xf32>
    %243 = arith.addf %242, %241 : vector<2x128xf32>
    %244 = arith.divf %242, %243 : vector<2x128xf32>
    %245 = math.tanh %239 : vector<2x128xf32>
    %246 = vector.extract_strided_slice %244 {offsets = [0, 0], sizes = [2, 32], strides = [1, 1]} : vector<2x128xf32> to vector<2x32xf32>
    %247 = vector.extract_strided_slice %244 {offsets = [0, 32], sizes = [2, 32], strides = [1, 1]} : vector<2x128xf32> to vector<2x32xf32>
    %248 = vector.extract_strided_slice %245 {offsets = [0, 64], sizes = [2, 32], strides = [1, 1]} : vector<2x128xf32> to vector<2x32xf32>
    %249 = vector.extract_strided_slice %244 {offsets = [0, 96], sizes = [2, 32], strides = [1, 1]} : vector<2x128xf32> to vector<2x32xf32>
    %250 = arith.mulf %247, %190 : vector<2x32xf32>
    %251 = arith.mulf %246, %248 : vector<2x32xf32>
    %252 = arith.addf %250, %251 : vector<2x32xf32>
    %253 = math.tanh %252 : vector<2x32xf32>
    %254 = arith.mulf %249, %253 : vector<2x32xf32>
    %255 = vector.broadcast %235 : vector<2x1xf32> to vector<2x32xf32>
    %256 = arith.mulf %255, %254 : vector<2x32xf32>
    %cst_67 = arith.constant 1.000000e+00 : f32
    %257 = vector.broadcast %cst_67 : f32 to vector<2x1xf32>
    %258 = arith.subf %257, %235 : vector<2x1xf32>
    %259 = vector.broadcast %258 : vector<2x1xf32> to vector<2x32xf32>
    %260 = arith.mulf %259, %183 : vector<2x32xf32>
    %261 = arith.addf %256, %260 : vector<2x32xf32>
    %262 = vector.broadcast %235 : vector<2x1xf32> to vector<2x32xf32>
    %263 = arith.mulf %262, %252 : vector<2x32xf32>
    %cst_68 = arith.constant 1.000000e+00 : f32
    %264 = vector.broadcast %cst_68 : f32 to vector<2x1xf32>
    %265 = arith.subf %264, %235 : vector<2x1xf32>
    %266 = vector.broadcast %265 : vector<2x1xf32> to vector<2x32xf32>
    %267 = arith.mulf %266, %190 : vector<2x32xf32>
    %268 = arith.addf %263, %267 : vector<2x32xf32>
    %269 = vector.broadcast %235 : vector<2x1xf32> to vector<2x32xf32>
    %270 = arith.mulf %269, %261 : vector<2x32xf32>
    %c0_69 = arith.constant 0 : index
    %c5 = arith.constant 5 : index
    %c32_70 = arith.constant 32 : index
    %271 = vector.load %arg18[%c0_69, %c5, %c32_70] : memref<2x8x64xf32, #tpu.memory_space<vmem>>, vector<2x1x32xf32>
    %272 = vector.shape_cast %271 : vector<2x1x32xf32> to vector<2x32xf32>
    %273 = vector.shape_cast %270 : vector<2x32xf32> to vector<2x1x32xf32>
    tpu.vector_store %arg18[%c0_69, %c5, %c32_70], %273 {strides = array<i32>} : memref<2x8x64xf32, #tpu.memory_space<vmem>>, vector<2x1x32xf32>,
    %274 = vector.extract_strided_slice %36 {offsets = [0, 3], sizes = [2, 1], strides = [1, 1]} : vector<2x8xf32> to vector<2x1xf32>
    %275 = vector.extract_strided_slice %35 {offsets = [0, 3, 0], sizes = [2, 1, 128], strides = [1, 1, 1]} : vector<2x8x256xf32> to vector<2x1x128xf32>
    %276 = vector.shape_cast %275 : vector<2x1x128xf32> to vector<2x128xf32>
    %cst_71 = arith.constant dense<0.000000e+00> : vector<2x128xf32>
    %277 = tpu.matmul %222, %37, %cst_71 {dimension_numbers = #tpu.dot_dimension_numbers<[1], [0], [0], [1], [0, 0, 1, 1], [], []>} : vector<2x32xf32>, vector<32x128xf32>, vector<2x128xf32> -> vector<2x128xf32>
    %278 = arith.addf %276, %277 : vector<2x128xf32>
    %279 = arith.negf %278 : vector<2x128xf32>
    %280 = math.exp %279 : vector<2x128xf32>
    %cst_72 = arith.constant 1.000000e+00 : f32
    %281 = vector.broadcast %cst_72 : f32 to vector<2x128xf32>
    %282 = arith.addf %281, %280 : vector<2x128xf32>
    %283 = arith.divf %281, %282 : vector<2x128xf32>
    %284 = math.tanh %278 : vector<2x128xf32>
    %285 = vector.extract_strided_slice %283 {offsets = [0, 0], sizes = [2, 32], strides = [1, 1]} : vector<2x128xf32> to vector<2x32xf32>
    %286 = vector.extract_strided_slice %283 {offsets = [0, 32], sizes = [2, 32], strides = [1, 1]} : vector<2x128xf32> to vector<2x32xf32>
    %287 = vector.extract_strided_slice %284 {offsets = [0, 64], sizes = [2, 32], strides = [1, 1]} : vector<2x128xf32> to vector<2x32xf32>
    %288 = vector.extract_strided_slice %283 {offsets = [0, 96], sizes = [2, 32], strides = [1, 1]} : vector<2x128xf32> to vector<2x32xf32>
    %289 = arith.mulf %286, %229 : vector<2x32xf32>
    %290 = arith.mulf %285, %287 : vector<2x32xf32>
    %291 = arith.addf %289, %290 : vector<2x32xf32>
    %292 = math.tanh %291 : vector<2x32xf32>
    %293 = arith.mulf %288, %292 : vector<2x32xf32>
    %294 = vector.broadcast %274 : vector<2x1xf32> to vector<2x32xf32>
    %295 = arith.mulf %294, %293 : vector<2x32xf32>
    %cst_73 = arith.constant 1.000000e+00 : f32
    %296 = vector.broadcast %cst_73 : f32 to vector<2x1xf32>
    %297 = arith.subf %296, %274 : vector<2x1xf32>
    %298 = vector.broadcast %297 : vector<2x1xf32> to vector<2x32xf32>
    %299 = arith.mulf %298, %222 : vector<2x32xf32>
    %300 = arith.addf %295, %299 : vector<2x32xf32>
    %301 = vector.broadcast %274 : vector<2x1xf32> to vector<2x32xf32>
    %302 = arith.mulf %301, %291 : vector<2x32xf32>
    %cst_74 = arith.constant 1.000000e+00 : f32
    %303 = vector.broadcast %cst_74 : f32 to vector<2x1xf32>
    %304 = arith.subf %303, %274 : vector<2x1xf32>
    %305 = vector.broadcast %304 : vector<2x1xf32> to vector<2x32xf32>
    %306 = arith.mulf %305, %229 : vector<2x32xf32>
    %307 = arith.addf %302, %306 : vector<2x32xf32>
    %308 = vector.broadcast %274 : vector<2x1xf32> to vector<2x32xf32>
    %309 = arith.mulf %308, %300 : vector<2x32xf32>
    %c0_75 = arith.constant 0 : index
    %c3 = arith.constant 3 : index
    %c0_76 = arith.constant 0 : index
    %310 = vector.load %arg18[%c0_75, %c3, %c0_76] : memref<2x8x64xf32, #tpu.memory_space<vmem>>, vector<2x1x32xf32>
    %311 = vector.shape_cast %310 : vector<2x1x32xf32> to vector<2x32xf32>
    %312 = vector.shape_cast %309 : vector<2x32xf32> to vector<2x1x32xf32>
    tpu.vector_store %arg18[%c0_75, %c3, %c0_76], %312 {strides = array<i32>} : memref<2x8x64xf32, #tpu.memory_space<vmem>>, vector<2x1x32xf32>,
    %313 = vector.extract_strided_slice %36 {offsets = [0, 4], sizes = [2, 1], strides = [1, 1]} : vector<2x8xf32> to vector<2x1xf32>
    %314 = vector.extract_strided_slice %35 {offsets = [0, 4, 128], sizes = [2, 1, 128], strides = [1, 1, 1]} : vector<2x8x256xf32> to vector<2x1x128xf32>
    %315 = vector.shape_cast %314 : vector<2x1x128xf32> to vector<2x128xf32>
    %cst_77 = arith.constant dense<0.000000e+00> : vector<2x128xf32>
    %316 = tpu.matmul %261, %38, %cst_77 {dimension_numbers = #tpu.dot_dimension_numbers<[1], [0], [0], [1], [0, 0, 1, 1], [], []>} : vector<2x32xf32>, vector<32x128xf32>, vector<2x128xf32> -> vector<2x128xf32>
    %317 = arith.addf %315, %316 : vector<2x128xf32>
    %318 = arith.negf %317 : vector<2x128xf32>
    %319 = math.exp %318 : vector<2x128xf32>
    %cst_78 = arith.constant 1.000000e+00 : f32
    %320 = vector.broadcast %cst_78 : f32 to vector<2x128xf32>
    %321 = arith.addf %320, %319 : vector<2x128xf32>
    %322 = arith.divf %320, %321 : vector<2x128xf32>
    %323 = math.tanh %317 : vector<2x128xf32>
    %324 = vector.extract_strided_slice %322 {offsets = [0, 0], sizes = [2, 32], strides = [1, 1]} : vector<2x128xf32> to vector<2x32xf32>
    %325 = vector.extract_strided_slice %322 {offsets = [0, 32], sizes = [2, 32], strides = [1, 1]} : vector<2x128xf32> to vector<2x32xf32>
    %326 = vector.extract_strided_slice %323 {offsets = [0, 64], sizes = [2, 32], strides = [1, 1]} : vector<2x128xf32> to vector<2x32xf32>
    %327 = vector.extract_strided_slice %322 {offsets = [0, 96], sizes = [2, 32], strides = [1, 1]} : vector<2x128xf32> to vector<2x32xf32>
    %328 = arith.mulf %325, %268 : vector<2x32xf32>
    %329 = arith.mulf %324, %326 : vector<2x32xf32>
    %330 = arith.addf %328, %329 : vector<2x32xf32>
    %331 = math.tanh %330 : vector<2x32xf32>
    %332 = arith.mulf %327, %331 : vector<2x32xf32>
    %333 = vector.broadcast %313 : vector<2x1xf32> to vector<2x32xf32>
    %334 = arith.mulf %333, %332 : vector<2x32xf32>
    %cst_79 = arith.constant 1.000000e+00 : f32
    %335 = vector.broadcast %cst_79 : f32 to vector<2x1xf32>
    %336 = arith.subf %335, %313 : vector<2x1xf32>
    %337 = vector.broadcast %336 : vector<2x1xf32> to vector<2x32xf32>
    %338 = arith.mulf %337, %261 : vector<2x32xf32>
    %339 = arith.addf %334, %338 : vector<2x32xf32>
    %340 = vector.broadcast %313 : vector<2x1xf32> to vector<2x32xf32>
    %341 = arith.mulf %340, %330 : vector<2x32xf32>
    %cst_80 = arith.constant 1.000000e+00 : f32
    %342 = vector.broadcast %cst_80 : f32 to vector<2x1xf32>
    %343 = arith.subf %342, %313 : vector<2x1xf32>
    %344 = vector.broadcast %343 : vector<2x1xf32> to vector<2x32xf32>
    %345 = arith.mulf %344, %268 : vector<2x32xf32>
    %346 = arith.addf %341, %345 : vector<2x32xf32>
    %347 = vector.broadcast %313 : vector<2x1xf32> to vector<2x32xf32>
    %348 = arith.mulf %347, %339 : vector<2x32xf32>
    %c0_81 = arith.constant 0 : index
    %c4 = arith.constant 4 : index
    %c32_82 = arith.constant 32 : index
    %349 = vector.load %arg18[%c0_81, %c4, %c32_82] : memref<2x8x64xf32, #tpu.memory_space<vmem>>, vector<2x1x32xf32>
    %350 = vector.shape_cast %349 : vector<2x1x32xf32> to vector<2x32xf32>
    %351 = vector.shape_cast %348 : vector<2x32xf32> to vector<2x1x32xf32>
    tpu.vector_store %arg18[%c0_81, %c4, %c32_82], %351 {strides = array<i32>} : memref<2x8x64xf32, #tpu.memory_space<vmem>>, vector<2x1x32xf32>,
    %352 = vector.extract_strided_slice %36 {offsets = [0, 4], sizes = [2, 1], strides = [1, 1]} : vector<2x8xf32> to vector<2x1xf32>
    %353 = vector.extract_strided_slice %35 {offsets = [0, 4, 0], sizes = [2, 1, 128], strides = [1, 1, 1]} : vector<2x8x256xf32> to vector<2x1x128xf32>
    %354 = vector.shape_cast %353 : vector<2x1x128xf32> to vector<2x128xf32>
    %cst_83 = arith.constant dense<0.000000e+00> : vector<2x128xf32>
    %355 = tpu.matmul %300, %37, %cst_83 {dimension_numbers = #tpu.dot_dimension_numbers<[1], [0], [0], [1], [0, 0, 1, 1], [], []>} : vector<2x32xf32>, vector<32x128xf32>, vector<2x128xf32> -> vector<2x128xf32>
    %356 = arith.addf %354, %355 : vector<2x128xf32>
    %357 = arith.negf %356 : vector<2x128xf32>
    %358 = math.exp %357 : vector<2x128xf32>
    %cst_84 = arith.constant 1.000000e+00 : f32
    %359 = vector.broadcast %cst_84 : f32 to vector<2x128xf32>
    %360 = arith.addf %359, %358 : vector<2x128xf32>
    %361 = arith.divf %359, %360 : vector<2x128xf32>
    %362 = math.tanh %356 : vector<2x128xf32>
    %363 = vector.extract_strided_slice %361 {offsets = [0, 0], sizes = [2, 32], strides = [1, 1]} : vector<2x128xf32> to vector<2x32xf32>
    %364 = vector.extract_strided_slice %361 {offsets = [0, 32], sizes = [2, 32], strides = [1, 1]} : vector<2x128xf32> to vector<2x32xf32>
    %365 = vector.extract_strided_slice %362 {offsets = [0, 64], sizes = [2, 32], strides = [1, 1]} : vector<2x128xf32> to vector<2x32xf32>
    %366 = vector.extract_strided_slice %361 {offsets = [0, 96], sizes = [2, 32], strides = [1, 1]} : vector<2x128xf32> to vector<2x32xf32>
    %367 = arith.mulf %364, %307 : vector<2x32xf32>
    %368 = arith.mulf %363, %365 : vector<2x32xf32>
    %369 = arith.addf %367, %368 : vector<2x32xf32>
    %370 = math.tanh %369 : vector<2x32xf32>
    %371 = arith.mulf %366, %370 : vector<2x32xf32>
    %372 = vector.broadcast %352 : vector<2x1xf32> to vector<2x32xf32>
    %373 = arith.mulf %372, %371 : vector<2x32xf32>
    %cst_85 = arith.constant 1.000000e+00 : f32
    %374 = vector.broadcast %cst_85 : f32 to vector<2x1xf32>
    %375 = arith.subf %374, %352 : vector<2x1xf32>
    %376 = vector.broadcast %375 : vector<2x1xf32> to vector<2x32xf32>
    %377 = arith.mulf %376, %300 : vector<2x32xf32>
    %378 = arith.addf %373, %377 : vector<2x32xf32>
    %379 = vector.broadcast %352 : vector<2x1xf32> to vector<2x32xf32>
    %380 = arith.mulf %379, %369 : vector<2x32xf32>
    %cst_86 = arith.constant 1.000000e+00 : f32
    %381 = vector.broadcast %cst_86 : f32 to vector<2x1xf32>
    %382 = arith.subf %381, %352 : vector<2x1xf32>
    %383 = vector.broadcast %382 : vector<2x1xf32> to vector<2x32xf32>
    %384 = arith.mulf %383, %307 : vector<2x32xf32>
    %385 = arith.addf %380, %384 : vector<2x32xf32>
    %386 = vector.broadcast %352 : vector<2x1xf32> to vector<2x32xf32>
    %387 = arith.mulf %386, %378 : vector<2x32xf32>
    %c0_87 = arith.constant 0 : index
    %c4_88 = arith.constant 4 : index
    %c0_89 = arith.constant 0 : index
    %388 = vector.load %arg18[%c0_87, %c4_88, %c0_89] : memref<2x8x64xf32, #tpu.memory_space<vmem>>, vector<2x1x32xf32>
    %389 = vector.shape_cast %388 : vector<2x1x32xf32> to vector<2x32xf32>
    %390 = vector.shape_cast %387 : vector<2x32xf32> to vector<2x1x32xf32>
    tpu.vector_store %arg18[%c0_87, %c4_88, %c0_89], %390 {strides = array<i32>} : memref<2x8x64xf32, #tpu.memory_space<vmem>>, vector<2x1x32xf32>,
    %391 = vector.extract_strided_slice %36 {offsets = [0, 3], sizes = [2, 1], strides = [1, 1]} : vector<2x8xf32> to vector<2x1xf32>
    %392 = vector.extract_strided_slice %35 {offsets = [0, 3, 128], sizes = [2, 1, 128], strides = [1, 1, 1]} : vector<2x8x256xf32> to vector<2x1x128xf32>
    %393 = vector.shape_cast %392 : vector<2x1x128xf32> to vector<2x128xf32>
    %cst_90 = arith.constant dense<0.000000e+00> : vector<2x128xf32>
    %394 = tpu.matmul %339, %38, %cst_90 {dimension_numbers = #tpu.dot_dimension_numbers<[1], [0], [0], [1], [0, 0, 1, 1], [], []>} : vector<2x32xf32>, vector<32x128xf32>, vector<2x128xf32> -> vector<2x128xf32>
    %395 = arith.addf %393, %394 : vector<2x128xf32>
    %396 = arith.negf %395 : vector<2x128xf32>
    %397 = math.exp %396 : vector<2x128xf32>
    %cst_91 = arith.constant 1.000000e+00 : f32
    %398 = vector.broadcast %cst_91 : f32 to vector<2x128xf32>
    %399 = arith.addf %398, %397 : vector<2x128xf32>
    %400 = arith.divf %398, %399 : vector<2x128xf32>
    %401 = math.tanh %395 : vector<2x128xf32>
    %402 = vector.extract_strided_slice %400 {offsets = [0, 0], sizes = [2, 32], strides = [1, 1]} : vector<2x128xf32> to vector<2x32xf32>
    %403 = vector.extract_strided_slice %400 {offsets = [0, 32], sizes = [2, 32], strides = [1, 1]} : vector<2x128xf32> to vector<2x32xf32>
    %404 = vector.extract_strided_slice %401 {offsets = [0, 64], sizes = [2, 32], strides = [1, 1]} : vector<2x128xf32> to vector<2x32xf32>
    %405 = vector.extract_strided_slice %400 {offsets = [0, 96], sizes = [2, 32], strides = [1, 1]} : vector<2x128xf32> to vector<2x32xf32>
    %406 = arith.mulf %403, %346 : vector<2x32xf32>
    %407 = arith.mulf %402, %404 : vector<2x32xf32>
    %408 = arith.addf %406, %407 : vector<2x32xf32>
    %409 = math.tanh %408 : vector<2x32xf32>
    %410 = arith.mulf %405, %409 : vector<2x32xf32>
    %411 = vector.broadcast %391 : vector<2x1xf32> to vector<2x32xf32>
    %412 = arith.mulf %411, %410 : vector<2x32xf32>
    %cst_92 = arith.constant 1.000000e+00 : f32
    %413 = vector.broadcast %cst_92 : f32 to vector<2x1xf32>
    %414 = arith.subf %413, %391 : vector<2x1xf32>
    %415 = vector.broadcast %414 : vector<2x1xf32> to vector<2x32xf32>
    %416 = arith.mulf %415, %339 : vector<2x32xf32>
    %417 = arith.addf %412, %416 : vector<2x32xf32>
    %418 = vector.broadcast %391 : vector<2x1xf32> to vector<2x32xf32>
    %419 = arith.mulf %418, %408 : vector<2x32xf32>
    %cst_93 = arith.constant 1.000000e+00 : f32
    %420 = vector.broadcast %cst_93 : f32 to vector<2x1xf32>
    %421 = arith.subf %420, %391 : vector<2x1xf32>
    %422 = vector.broadcast %421 : vector<2x1xf32> to vector<2x32xf32>
    %423 = arith.mulf %422, %346 : vector<2x32xf32>
    %424 = arith.addf %419, %423 : vector<2x32xf32>
    %425 = vector.broadcast %391 : vector<2x1xf32> to vector<2x32xf32>
    %426 = arith.mulf %425, %417 : vector<2x32xf32>
    %c0_94 = arith.constant 0 : index
    %c3_95 = arith.constant 3 : index
    %c32_96 = arith.constant 32 : index
    %427 = vector.load %arg18[%c0_94, %c3_95, %c32_96] : memref<2x8x64xf32, #tpu.memory_space<vmem>>, vector<2x1x32xf32>
    %428 = vector.shape_cast %427 : vector<2x1x32xf32> to vector<2x32xf32>
    %429 = vector.shape_cast %426 : vector<2x32xf32> to vector<2x1x32xf32>
    tpu.vector_store %arg18[%c0_94, %c3_95, %c32_96], %429 {strides = array<i32>} : memref<2x8x64xf32, #tpu.memory_space<vmem>>, vector<2x1x32xf32>,
    %430 = vector.extract_strided_slice %36 {offsets = [0, 5], sizes = [2, 1], strides = [1, 1]} : vector<2x8xf32> to vector<2x1xf32>
    %431 = vector.extract_strided_slice %35 {offsets = [0, 5, 0], sizes = [2, 1, 128], strides = [1, 1, 1]} : vector<2x8x256xf32> to vector<2x1x128xf32>
    %432 = vector.shape_cast %431 : vector<2x1x128xf32> to vector<2x128xf32>
    %cst_97 = arith.constant dense<0.000000e+00> : vector<2x128xf32>
    %433 = tpu.matmul %378, %37, %cst_97 {dimension_numbers = #tpu.dot_dimension_numbers<[1], [0], [0], [1], [0, 0, 1, 1], [], []>} : vector<2x32xf32>, vector<32x128xf32>, vector<2x128xf32> -> vector<2x128xf32>
    %434 = arith.addf %432, %433 : vector<2x128xf32>
    %435 = arith.negf %434 : vector<2x128xf32>
    %436 = math.exp %435 : vector<2x128xf32>
    %cst_98 = arith.constant 1.000000e+00 : f32
    %437 = vector.broadcast %cst_98 : f32 to vector<2x128xf32>
    %438 = arith.addf %437, %436 : vector<2x128xf32>
    %439 = arith.divf %437, %438 : vector<2x128xf32>
    %440 = math.tanh %434 : vector<2x128xf32>
    %441 = vector.extract_strided_slice %439 {offsets = [0, 0], sizes = [2, 32], strides = [1, 1]} : vector<2x128xf32> to vector<2x32xf32>
    %442 = vector.extract_strided_slice %439 {offsets = [0, 32], sizes = [2, 32], strides = [1, 1]} : vector<2x128xf32> to vector<2x32xf32>
    %443 = vector.extract_strided_slice %440 {offsets = [0, 64], sizes = [2, 32], strides = [1, 1]} : vector<2x128xf32> to vector<2x32xf32>
    %444 = vector.extract_strided_slice %439 {offsets = [0, 96], sizes = [2, 32], strides = [1, 1]} : vector<2x128xf32> to vector<2x32xf32>
    %445 = arith.mulf %442, %385 : vector<2x32xf32>
    %446 = arith.mulf %441, %443 : vector<2x32xf32>
    %447 = arith.addf %445, %446 : vector<2x32xf32>
    %448 = math.tanh %447 : vector<2x32xf32>
    %449 = arith.mulf %444, %448 : vector<2x32xf32>
    %450 = vector.broadcast %430 : vector<2x1xf32> to vector<2x32xf32>
    %451 = arith.mulf %450, %449 : vector<2x32xf32>
    %cst_99 = arith.constant 1.000000e+00 : f32
    %452 = vector.broadcast %cst_99 : f32 to vector<2x1xf32>
    %453 = arith.subf %452, %430 : vector<2x1xf32>
    %454 = vector.broadcast %453 : vector<2x1xf32> to vector<2x32xf32>
    %455 = arith.mulf %454, %378 : vector<2x32xf32>
    %456 = arith.addf %451, %455 : vector<2x32xf32>
    %457 = vector.broadcast %430 : vector<2x1xf32> to vector<2x32xf32>
    %458 = arith.mulf %457, %447 : vector<2x32xf32>
    %cst_100 = arith.constant 1.000000e+00 : f32
    %459 = vector.broadcast %cst_100 : f32 to vector<2x1xf32>
    %460 = arith.subf %459, %430 : vector<2x1xf32>
    %461 = vector.broadcast %460 : vector<2x1xf32> to vector<2x32xf32>
    %462 = arith.mulf %461, %385 : vector<2x32xf32>
    %463 = arith.addf %458, %462 : vector<2x32xf32>
    %464 = vector.broadcast %430 : vector<2x1xf32> to vector<2x32xf32>
    %465 = arith.mulf %464, %456 : vector<2x32xf32>
    %c0_101 = arith.constant 0 : index
    %c5_102 = arith.constant 5 : index
    %c0_103 = arith.constant 0 : index
    %466 = vector.load %arg18[%c0_101, %c5_102, %c0_103] : memref<2x8x64xf32, #tpu.memory_space<vmem>>, vector<2x1x32xf32>
    %467 = vector.shape_cast %466 : vector<2x1x32xf32> to vector<2x32xf32>
    %468 = vector.shape_cast %465 : vector<2x32xf32> to vector<2x1x32xf32>
    tpu.vector_store %arg18[%c0_101, %c5_102, %c0_103], %468 {strides = array<i32>} : memref<2x8x64xf32, #tpu.memory_space<vmem>>, vector<2x1x32xf32>,
    %469 = vector.extract_strided_slice %36 {offsets = [0, 2], sizes = [2, 1], strides = [1, 1]} : vector<2x8xf32> to vector<2x1xf32>
    %470 = vector.extract_strided_slice %35 {offsets = [0, 2, 128], sizes = [2, 1, 128], strides = [1, 1, 1]} : vector<2x8x256xf32> to vector<2x1x128xf32>
    %471 = vector.shape_cast %470 : vector<2x1x128xf32> to vector<2x128xf32>
    %cst_104 = arith.constant dense<0.000000e+00> : vector<2x128xf32>
    %472 = tpu.matmul %417, %38, %cst_104 {dimension_numbers = #tpu.dot_dimension_numbers<[1], [0], [0], [1], [0, 0, 1, 1], [], []>} : vector<2x32xf32>, vector<32x128xf32>, vector<2x128xf32> -> vector<2x128xf32>
    %473 = arith.addf %471, %472 : vector<2x128xf32>
    %474 = arith.negf %473 : vector<2x128xf32>
    %475 = math.exp %474 : vector<2x128xf32>
    %cst_105 = arith.constant 1.000000e+00 : f32
    %476 = vector.broadcast %cst_105 : f32 to vector<2x128xf32>
    %477 = arith.addf %476, %475 : vector<2x128xf32>
    %478 = arith.divf %476, %477 : vector<2x128xf32>
    %479 = math.tanh %473 : vector<2x128xf32>
    %480 = vector.extract_strided_slice %478 {offsets = [0, 0], sizes = [2, 32], strides = [1, 1]} : vector<2x128xf32> to vector<2x32xf32>
    %481 = vector.extract_strided_slice %478 {offsets = [0, 32], sizes = [2, 32], strides = [1, 1]} : vector<2x128xf32> to vector<2x32xf32>
    %482 = vector.extract_strided_slice %479 {offsets = [0, 64], sizes = [2, 32], strides = [1, 1]} : vector<2x128xf32> to vector<2x32xf32>
    %483 = vector.extract_strided_slice %478 {offsets = [0, 96], sizes = [2, 32], strides = [1, 1]} : vector<2x128xf32> to vector<2x32xf32>
    %484 = arith.mulf %481, %424 : vector<2x32xf32>
    %485 = arith.mulf %480, %482 : vector<2x32xf32>
    %486 = arith.addf %484, %485 : vector<2x32xf32>
    %487 = math.tanh %486 : vector<2x32xf32>
    %488 = arith.mulf %483, %487 : vector<2x32xf32>
    %489 = vector.broadcast %469 : vector<2x1xf32> to vector<2x32xf32>
    %490 = arith.mulf %489, %488 : vector<2x32xf32>
    %cst_106 = arith.constant 1.000000e+00 : f32
    %491 = vector.broadcast %cst_106 : f32 to vector<2x1xf32>
    %492 = arith.subf %491, %469 : vector<2x1xf32>
    %493 = vector.broadcast %492 : vector<2x1xf32> to vector<2x32xf32>
    %494 = arith.mulf %493, %417 : vector<2x32xf32>
    %495 = arith.addf %490, %494 : vector<2x32xf32>
    %496 = vector.broadcast %469 : vector<2x1xf32> to vector<2x32xf32>
    %497 = arith.mulf %496, %486 : vector<2x32xf32>
    %cst_107 = arith.constant 1.000000e+00 : f32
    %498 = vector.broadcast %cst_107 : f32 to vector<2x1xf32>
    %499 = arith.subf %498, %469 : vector<2x1xf32>
    %500 = vector.broadcast %499 : vector<2x1xf32> to vector<2x32xf32>
    %501 = arith.mulf %500, %424 : vector<2x32xf32>
    %502 = arith.addf %497, %501 : vector<2x32xf32>
    %503 = vector.broadcast %469 : vector<2x1xf32> to vector<2x32xf32>
    %504 = arith.mulf %503, %495 : vector<2x32xf32>
    %c0_108 = arith.constant 0 : index
    %c2_109 = arith.constant 2 : index
    %c32_110 = arith.constant 32 : index
    %505 = vector.load %arg18[%c0_108, %c2_109, %c32_110] : memref<2x8x64xf32, #tpu.memory_space<vmem>>, vector<2x1x32xf32>
    %506 = vector.shape_cast %505 : vector<2x1x32xf32> to vector<2x32xf32>
    %507 = vector.shape_cast %504 : vector<2x32xf32> to vector<2x1x32xf32>
    tpu.vector_store %arg18[%c0_108, %c2_109, %c32_110], %507 {strides = array<i32>} : memref<2x8x64xf32, #tpu.memory_space<vmem>>, vector<2x1x32xf32>,
    %508 = vector.extract_strided_slice %36 {offsets = [0, 6], sizes = [2, 1], strides = [1, 1]} : vector<2x8xf32> to vector<2x1xf32>
    %509 = vector.extract_strided_slice %35 {offsets = [0, 6, 0], sizes = [2, 1, 128], strides = [1, 1, 1]} : vector<2x8x256xf32> to vector<2x1x128xf32>
    %510 = vector.shape_cast %509 : vector<2x1x128xf32> to vector<2x128xf32>
    %cst_111 = arith.constant dense<0.000000e+00> : vector<2x128xf32>
    %511 = tpu.matmul %456, %37, %cst_111 {dimension_numbers = #tpu.dot_dimension_numbers<[1], [0], [0], [1], [0, 0, 1, 1], [], []>} : vector<2x32xf32>, vector<32x128xf32>, vector<2x128xf32> -> vector<2x128xf32>
    %512 = arith.addf %510, %511 : vector<2x128xf32>
    %513 = arith.negf %512 : vector<2x128xf32>
    %514 = math.exp %513 : vector<2x128xf32>
    %cst_112 = arith.constant 1.000000e+00 : f32
    %515 = vector.broadcast %cst_112 : f32 to vector<2x128xf32>
    %516 = arith.addf %515, %514 : vector<2x128xf32>
    %517 = arith.divf %515, %516 : vector<2x128xf32>
    %518 = math.tanh %512 : vector<2x128xf32>
    %519 = vector.extract_strided_slice %517 {offsets = [0, 0], sizes = [2, 32], strides = [1, 1]} : vector<2x128xf32> to vector<2x32xf32>
    %520 = vector.extract_strided_slice %517 {offsets = [0, 32], sizes = [2, 32], strides = [1, 1]} : vector<2x128xf32> to vector<2x32xf32>
    %521 = vector.extract_strided_slice %518 {offsets = [0, 64], sizes = [2, 32], strides = [1, 1]} : vector<2x128xf32> to vector<2x32xf32>
    %522 = vector.extract_strided_slice %517 {offsets = [0, 96], sizes = [2, 32], strides = [1, 1]} : vector<2x128xf32> to vector<2x32xf32>
    %523 = arith.mulf %520, %463 : vector<2x32xf32>
    %524 = arith.mulf %519, %521 : vector<2x32xf32>
    %525 = arith.addf %523, %524 : vector<2x32xf32>
    %526 = math.tanh %525 : vector<2x32xf32>
    %527 = arith.mulf %522, %526 : vector<2x32xf32>
    %528 = vector.broadcast %508 : vector<2x1xf32> to vector<2x32xf32>
    %529 = arith.mulf %528, %527 : vector<2x32xf32>
    %cst_113 = arith.constant 1.000000e+00 : f32
    %530 = vector.broadcast %cst_113 : f32 to vector<2x1xf32>
    %531 = arith.subf %530, %508 : vector<2x1xf32>
    %532 = vector.broadcast %531 : vector<2x1xf32> to vector<2x32xf32>
    %533 = arith.mulf %532, %456 : vector<2x32xf32>
    %534 = arith.addf %529, %533 : vector<2x32xf32>
    %535 = vector.broadcast %508 : vector<2x1xf32> to vector<2x32xf32>
    %536 = arith.mulf %535, %525 : vector<2x32xf32>
    %cst_114 = arith.constant 1.000000e+00 : f32
    %537 = vector.broadcast %cst_114 : f32 to vector<2x1xf32>
    %538 = arith.subf %537, %508 : vector<2x1xf32>
    %539 = vector.broadcast %538 : vector<2x1xf32> to vector<2x32xf32>
    %540 = arith.mulf %539, %463 : vector<2x32xf32>
    %541 = arith.addf %536, %540 : vector<2x32xf32>
    %542 = vector.broadcast %508 : vector<2x1xf32> to vector<2x32xf32>
    %543 = arith.mulf %542, %534 : vector<2x32xf32>
    %c0_115 = arith.constant 0 : index
    %c6_116 = arith.constant 6 : index
    %c0_117 = arith.constant 0 : index
    %544 = vector.load %arg18[%c0_115, %c6_116, %c0_117] : memref<2x8x64xf32, #tpu.memory_space<vmem>>, vector<2x1x32xf32>
    %545 = vector.shape_cast %544 : vector<2x1x32xf32> to vector<2x32xf32>
    %546 = vector.shape_cast %543 : vector<2x32xf32> to vector<2x1x32xf32>
    tpu.vector_store %arg18[%c0_115, %c6_116, %c0_117], %546 {strides = array<i32>} : memref<2x8x64xf32, #tpu.memory_space<vmem>>, vector<2x1x32xf32>,
    %547 = vector.extract_strided_slice %36 {offsets = [0, 1], sizes = [2, 1], strides = [1, 1]} : vector<2x8xf32> to vector<2x1xf32>
    %548 = vector.extract_strided_slice %35 {offsets = [0, 1, 128], sizes = [2, 1, 128], strides = [1, 1, 1]} : vector<2x8x256xf32> to vector<2x1x128xf32>
    %549 = vector.shape_cast %548 : vector<2x1x128xf32> to vector<2x128xf32>
    %cst_118 = arith.constant dense<0.000000e+00> : vector<2x128xf32>
    %550 = tpu.matmul %495, %38, %cst_118 {dimension_numbers = #tpu.dot_dimension_numbers<[1], [0], [0], [1], [0, 0, 1, 1], [], []>} : vector<2x32xf32>, vector<32x128xf32>, vector<2x128xf32> -> vector<2x128xf32>
    %551 = arith.addf %549, %550 : vector<2x128xf32>
    %552 = arith.negf %551 : vector<2x128xf32>
    %553 = math.exp %552 : vector<2x128xf32>
    %cst_119 = arith.constant 1.000000e+00 : f32
    %554 = vector.broadcast %cst_119 : f32 to vector<2x128xf32>
    %555 = arith.addf %554, %553 : vector<2x128xf32>
    %556 = arith.divf %554, %555 : vector<2x128xf32>
    %557 = math.tanh %551 : vector<2x128xf32>
    %558 = vector.extract_strided_slice %556 {offsets = [0, 0], sizes = [2, 32], strides = [1, 1]} : vector<2x128xf32> to vector<2x32xf32>
    %559 = vector.extract_strided_slice %556 {offsets = [0, 32], sizes = [2, 32], strides = [1, 1]} : vector<2x128xf32> to vector<2x32xf32>
    %560 = vector.extract_strided_slice %557 {offsets = [0, 64], sizes = [2, 32], strides = [1, 1]} : vector<2x128xf32> to vector<2x32xf32>
    %561 = vector.extract_strided_slice %556 {offsets = [0, 96], sizes = [2, 32], strides = [1, 1]} : vector<2x128xf32> to vector<2x32xf32>
    %562 = arith.mulf %559, %502 : vector<2x32xf32>
    %563 = arith.mulf %558, %560 : vector<2x32xf32>
    %564 = arith.addf %562, %563 : vector<2x32xf32>
    %565 = math.tanh %564 : vector<2x32xf32>
    %566 = arith.mulf %561, %565 : vector<2x32xf32>
    %567 = vector.broadcast %547 : vector<2x1xf32> to vector<2x32xf32>
    %568 = arith.mulf %567, %566 : vector<2x32xf32>
    %cst_120 = arith.constant 1.000000e+00 : f32
    %569 = vector.broadcast %cst_120 : f32 to vector<2x1xf32>
    %570 = arith.subf %569, %547 : vector<2x1xf32>
    %571 = vector.broadcast %570 : vector<2x1xf32> to vector<2x32xf32>
    %572 = arith.mulf %571, %495 : vector<2x32xf32>
    %573 = arith.addf %568, %572 : vector<2x32xf32>
    %574 = vector.broadcast %547 : vector<2x1xf32> to vector<2x32xf32>
    %575 = arith.mulf %574, %564 : vector<2x32xf32>
    %cst_121 = arith.constant 1.000000e+00 : f32
    %576 = vector.broadcast %cst_121 : f32 to vector<2x1xf32>
    %577 = arith.subf %576, %547 : vector<2x1xf32>
    %578 = vector.broadcast %577 : vector<2x1xf32> to vector<2x32xf32>
    %579 = arith.mulf %578, %502 : vector<2x32xf32>
    %580 = arith.addf %575, %579 : vector<2x32xf32>
    %581 = vector.broadcast %547 : vector<2x1xf32> to vector<2x32xf32>
    %582 = arith.mulf %581, %573 : vector<2x32xf32>
    %c0_122 = arith.constant 0 : index
    %c1_123 = arith.constant 1 : index
    %c32_124 = arith.constant 32 : index
    %583 = vector.load %arg18[%c0_122, %c1_123, %c32_124] : memref<2x8x64xf32, #tpu.memory_space<vmem>>, vector<2x1x32xf32>
    %584 = vector.shape_cast %583 : vector<2x1x32xf32> to vector<2x32xf32>
    %585 = vector.shape_cast %582 : vector<2x32xf32> to vector<2x1x32xf32>
    tpu.vector_store %arg18[%c0_122, %c1_123, %c32_124], %585 {strides = array<i32>} : memref<2x8x64xf32, #tpu.memory_space<vmem>>, vector<2x1x32xf32>,
    %586 = vector.extract_strided_slice %36 {offsets = [0, 7], sizes = [2, 1], strides = [1, 1]} : vector<2x8xf32> to vector<2x1xf32>
    %587 = vector.extract_strided_slice %35 {offsets = [0, 7, 0], sizes = [2, 1, 128], strides = [1, 1, 1]} : vector<2x8x256xf32> to vector<2x1x128xf32>
    %588 = vector.shape_cast %587 : vector<2x1x128xf32> to vector<2x128xf32>
    %cst_125 = arith.constant dense<0.000000e+00> : vector<2x128xf32>
    %589 = tpu.matmul %534, %37, %cst_125 {dimension_numbers = #tpu.dot_dimension_numbers<[1], [0], [0], [1], [0, 0, 1, 1], [], []>} : vector<2x32xf32>, vector<32x128xf32>, vector<2x128xf32> -> vector<2x128xf32>
    %590 = arith.addf %588, %589 : vector<2x128xf32>
    %591 = arith.negf %590 : vector<2x128xf32>
    %592 = math.exp %591 : vector<2x128xf32>
    %cst_126 = arith.constant 1.000000e+00 : f32
    %593 = vector.broadcast %cst_126 : f32 to vector<2x128xf32>
    %594 = arith.addf %593, %592 : vector<2x128xf32>
    %595 = arith.divf %593, %594 : vector<2x128xf32>
    %596 = math.tanh %590 : vector<2x128xf32>
    %597 = vector.extract_strided_slice %595 {offsets = [0, 0], sizes = [2, 32], strides = [1, 1]} : vector<2x128xf32> to vector<2x32xf32>
    %598 = vector.extract_strided_slice %595 {offsets = [0, 32], sizes = [2, 32], strides = [1, 1]} : vector<2x128xf32> to vector<2x32xf32>
    %599 = vector.extract_strided_slice %596 {offsets = [0, 64], sizes = [2, 32], strides = [1, 1]} : vector<2x128xf32> to vector<2x32xf32>
    %600 = vector.extract_strided_slice %595 {offsets = [0, 96], sizes = [2, 32], strides = [1, 1]} : vector<2x128xf32> to vector<2x32xf32>
    %601 = arith.mulf %598, %541 : vector<2x32xf32>
    %602 = arith.mulf %597, %599 : vector<2x32xf32>
    %603 = arith.addf %601, %602 : vector<2x32xf32>
    %604 = math.tanh %603 : vector<2x32xf32>
    %605 = arith.mulf %600, %604 : vector<2x32xf32>
    %606 = vector.broadcast %586 : vector<2x1xf32> to vector<2x32xf32>
    %607 = arith.mulf %606, %605 : vector<2x32xf32>
    %cst_127 = arith.constant 1.000000e+00 : f32
    %608 = vector.broadcast %cst_127 : f32 to vector<2x1xf32>
    %609 = arith.subf %608, %586 : vector<2x1xf32>
    %610 = vector.broadcast %609 : vector<2x1xf32> to vector<2x32xf32>
    %611 = arith.mulf %610, %534 : vector<2x32xf32>
    %612 = arith.addf %607, %611 : vector<2x32xf32>
    %613 = vector.broadcast %586 : vector<2x1xf32> to vector<2x32xf32>
    %614 = arith.mulf %613, %612 : vector<2x32xf32>
    %c0_128 = arith.constant 0 : index
    %c7_129 = arith.constant 7 : index
    %c0_130 = arith.constant 0 : index
    %615 = vector.load %arg18[%c0_128, %c7_129, %c0_130] : memref<2x8x64xf32, #tpu.memory_space<vmem>>, vector<2x1x32xf32>
    %616 = vector.shape_cast %615 : vector<2x1x32xf32> to vector<2x32xf32>
    %617 = vector.shape_cast %614 : vector<2x32xf32> to vector<2x1x32xf32>
    tpu.vector_store %arg18[%c0_128, %c7_129, %c0_130], %617 {strides = array<i32>} : memref<2x8x64xf32, #tpu.memory_space<vmem>>, vector<2x1x32xf32>,
    %618 = vector.extract_strided_slice %36 {offsets = [0, 0], sizes = [2, 1], strides = [1, 1]} : vector<2x8xf32> to vector<2x1xf32>
    %619 = vector.extract_strided_slice %35 {offsets = [0, 0, 128], sizes = [2, 1, 128], strides = [1, 1, 1]} : vector<2x8x256xf32> to vector<2x1x128xf32>
    %620 = vector.shape_cast %619 : vector<2x1x128xf32> to vector<2x128xf32>
    %cst_131 = arith.constant dense<0.000000e+00> : vector<2x128xf32>
    %621 = tpu.matmul %573, %38, %cst_131 {dimension_numbers = #tpu.dot_dimension_numbers<[1], [0], [0], [1], [0, 0, 1, 1], [], []>} : vector<2x32xf32>, vector<32x128xf32>, vector<2x128xf32> -> vector<2x128xf32>
    %622 = arith.addf %620, %621 : vector<2x128xf32>
    %623 = arith.negf %622 : vector<2x128xf32>
    %624 = math.exp %623 : vector<2x128xf32>
    %cst_132 = arith.constant 1.000000e+00 : f32
    %625 = vector.broadcast %cst_132 : f32 to vector<2x128xf32>
    %626 = arith.addf %625, %624 : vector<2x128xf32>
    %627 = arith.divf %625, %626 : vector<2x128xf32>
    %628 = math.tanh %622 : vector<2x128xf32>
    %629 = vector.extract_strided_slice %627 {offsets = [0, 0], sizes = [2, 32], strides = [1, 1]} : vector<2x128xf32> to vector<2x32xf32>
    %630 = vector.extract_strided_slice %627 {offsets = [0, 32], sizes = [2, 32], strides = [1, 1]} : vector<2x128xf32> to vector<2x32xf32>
    %631 = vector.extract_strided_slice %628 {offsets = [0, 64], sizes = [2, 32], strides = [1, 1]} : vector<2x128xf32> to vector<2x32xf32>
    %632 = vector.extract_strided_slice %627 {offsets = [0, 96], sizes = [2, 32], strides = [1, 1]} : vector<2x128xf32> to vector<2x32xf32>
    %633 = arith.mulf %630, %580 : vector<2x32xf32>
    %634 = arith.mulf %629, %631 : vector<2x32xf32>
    %635 = arith.addf %633, %634 : vector<2x32xf32>
    %636 = math.tanh %635 : vector<2x32xf32>
    %637 = arith.mulf %632, %636 : vector<2x32xf32>
    %638 = vector.broadcast %618 : vector<2x1xf32> to vector<2x32xf32>
    %639 = arith.mulf %638, %637 : vector<2x32xf32>
    %cst_133 = arith.constant 1.000000e+00 : f32
    %640 = vector.broadcast %cst_133 : f32 to vector<2x1xf32>
    %641 = arith.subf %640, %618 : vector<2x1xf32>
    %642 = vector.broadcast %641 : vector<2x1xf32> to vector<2x32xf32>
    %643 = arith.mulf %642, %573 : vector<2x32xf32>
    %644 = arith.addf %639, %643 : vector<2x32xf32>
    %645 = vector.broadcast %618 : vector<2x1xf32> to vector<2x32xf32>
    %646 = arith.mulf %645, %644 : vector<2x32xf32>
    %c0_134 = arith.constant 0 : index
    %c0_135 = arith.constant 0 : index
    %c32_136 = arith.constant 32 : index
    %647 = vector.load %arg18[%c0_134, %c0_135, %c32_136] : memref<2x8x64xf32, #tpu.memory_space<vmem>>, vector<2x1x32xf32>
    %648 = vector.shape_cast %647 : vector<2x1x32xf32> to vector<2x32xf32>
    %649 = vector.shape_cast %646 : vector<2x32xf32> to vector<2x1x32xf32>
    tpu.vector_store %arg18[%c0_134, %c0_135, %c32_136], %649 {strides = array<i32>} : memref<2x8x64xf32, #tpu.memory_space<vmem>>, vector<2x1x32xf32>,
    %c0_137 = arith.constant 0 : index
    %c0_138 = arith.constant 0 : index
    %c0_139 = arith.constant 0 : index
    %650 = vector.load %arg18[%c0_137, %c0_138, %c0_139] : memref<2x8x64xf32, #tpu.memory_space<vmem>>, vector<2x8x64xf32>
    %651 = vector.shape_cast %650 : vector<2x8x64xf32> to vector<16x64xf32>
    %c0_140 = arith.constant 0 : index
    %c0_141 = arith.constant 0 : index
    %652 = vector.load %arg12[%c0_140, %c0_141] : memref<64x128xf32, #tpu.memory_space<vmem>>, vector<64x128xf32>
    %cst_142 = arith.constant dense<0.000000e+00> : vector<16x128xf32>
    %653 = tpu.matmul %651, %652, %cst_142 {dimension_numbers = #tpu.dot_dimension_numbers<[1], [0], [0], [1], [0, 0, 1, 1], [], []>} : vector<16x64xf32>, vector<64x128xf32>, vector<16x128xf32> -> vector<16x128xf32>
    %c0_143 = arith.constant 0 : index
    %c0_144 = arith.constant 0 : index
    %654 = vector.load %arg13[%c0_143, %c0_144] : memref<1x128xf32, #tpu.memory_space<vmem>>, vector<1x128xf32>
    %655 = vector.broadcast %654 : vector<1x128xf32> to vector<16x128xf32>
    %656 = arith.addf %653, %655 : vector<16x128xf32>
    %657 = vector.extract_strided_slice %656 {offsets = [0, 0], sizes = [16, 64], strides = [1, 1]} : vector<16x128xf32> to vector<16x64xf32>
    %cst_145 = arith.constant 0.000000e+00 : f32
    %658 = vector.broadcast %cst_145 : f32 to vector<16x64xf32>
    %659 = arith.maximumf %657, %658 : vector<16x64xf32>
    %660 = vector.extract_strided_slice %656 {offsets = [0, 64], sizes = [16, 64], strides = [1, 1]} : vector<16x128xf32> to vector<16x64xf32>
    %661 = arith.negf %660 : vector<16x64xf32>
    %662 = math.exp %661 : vector<16x64xf32>
    %cst_146 = arith.constant 1.000000e+00 : f32
    %663 = vector.broadcast %cst_146 : f32 to vector<16x64xf32>
    %664 = arith.addf %663, %662 : vector<16x64xf32>
    %665 = arith.divf %663, %664 : vector<16x64xf32>
    %666 = arith.mulf %665, %651 : vector<16x64xf32>
    %cst_147 = arith.constant 1.000000e+00 : f32
    %667 = vector.broadcast %cst_147 : f32 to vector<16x64xf32>
    %668 = arith.subf %667, %665 : vector<16x64xf32>
    %669 = arith.mulf %668, %659 : vector<16x64xf32>
    %670 = arith.addf %666, %669 : vector<16x64xf32>
    %c0_148 = arith.constant 0 : index
    %c0_149 = arith.constant 0 : index
    %671 = vector.load %arg14[%c0_148, %c0_149] : memref<64x10xf32, #tpu.memory_space<vmem>>, vector<64x10xf32>
    %cst_150 = arith.constant dense<0.000000e+00> : vector<16x10xf32>
    %672 = tpu.matmul %670, %671, %cst_150 {dimension_numbers = #tpu.dot_dimension_numbers<[1], [0], [0], [1], [0, 0, 1, 1], [], []>} : vector<16x64xf32>, vector<64x10xf32>, vector<16x10xf32> -> vector<16x10xf32>
    %c0_151 = arith.constant 0 : index
    %c0_152 = arith.constant 0 : index
    %673 = vector.load %arg15[%c0_151, %c0_152] : memref<1x10xf32, #tpu.memory_space<vmem>>, vector<1x10xf32>
    %674 = vector.broadcast %673 : vector<1x10xf32> to vector<16x10xf32>
    %675 = arith.addf %672, %674 : vector<16x10xf32>
    %676 = vector.shape_cast %675 : vector<16x10xf32> to vector<2x8x10xf32>
    %c0_153 = arith.constant 0 : index
    %c0_154 = arith.constant 0 : index
    %c0_155 = arith.constant 0 : index
    %677 = vector.load %arg17[%c0_153, %c0_154, %c0_155] : memref<2x8x10xf32, #tpu.memory_space<vmem>>, vector<2x8x10xf32>
    tpu.vector_store %arg17[%c0_153, %c0_154, %c0_155], %676 {strides = array<i32>} : memref<2x8x10xf32, #tpu.memory_space<vmem>>, vector<2x8x10xf32>,
    %c0_156 = arith.constant 0 : index
    %c0_157 = arith.constant 0 : index
    %678 = vector.load %arg4[%c0_156, %c0_157] : memref<16x1xi32, #tpu.memory_space<vmem>>, vector<16x1xi32>
    %cst_158 = arith.constant dense<0xFF800000> : vector<16xf32>
    %679 = vector.multi_reduction <maximumf>, %675, %cst_158 [1] : vector<16x10xf32> to vector<16xf32>
    %680 = vector.shape_cast %679 : vector<16xf32> to vector<16x1xf32>
    %681 = vector.broadcast %680 : vector<16x1xf32> to vector<16x10xf32>
    %682 = arith.subf %675, %681 : vector<16x10xf32>
    %683 = math.exp %682 : vector<16x10xf32>
    %cst_159 = arith.constant dense<0.000000e+00> : vector<16xf32>
    %684 = vector.multi_reduction <add>, %683, %cst_159 [1] : vector<16x10xf32> to vector<16xf32>
    %685 = vector.shape_cast %684 : vector<16xf32> to vector<16x1xf32>
    %686 = math.log %685 : vector<16x1xf32>
    %687 = arith.addf %680, %686 : vector<16x1xf32>
    %688 = tpu.iota {dimensions = array<i32: 1>} : vector<16x10xi32>
    %689 = vector.broadcast %678 : vector<16x1xi32> to vector<16x10xi32>
    %690 = arith.cmpi eq, %688, %689 : vector<16x10xi32>
    %691 = arith.extui %690 : vector<16x10xi1> to vector<16x10xi32>
    %692 = arith.sitofp %691 : vector<16x10xi32> to vector<16x10xf32>
    %693 = arith.mulf %675, %692 : vector<16x10xf32>
    %cst_160 = arith.constant dense<0.000000e+00> : vector<16xf32>
    %694 = vector.multi_reduction <add>, %693, %cst_160 [1] : vector<16x10xf32> to vector<16xf32>
    %695 = vector.shape_cast %694 : vector<16xf32> to vector<16x1xf32>
    %c0_i32 = arith.constant 0 : i32
    %696 = vector.broadcast %c0_i32 : i32 to vector<16x1xi32>
    %697 = arith.cmpi ne, %678, %696 : vector<16x1xi32>
    %698 = arith.extui %697 : vector<16x1xi1> to vector<16x1xi32>
    %699 = arith.sitofp %698 : vector<16x1xi32> to vector<16x1xf32>
    %700 = arith.mulf %23, %699 : vector<16x1xf32>
    %701 = arith.subf %687, %695 : vector<16x1xf32>
    %702 = arith.mulf %701, %700 : vector<16x1xf32>
    %703 = vector.shape_cast %702 : vector<16x1xf32> to vector<1x16x1xf32>
    %cst_161 = arith.constant dense<0.000000e+00> : vector<1xf32>
    %704 = vector.multi_reduction <add>, %703, %cst_161 [1, 2] : vector<1x16x1xf32> to vector<1xf32>
    %705 = vector.shape_cast %704 : vector<1xf32> to vector<1x1x1xf32>
    %706 = vector.extract %705[0, 0, 0] : f32 from vector<1x1x1xf32>
    %707 = vector.shape_cast %700 : vector<16x1xf32> to vector<1x16x1xf32>
    %cst_162 = arith.constant dense<0.000000e+00> : vector<1xf32>
    %708 = vector.multi_reduction <add>, %707, %cst_162 [1, 2] : vector<1x16x1xf32> to vector<1xf32>
    %709 = vector.shape_cast %708 : vector<1xf32> to vector<1x1x1xf32>
    %710 = vector.extract %709[0, 0, 0] : f32 from vector<1x1x1xf32>
    %711 = arith.divf %706, %710 : f32
    %c0_163 = arith.constant 0 : index
    %c0_164 = arith.constant 0 : index
    %712 = memref.load %arg16[%c0_163, %c0_164] : memref<1x1xf32, #tpu.memory_space<smem>>
    memref.store %711, %arg16[%c0_163, %c0_164] : memref<1x1xf32, #tpu.memory_space<smem>>
    return
  }
}

</mosaic_0001>

<bundles_post_ra>
// kernel: bilstmcrf_forward.1
= control target key start
LH: loop header
LB: loop body
LE: loop exit
PB: predicated region body
PF: predicated region fallthrough
CT: control target
= control target key end

     0   :  { %s6131_s0 = inlined_call_operand.vmem [shape: f32[16,300], index: 0, kind: input, shape index: {}]   ;;  %s6132_s1 = inlined_call_operand.vmem [shape: f32[16,16,30], index: 1, kind: input, shape index: {}]   ;;  %s6133_s2 = inlined_call_operand.vmem [shape: f32[2,8], index: 2, kind: input, shape index: {}]   ;;  %s6134_s3 = inlined_call_operand.vmem [shape: f32[16,1], index: 3, kind: input, shape index: {}]   ;;  %s6135_s4 = inlined_call_operand.vmem [shape: s32[16,1], index: 4, kind: input, shape index: {}]   ;;  %s6136_s5 = inlined_call_operand.vmem [shape: f32[3,30,50], index: 5, kind: input, shape index: {}]   ;;  %s6137_s6 = inlined_call_operand.vmem [shape: f32[1,50], index: 6, kind: input, shape index: {}]   ;;  %s6138_s7 = inlined_call_operand.vmem [shape: f32[300,256], index: 7, kind: input, shape index: {}]   ;;  %s6139_s8 = inlined_call_operand.vmem [shape: f32[50,256], index: 8, kind: input, shape index: {}]   ;;  %s6140_s9 = inlined_call_operand.vmem [shape: f32[1,256], index: 9, kind: input, shape index: {}]   ;;  %s6141_s10 = inlined_call_operand.vmem [shape: f32[32,128], index: 10, kind: input, shape index: {}]   ;;  %s6142_s11 = inlined_call_operand.vmem [shape: f32[32,128], index: 11, kind: input, shape index: {}]   ;;  %s6143_s12 = inlined_call_operand.vmem [shape: f32[64,128], index: 12, kind: input, shape index: {}]   ;;  %s6144_s13 = inlined_call_operand.vmem [shape: f32[1,128], index: 13, kind: input, shape index: {}]   ;;  %s6145_s14 = inlined_call_operand.vmem [shape: f32[64,10], index: 14, kind: input, shape index: {}]   ;;  %s6146_s15 = inlined_call_operand.vmem [shape: f32[1,10], index: 15, kind: input, shape index: {}]   ;;  %s6147_s16 = inlined_call_operand.hbm [shape: f32[1,1], index: 16, kind: output, shape index: {0}]   ;;  %s6148_s17 = inlined_call_operand.hbm [shape: f32[2,8,10], index: 17, kind: output, shape index: {1}]  }
   0x1   :  { %6151 = sst [smem:[#allocation9_spill]] %s6131_s0 }
   0x2   :  { %6152 = sst [smem:[#allocation10_spill]] %s6132_s1 }
   0x3   :  { %23 = vsyncpa [#allocation5], 0  ;;  %v92_v0 = vld [vmem:[%s6136_s5 + $0x18] sm:$0x3f]  ;;  %vm190_vm0 = vcmask 1045504   ;;  %v91_v1 = vld [vmem:[%s6136_s5 + $0x10] sm:$0xff] }
   0x4   :  { %4071 = vmatpush.msk.msra.mxu2 %vm190_vm0, %v92_v0  ;;  %v3932_v2 = vld [vmem:[%s6136_s5 + $0x38] sm:$0x3f]  ;;  %v3931_v3 = vld [vmem:[%s6136_s5 + $0x30] sm:$0xff]  ;;  %3896 = vmatpush.msk.msra.mxu0 %vm190_vm0, %v92_v0  ;;  %v90_v4 = vld [vmem:[%s6136_s5 + $0x8] sm:$0xff]  ;;  %s6153_s25 = sld [smem:[#allocation10_spill]]  ;;  %vm93_vm1 = vcmask 244736  }
   0x5   :  { %3933 = vmatpush.msk.msra.mxu1 %vm190_vm0, %v3932_v2  ;;  %v3930_v5 = vld [vmem:[%s6136_s5 + $0x28] sm:$0xff]  ;;  %v89_v6 = vld [vmem:[%s6136_s5] sm:$0xff]  ;;  %v3969_v8 = vld [vmem:[%s6136_s5 + $0x58] sm:$0x3f] }
   0x6   :  { %4072 = vmatpush.msra.mxu2 %v91_v1  ;;  %207 = vmatpush.msra.mxu0 %v91_v1  ;;  %v3929_v9 = vld [vmem:[%s6136_s5 + $0x20] sm:$0xff] }
   0x7   :  { %312 = vmatpush.msra.mxu1 %v3931_v3 }
   0x8   :  { %4073 = vmatpush.msra.mxu2 %v90_v4  ;;  %208 = vmatpush.msra.mxu0 %v90_v4 }
   0x9   :  { %313 = vmatpush.msra.mxu1 %v3930_v5 }
   0xa   :  { %v4572_v7 = vld [vmem:[%s6153_s25 + $0xf8] sm:$0xff]  ;;  %v57_v10 = vld [vmem:[%s6153_s25] sm:$0xff] }
   0xb   :  { %24 = vsyncpa [#allocation4], 0  ;;  %4074 = vmatpush.msra.mxu2 %v89_v6  ;;  %209 = vmatpush.msra.mxu0 %v89_v6  ;;  %v3968_v11 = vld [vmem:[%s6136_s5 + $0x50] sm:$0xff]  ;;  %v3967_v12 = vld [vmem:[%s6136_s5 + $0x48] sm:$0xff]  ;;  %vm565_vm2 = vcmask 1046528   ;;  %vm758_vm3 = vcmask 408576  }
   0xc   :  { %3928 = vmatmul.msk.f32.vlgmr.msra.gmra.mxu2 %vm93_vm1, %v4572_v7  ;;  %314 = vmatpush.msra.mxu1 %v3929_v9  ;;  %v3966_v13 = vld [vmem:[%s6136_s5 + $0x40] sm:$0xff]  ;;  %v58_v14 = vld [vmem:[%s6153_s25 + $0x8] sm:$0xff]  ;;  %v59_v15 = vld [vmem:[%s6153_s25 + $0x10] sm:$0xff]  ;;  %vm1006_vm4 = vcmask 1041409   ;;  %vm1009_vm5 = vcmask 1042434   ;;  %vm1012_vm6 = vcmask 1043459  }
   0xd   :  { %3970 = vmatpush.msk.msrb.mxu2 %vm190_vm0, %v3969_v8  ;;  %3934 = vmatmul.msk.f32.vlgmr.msra.gmra.mxu1 %vm93_vm1, %v57_v10  ;;  %v60_v16 = vld [vmem:[%s6153_s25 + $0x18] sm:$0xff]  ;;  %v61_v17 = vld [vmem:[%s6153_s25 + $0x20] sm:$0xff]  ;;  %v62_v18 = vld [vmem:[%s6153_s25 + $0x28] sm:$0xff]  ;;  %vm1044_vm7 = vcmask 1041408   ;;  %vm1015_vm8 = vcmask 1044484   ;;  %vm1018_vm9 = vcmask 1045509  }
   0xe   :  { %3897 = vmatmul.msk.f32.vlgmr.msra.gmra.mxu0 %vm93_vm1, %v57_v10  ;;  %v63_v19 = vld [vmem:[%s6153_s25 + $0x30] sm:$0xff]  ;;  %v64_v20 = vld [vmem:[%s6153_s25 + $0x38] sm:$0xff]  ;;  %v65_v21 = vld [vmem:[%s6153_s25 + $0x40] sm:$0xff]  ;;  %vm1021_vm10 = vcmask 1046534   ;;  %vm1024_vm11 = vcmask 1047559   ;;  %s6154_s29 = sld [smem:[#allocation9_spill]] }
   0xf   :  { %433 = vmatpush.msrb.mxu2 %v3968_v11  ;;  %v66_v22 = vld [vmem:[%s6153_s25 + $0x48] sm:$0xff]  ;;  %v67_v23 = vld [vmem:[%s6153_s25 + $0x50] sm:$0xff]  ;;  %v68_v24 = vld [vmem:[%s6153_s25 + $0x58] sm:$0xff]  ;;  %vm1104_vm12 = vcmask 1043456   ;;  %vm1097_vm13 = vcmask 359424   ;;  %s3878_s30 = sshll.u32 %s6148_s17, 4  ;;  %s3879_s30 = int_to_ptr.hbm [resolvable:$true] %s3878_s30 }
  0x10   :  { %v69_v25 = vld [vmem:[%s6153_s25 + $0x60] sm:$0xff]  ;;  %v70_v26 = vld [vmem:[%s6153_s25 + $0x68] sm:$0xff]  ;;  %v71_v27 = vld [vmem:[%s6153_s25 + $0x70] sm:$0xff]  ;;  %s4452_s18 = smov 128   ;;  %s4453_s19 = smov 8  }
  0x11   :  { %434 = vmatpush.msrb.mxu2 %v3967_v12  ;;  %v72_v28 = vld [vmem:[%s6153_s25 + $0x78] sm:$0xff]  ;;  %v73_v30 = vld [vmem:[%s6153_s25 + $0x80] sm:$0xff]  ;;  %v74_v34 = vld [vmem:[%s6153_s25 + $0x88] sm:$0xff]  ;;  %s3868_s20 = sshll.u32 %s6147_s16, 4  ;;  %s4454_s23 = smov [#allocation3]   ;;  %s3869_s20 = int_to_ptr.hbm [resolvable:$true] %s3868_s20 }
  0x12   :  { %v75_v40 = vld [vmem:[%s6153_s25 + $0x90] sm:$0xff]  ;;  %v76_v49 = vld [vmem:[%s6153_s25 + $0x98] sm:$0xff]  ;;  %v77_v57 = vld [vmem:[%s6153_s25 + $0xa0] sm:$0xff] }
  0x13   :  { %435 = vmatpush.msrb.mxu2 %v3966_v13  ;;  %v78_v4 = vld [vmem:[%s6153_s25 + $0xa8] sm:$0xff] }
  0x14   :  { %3971 = vmatmul.msk.f32.vlgmr.msrb.gmra.mxu2 %vm93_vm1, %v57_v10 }
  0x15   :  { %3935 = vmatmul.msk.f32.gmra.mxu1 %vm93_vm1, %v58_v14 }
  0x16   :  { %3898 = vmatmul.msk.f32.gmra.mxu0 %vm93_vm1, %v58_v14 }
  0x1c   :  { %3972 = vmatmul.msk.f32.gmra.mxu2 %vm93_vm1, %v58_v14 }
  0x1d   :  { %3936 = vmatmul.msk.f32.gmra.mxu1 %vm93_vm1, %v59_v15 }
  0x1e   :  { %3899 = vmatmul.msk.f32.gmra.mxu0 %vm93_vm1, %v59_v15 }
  0x24   :  { %3973 = vmatmul.msk.f32.gmra.mxu2 %vm93_vm1, %v59_v15 }
  0x25   :  { %3937 = vmatmul.msk.f32.gmra.mxu1 %vm93_vm1, %v60_v16 }
  0x26   :  { %3900 = vmatmul.msk.f32.gmra.mxu0 %vm93_vm1, %v60_v16 }
  0x2c   :  { %3974 = vmatmul.msk.f32.gmra.mxu2 %vm93_vm1, %v60_v16 }
  0x2d   :  { %3938 = vmatmul.msk.f32.gmra.mxu1 %vm93_vm1, %v61_v17 }
  0x2e   :  { %3901 = vmatmul.msk.f32.gmra.mxu0 %vm93_vm1, %v61_v17 }
  0x34   :  { %3975 = vmatmul.msk.f32.gmra.mxu2 %vm93_vm1, %v61_v17 }
  0x35   :  { %3939 = vmatmul.msk.f32.gmra.mxu1 %vm93_vm1, %v62_v18 }
  0x36   :  { %3902 = vmatmul.msk.f32.gmra.mxu0 %vm93_vm1, %v62_v18 }
  0x3c   :  { %3976 = vmatmul.msk.f32.gmra.mxu2 %vm93_vm1, %v62_v18  ;;  %v79_v18 = vld [vmem:[%s6153_s25 + $0xb0] sm:$0xff] }
  0x3d   :  { %3940 = vmatmul.msk.f32.gmra.mxu1 %vm93_vm1, %v63_v19 }
  0x3e   :  { %3903 = vmatmul.msk.f32.gmra.mxu0 %vm93_vm1, %v63_v19 }
  0x44   :  { %3977 = vmatmul.msk.f32.gmra.mxu2 %vm93_vm1, %v63_v19 }
  0x45   :  { %3941 = vmatmul.msk.f32.gmra.mxu1 %vm93_vm1, %v64_v20 }
  0x46   :  { %3904 = vmatmul.msk.f32.gmra.mxu0 %vm93_vm1, %v64_v20 }
  0x4c   :  { %3978 = vmatmul.msk.f32.gmra.mxu2 %vm93_vm1, %v64_v20 }
  0x4d   :  { %3942 = vmatmul.msk.f32.gmra.mxu1 %vm93_vm1, %v65_v21 }
  0x4e   :  { %3905 = vmatmul.msk.f32.gmra.mxu0 %vm93_vm1, %v65_v21 }
  0x54   :  { %3979 = vmatmul.msk.f32.gmra.mxu2 %vm93_vm1, %v65_v21 }
  0x55   :  { %3943 = vmatmul.msk.f32.gmra.mxu1 %vm93_vm1, %v66_v22 }
  0x56   :  { %3906 = vmatmul.msk.f32.gmra.mxu0 %vm93_vm1, %v66_v22 }
  0x5c   :  { %3980 = vmatmul.msk.f32.gmra.mxu2 %vm93_vm1, %v66_v22 }
  0x5d   :  { %3944 = vmatmul.msk.f32.gmra.mxu1 %vm93_vm1, %v67_v23 }
  0x5e   :  { %3907 = vmatmul.msk.f32.gmra.mxu0 %vm93_vm1, %v67_v23 }
  0x64   :  { %3981 = vmatmul.msk.f32.gmra.mxu2 %vm93_vm1, %v67_v23 }
  0x65   :  { %3945 = vmatmul.msk.f32.gmra.mxu1 %vm93_vm1, %v68_v24 }
  0x66   :  { %3908 = vmatmul.msk.f32.gmra.mxu0 %vm93_vm1, %v68_v24 }
  0x6c   :  { %3982 = vmatmul.msk.f32.gmra.mxu2 %vm93_vm1, %v68_v24 }
  0x6d   :  { %3946 = vmatmul.msk.f32.gmra.mxu1 %vm93_vm1, %v69_v25 }
  0x6e   :  { %3909 = vmatmul.msk.f32.gmra.mxu0 %vm93_vm1, %v69_v25 }
  0x74   :  { %3983 = vmatmul.msk.f32.gmra.mxu2 %vm93_vm1, %v69_v25 }
  0x75   :  { %3947 = vmatmul.msk.f32.gmra.mxu1 %vm93_vm1, %v70_v26 }
  0x76   :  { %3910 = vmatmul.msk.f32.gmra.mxu0 %vm93_vm1, %v70_v26 }
  0x7c   :  { %3984 = vmatmul.msk.f32.gmra.mxu2 %vm93_vm1, %v70_v26  ;;  %v4739_v26 = vld [vmem:[%s6137_s6] ss:$0 sm:$0xff]  ;;  %s4444_s6 = smov 96  }
  0x7d   :  { %3948 = vmatmul.msk.f32.gmra.mxu1 %vm93_vm1, %v71_v27 }
  0x7e   :  { %3911 = vmatmul.msk.f32.gmra.mxu0 %vm93_vm1, %v71_v27 }
  0x84   :  { %3985 = vmatmul.msk.f32.gmra.mxu2 %vm93_vm1, %v71_v27 }
  0x85   :  { %3949 = vmatmul.msk.f32.gmra.mxu1 %vm93_vm1, %v72_v28 }
  0x86   :  { %3912 = vmatmul.msk.f32.gmra.mxu0 %vm93_vm1, %v72_v28 }
  0x8a   :  { %v316_v29 = vpop.f32.mrf.mxu1 }
  0x8b   :  { %v211_v31 = vpop.f32.mrf.mxu0  ;;  %v566_v37 = vrot.slane %v316_v29, 1 }
  0x8c   :  { %3986 = vmatmul.msk.f32.gmra.mxu2 %vm93_vm1, %v72_v28 }
  0x8d   :  { %3950 = vmatmul.msk.f32.gmra.mxu1 %vm93_vm1, %v73_v30 }
  0x8e   :  { %3913 = vmatmul.msk.f32.gmra.mxu0 %vm93_vm1, %v73_v30 }
  0x8f   :  { %v289_v32 = vpop.f32.mrf.mxu2 }
  0x92   :  { %v319_v33 = vpop.f32.mrf.mxu1 }
  0x93   :  { %v214_v35 = vpop.f32.mrf.mxu0  ;;  %v567_v38 = vrot.slane %v319_v33, 1 }
  0x94   :  { %3987 = vmatmul.msk.f32.gmra.mxu2 %vm93_vm1, %v73_v30  ;;  %v80_v35 = vld [vmem:[%s6153_s25 + $0xb8] sm:$0xff] }
  0x95   :  { %3951 = vmatmul.msk.f32.gmra.mxu1 %vm93_vm1, %v74_v34  ;;  %v568_v42 = vsel %vm565_vm2, %v566_v37, %v567_v38 }
  0x96   :  { %3914 = vmatmul.msk.f32.gmra.mxu0 %vm93_vm1, %v74_v34  ;;  %v630_v46 = vadd.f32 %v568_v42, %v211_v31 }
  0x97   :  { %v437_v36 = vpop.f32.mrf.mxu2 }
  0x98   :  { %v678_v44 = vrot.slane %v437_v36, 2 }
  0x9a   :  { %v322_v39 = vpop.f32.mrf.mxu1 }
  0x9b   :  { %v216_v41 = vpop.f32.mrf.mxu0  ;;  %v569_v54 = vrot.slane %v322_v39, 1 }
  0x9c   :  { %3988 = vmatmul.msk.f32.gmra.mxu2 %vm93_vm1, %v74_v34 }
  0x9d   :  { %3952 = vmatmul.msk.f32.gmra.mxu1 %vm93_vm1, %v75_v40 }
  0x9e   :  { %3915 = vmatmul.msk.f32.gmra.mxu0 %vm93_vm1, %v75_v40 }
  0x9f   :  { %v440_v43 = vpop.f32.mrf.mxu2 }
  0xa0   :  { %v679_v45 = vrot.slane %v440_v43, 2 }
  0xa2   :  { %v680_v47 = vsel %vm190_vm0, %v678_v44, %v679_v45  ;;  %v325_v48 = vpop.f32.mrf.mxu1 }
  0xa3   :  { %v742_v50 = vadd.f32 %v680_v47, %v630_v46  ;;  %v219_v51 = vpop.f32.mrf.mxu0  ;;  %v570_v55 = vrot.slane %v325_v48, 1 }
  0xa4   :  { %3989 = vmatmul.msk.f32.gmra.mxu2 %vm93_vm1, %v75_v40 }
  0xa5   :  { %3953 = vmatmul.msk.f32.gmra.mxu1 %vm93_vm1, %v76_v49  ;;  %v759_v53 = vsel %vm758_vm3, %v742_v50, -inf  ;;  %v571_v60 = vsel %vm565_vm2, %v569_v54, %v570_v55  ;;  %v81_v50 = vld [vmem:[%s6153_s25 + $0xc0] sm:$0xff] }
  0xa6   :  { %3916 = vmatmul.msk.f32.gmra.mxu0 %vm93_vm1, %v76_v49  ;;  %v760_v59 = vrot.slane %v759_v53, 4  ;;  %v631_v1 = vadd.f32 %v571_v60, %v216_v41 }
  0xa7   :  { %v443_v52 = vpop.f32.mrf.mxu2 }
  0xa8   :  { %v761_v62 = vmax.f32 %v759_v53, %v760_v59  ;;  %v681_v63 = vrot.slane %v443_v52, 2 }
  0xaa   :  { %v328_v56 = vpop.f32.mrf.mxu1  ;;  %v762_v8 = vrot.slane %v761_v62, 2 }
  0xab   :  { %v221_v58 = vpop.f32.mrf.mxu0  ;;  %v572_v14 = vrot.slane %v328_v56, 1 }
  0xac   :  { %3990 = vmatmul.msk.f32.gmra.mxu2 %vm93_vm1, %v76_v49  ;;  %v763_v12 = vmax.f32 %v761_v62, %v762_v8 }
  0xad   :  { %3954 = vmatmul.msk.f32.gmra.mxu1 %vm93_vm1, %v77_v57 }
  0xae   :  { %3917 = vmatmul.msk.f32.gmra.mxu0 %vm93_vm1, %v77_v57  ;;  %v764_v20 = vrot.slane %v763_v12, 1 }
  0xaf   :  { %v446_v61 = vpop.f32.mrf.mxu2 }
  0xb0   :  { %v682_v0 = vrot.slane %v446_v61, 2  ;;  %v765_v25 = vmax.f32 %v763_v12, %v764_v20  ;;  %v82_v61 = vld [vmem:[%s6153_s25 + $0xc8] sm:$0xff] }
  0xb2   :  { %v683_v2 = vsel %vm190_vm0, %v681_v63, %v682_v0  ;;  %v331_v3 = vpop.f32.mrf.mxu1  ;;  %v875_v39 = vadd.f32 %v4739_v26, %v765_v25 }
  0xb3   :  { %v743_v5 = vadd.f32 %v683_v2, %v631_v1  ;;  %v224_v6 = vpop.f32.mrf.mxu0  ;;  %v573_v16 = vrot.slane %v331_v3, 1 }
  0xb4   :  { %3991 = vmatmul.msk.f32.gmra.mxu2 %vm93_vm1, %v77_v57 }
  0xb5   :  { %v766_v9 = vsel %vm758_vm3, %v743_v5, -inf  ;;  %3955 = vmatmul.msk.f32.gmra.mxu1 %vm93_vm1, %v78_v4  ;;  %v574_v23 = vsel %vm565_vm2, %v572_v14, %v573_v16  ;;  %v84_v16 = vld [vmem:[%s6153_s25 + $0xd8] sm:$0xff] }
  0xb6   :  { %v767_v10 = vrot.slane %v766_v9, 4  ;;  %3918 = vmatmul.msk.f32.gmra.mxu0 %vm93_vm1, %v78_v4  ;;  %v632_v30 = vadd.f32 %v574_v23, %v221_v58  ;;  %v85_v23 = vld [vmem:[%s6153_s25 + $0xe0] sm:$0xff] }
  0xb7   :  { %v449_v11 = vpop.f32.mrf.mxu2 }
  0xb8   :  { %v768_v13 = vmax.f32 %v766_v9, %v767_v10  ;;  %v684_v28 = vrot.slane %v449_v11, 2  ;;  %v83_v9 = vld [vmem:[%s6153_s25 + $0xd0] sm:$0xff] }
  0xba   :  { %v769_v15 = vrot.slane %v768_v13, 2  ;;  %v334_v17 = vpop.f32.mrf.mxu1 }
  0xbb   :  { %v226_v19 = vpop.f32.mrf.mxu0  ;;  %v575_v31 = vrot.slane %v334_v17, 1 }
  0xbc   :  { %v770_v21 = vmax.f32 %v768_v13, %v769_v15  ;;  %3992 = vmatmul.msk.f32.gmra.mxu2 %vm93_vm1, %v78_v4 }
  0xbd   :  { %3956 = vmatmul.msk.f32.gmra.mxu1 %vm93_vm1, %v79_v18 }
  0xbe   :  { %v771_v22 = vrot.slane %v770_v21, 1  ;;  %3919 = vmatmul.msk.f32.gmra.mxu0 %vm93_vm1, %v79_v18 }
  0xbf   :  { %v452_v24 = vpop.f32.mrf.mxu2 }
  0xc0   :  { %v772_v27 = vmax.f32 %v770_v21, %v771_v22  ;;  %v685_v29 = vrot.slane %v452_v24, 2 }
  0xc2   :  { %v876_v32 = vadd.f32 %v4739_v26, %v772_v27  ;;  %v686_v33 = vsel %vm190_vm0, %v684_v28, %v685_v29  ;;  %v337_v34 = vpop.f32.mrf.mxu1  ;;  %v86_v28 = vld [vmem:[%s6153_s25 + $0xe8] sm:$0xff] }
  0xc3   :  { %v744_v36 = vadd.f32 %v686_v33, %v632_v30  ;;  %v576_v37 = vrot.slane %v337_v34, 1  ;;  %v229_v38 = vpop.f32.mrf.mxu0 }
  0xc4   :  { %v1005_v40 = vrot.slane %v876_v32, 7  ;;  %3993 = vmatmul.msk.f32.gmra.mxu2 %vm93_vm1, %v79_v18 }
  0xc5   :  { %v773_v41 = vsel %vm758_vm3, %v744_v36, -inf  ;;  %v577_v42 = vsel %vm565_vm2, %v575_v31, %v576_v37  ;;  %3957 = vmatmul.msk.f32.gmra.mxu1 %vm93_vm1, %v80_v35 }
  0xc6   :  { %v774_v43 = vrot.slane %v773_v41, 4  ;;  %v633_v44 = vadd.f32 %v577_v42, %v226_v19  ;;  %3920 = vmatmul.msk.f32.gmra.mxu0 %vm93_vm1, %v80_v35  ;;  %v1007_v45 = vsel %vm1006_vm4, %v1005_v40, %v875_v39  ;;  %v987_v42 = vld [vmem:[%s6139_s8 + $0x60] sm:$0x3] }
  0xc7   :  { %v455_v46 = vpop.f32.mrf.mxu2  ;;  %4003 = vmatpush.msk.msra.mxu3 %vm1044_vm7, %v987_v42 }
  0xc8   :  { %v775_v47 = vmax.f32 %v773_v41, %v774_v43  ;;  %v687_v56 = vrot.slane %v455_v46, 2 }
  0xca   :  { %v776_v48 = vrot.slane %v775_v47, 2  ;;  %v4753_v49 = vpop.f32.mrf.mxu1 }
  0xcb   :  { %v4758_v51 = vpop.f32.mrf.mxu0  ;;  %v578_v29 = vrot.slane %v4753_v49, 1  ;;  %v985_v49 = vld [vmem:[%s6139_s8 + $0x50] sm:$0xff] }
  0xcc   :  { %v777_v52 = vmax.f32 %v775_v47, %v776_v48  ;;  %3994 = vmatmul.msk.f32.gmra.mxu2 %vm93_vm1, %v80_v35  ;;  %v87_v48 = vld [vmem:[%s6153_s25 + $0xf0] sm:$0xff]  ;;  %1061 = vmatpush.msra.mxu3 %v985_v49 }
  0xcd   :  { %3958 = vmatmul.msk.f32.gmra.mxu1 %vm93_vm1, %v81_v50 }
  0xce   :  { %v778_v53 = vrot.slane %v777_v52, 1  ;;  %3921 = vmatmul.msk.f32.gmra.mxu0 %vm93_vm1, %v81_v50 }
  0xcf   :  { %v458_v54 = vpop.f32.mrf.mxu2 }
  0xd0   :  { %v779_v55 = vmax.f32 %v777_v52, %v778_v53  ;;  %v688_v57 = vrot.slane %v458_v54, 2 }
  0xd2   :  { %v877_v58 = vadd.f32 %v4739_v26, %v779_v55  ;;  %v689_v59 = vsel %vm190_vm0, %v687_v56, %v688_v57  ;;  %v343_v60 = vpop.f32.mrf.mxu1  ;;  %v981_v57 = vld [vmem:[%s6139_s8 + $0x30] sm:$0xff] }
  0xd3   :  { %v745_v62 = vadd.f32 %v689_v59, %v633_v44  ;;  %v234_v63 = vpop.f32.mrf.mxu0  ;;  %v579_v30 = vrot.slane %v343_v60, 1 }
  0xd4   :  { %v1008_v0 = vrot.slane %v877_v58, 6  ;;  %3995 = vmatmul.msk.f32.gmra.mxu2 %vm93_vm1, %v81_v50  ;;  %v979_v63 = vld [vmem:[%s6139_s8 + $0x20] sm:$0xff] }
  0xd5   :  { %v780_v1 = vsel %vm758_vm3, %v745_v62, -inf  ;;  %3959 = vmatmul.msk.f32.gmra.mxu1 %vm93_vm1, %v82_v61  ;;  %v580_v37 = vsel %vm565_vm2, %v578_v29, %v579_v30 }
  0xd6   :  { %v781_v2 = vrot.slane %v780_v1, 4  ;;  %3922 = vmatmul.msk.f32.gmra.mxu0 %vm93_vm1, %v82_v61  ;;  %v1010_v3 = vsel %vm1009_vm5, %v1008_v0, %v1007_v45  ;;  %v634_v43 = vadd.f32 %v580_v37, %v4758_v51  ;;  %v983_v51 = vld [vmem:[%s6139_s8 + $0x40] sm:$0xff] }
  0xd7   :  { %v461_v4 = vpop.f32.mrf.mxu2  ;;  %1062 = vmatpush.msra.mxu3 %v983_v51 }
  0xd8   :  { %v782_v5 = vmax.f32 %v780_v1, %v781_v2  ;;  %v690_v36 = vrot.slane %v461_v4, 2 }
  0xd9   :  { %1063 = vmatpush.msra.mxu3 %v981_v57 }
  0xda   :  { %v783_v6 = vrot.slane %v782_v5, 2  ;;  %v346_v8 = vpop.f32.mrf.mxu1 }
  0xdb   :  { %v236_v10 = vpop.f32.mrf.mxu0  ;;  %v581_v32 = vrot.slane %v346_v8, 1  ;;  %1064 = vmatpush.msra.mxu3 %v979_v63 }
  0xdc   :  { %v784_v11 = vmax.f32 %v782_v5, %v783_v6  ;;  %3996 = vmatmul.msk.f32.gmra.mxu2 %vm93_vm1, %v82_v61  ;;  %v977_v5 = vld [vmem:[%s6139_s8 + $0x10] sm:$0xff] }
  0xdd   :  { %3960 = vmatmul.msk.f32.gmra.mxu1 %vm93_vm1, %v83_v9  ;;  %1065 = vmatpush.msra.mxu3 %v977_v5 }
  0xde   :  { %v785_v12 = vrot.slane %v784_v11, 1  ;;  %3923 = vmatmul.msk.f32.gmra.mxu0 %vm93_vm1, %v83_v9 }
  0xdf   :  { %v464_v13 = vpop.f32.mrf.mxu2 }
  0xe0   :  { %v786_v14 = vmax.f32 %v784_v11, %v785_v12  ;;  %v691_v34 = vrot.slane %v464_v13, 2 }
  0xe2   :  { %v349_v15 = vpop.f32.mrf.mxu1  ;;  %v878_v17 = vadd.f32 %v4739_v26, %v786_v14  ;;  %v692_v41 = vsel %vm190_vm0, %v690_v36, %v691_v34 }
  0xe3   :  { %v239_v18 = vpop.f32.mrf.mxu0  ;;  %v582_v33 = vrot.slane %v349_v15, 1  ;;  %v746_v53 = vadd.f32 %v692_v41, %v634_v43 }
  0xe4   :  { %3997 = vmatmul.msk.f32.gmra.mxu2 %vm93_vm1, %v83_v9  ;;  %v1011_v19 = vrot.slane %v878_v17, 5  ;;  %v975_v9 = vld [vmem:[%s6139_s8] sm:$0xff] }
  0xe5   :  { %3961 = vmatmul.msk.f32.gmra.mxu1 %vm93_vm1, %v84_v16  ;;  %v583_v40 = vsel %vm565_vm2, %v581_v32, %v582_v33  ;;  %v787_v58 = vsel %vm758_vm3, %v746_v53, -inf  ;;  %1066 = vmatpush.msra.mxu3 %v975_v9 }
  0xe6   :  { %3924 = vmatmul.msk.f32.gmra.mxu0 %vm93_vm1, %v84_v16  ;;  %v4787_v20 = vsel %vm1012_vm6, %v1011_v19, %v1010_v3  ;;  %v635_v50 = vadd.f32 %v583_v40, %v236_v10  ;;  %v788_v2 = vrot.slane %v787_v58, 4 }
  0xe7   :  { %v467_v21 = vpop.f32.mrf.mxu2 }
  0xe8   :  { %v693_v39 = vrot.slane %v467_v21, 2  ;;  %v789_v11 = vmax.f32 %v787_v58, %v788_v2 }
  0xea   :  { %v352_v22 = vpop.f32.mrf.mxu1  ;;  %v790_v18 = vrot.slane %v789_v11, 2 }
  0xeb   :  { %v241_v24 = vpop.f32.mrf.mxu0  ;;  %v584_v44 = vrot.slane %v352_v22, 1 }
  0xec   :  { %3998 = vmatmul.msk.f32.gmra.mxu2 %vm93_vm1, %v84_v16 }
  0xed   :  { %3962 = vmatmul.msk.f32.gmra.mxu1 %vm93_vm1, %v85_v23 }
  0xee   :  { %3925 = vmatmul.msk.f32.gmra.mxu0 %vm93_vm1, %v85_v23 }
  0xef   :  { %v470_v25 = vpop.f32.mrf.mxu2 }
  0xf0   :  { %v694_v35 = vrot.slane %v470_v25, 2 }
  0xf2   :  { %v355_v27 = vpop.f32.mrf.mxu1  ;;  %v695_v45 = vsel %vm190_vm0, %v693_v39, %v694_v35 }
  0xf3   :  { %v244_v31 = vpop.f32.mrf.mxu0  ;;  %v585_v46 = vrot.slane %v355_v27, 1  ;;  %v747_v54 = vadd.f32 %v695_v45, %v635_v50 }
  0xf4   :  { %3999 = vmatmul.msk.f32.gmra.mxu2 %vm93_vm1, %v85_v23 }
  0xf5   :  { %3963 = vmatmul.msk.f32.gmra.mxu1 %vm93_vm1, %v86_v28  ;;  %v586_v55 = vsel %vm565_vm2, %v584_v44, %v585_v46  ;;  %v794_v61 = vsel %vm758_vm3, %v747_v54, -inf }
  0xf6   :  { %3926 = vmatmul.msk.f32.gmra.mxu0 %vm93_vm1, %v86_v28  ;;  %v636_v62 = vadd.f32 %v586_v55, %v241_v24  ;;  %v795_v6 = vrot.slane %v794_v61, 4  ;;  %v791_v24 = vmax.f32 %v789_v11, %v790_v18 }
  0xf7   :  { %v473_v38 = vpop.f32.mrf.mxu2 }
  0xf8   :  { %v696_v59 = vrot.slane %v473_v38, 2  ;;  %v796_v13 = vmax.f32 %v794_v61, %v795_v6  ;;  %v792_v35 = vrot.slane %v791_v24, 1 }
  0xfa   :  { %v358_v47 = vpop.f32.mrf.mxu1  ;;  %v797_v21 = vrot.slane %v796_v13, 2  ;;  %v793_v44 = vmax.f32 %v791_v24, %v792_v35 }
  0xfb   :  { %v246_v52 = vpop.f32.mrf.mxu0  ;;  %v587_v15 = vrot.slane %v358_v47, 1 }
  0xfc   :  { %4000 = vmatmul.msk.f32.gmra.mxu2 %vm93_vm1, %v86_v28  ;;  %v798_v27 = vmax.f32 %v796_v13, %v797_v21 }
  0xfd   :  { %3964 = vmatmul.msk.f32.gmra.mxu1 %vm93_vm1, %v87_v48 }
  0xfe   :  { %3927 = vmatmul.msk.f32.gmra.mxu0 %vm93_vm1, %v87_v48  ;;  %v799_v39 = vrot.slane %v798_v27, 1 }
  0xff   :  { %v476_v56 = vpop.f32.mrf.mxu2 }
 0x100   :  { %v697_v60 = vrot.slane %v476_v56, 2  ;;  %v800_v46 = vmax.f32 %v798_v27, %v799_v39 }
 0x102   :  { %v698_v0 = vsel %vm190_vm0, %v696_v59, %v697_v60  ;;  %v361_v1 = vpop.f32.mrf.mxu1  ;;  %v880_v54 = vadd.f32 %v4739_v26, %v800_v46 }
 0x103   :  { %v748_v3 = vadd.f32 %v698_v0, %v636_v62  ;;  %v249_v4 = vpop.f32.mrf.mxu0  ;;  %v588_v16 = vrot.slane %v361_v1, 1 }
 0x104   :  { %4001 = vmatmul.msk.f32.gmra.mxu2 %vm93_vm1, %v87_v48  ;;  %v1017_v62 = vrot.slane %v880_v54, 3 }
 0x105   :  { %v801_v8 = vsel %vm758_vm3, %v748_v3, -inf  ;;  %3965 = vmatmul.msk.f32.gmra.mxu1 %vm93_vm1, %v4572_v7  ;;  %v589_v23 = vsel %vm565_vm2, %v587_v15, %v588_v16 }
 0x106   :  { %v802_v10 = vrot.slane %v801_v8, 4  ;;  %v637_v31 = vadd.f32 %v589_v23, %v246_v52  ;;  %v879_v52 = vadd.f32 %v4739_v26, %v793_v44 }
 0x107   :  { %v479_v12 = vpop.f32.mrf.mxu2 }
 0x108   :  { %v803_v14 = vmax.f32 %v801_v8, %v802_v10  ;;  %v699_v28 = vrot.slane %v479_v12, 2  ;;  %v1014_v58 = vrot.slane %v879_v52, 4 }
 0x10a   :  { %v364_v17 = vpop.f32.mrf.mxu1  ;;  %v804_v22 = vrot.slane %v803_v14, 2  ;;  %v1016_v6 = vsel %vm1015_vm8, %v1014_v58, %v4787_v20 }
 0x10b   :  { %v251_v19 = vpop.f32.mrf.mxu0  ;;  %v590_v32 = vrot.slane %v364_v17, 1  ;;  %v1019_v9 = vsel %vm1018_vm9, %v1017_v62, %v1016_v6 }
 0x10c   :  { %4002 = vmatmul.msk.f32.gmra.mxu2 %vm93_vm1, %v4572_v7  ;;  %v805_v30 = vmax.f32 %v803_v14, %v804_v22 }
 0x10e   :  { %v806_v41 = vrot.slane %v805_v30, 1 }
 0x10f   :  { %v482_v25 = vpop.f32.mrf.mxu2 }
 0x110   :  { %v700_v29 = vrot.slane %v482_v25, 2  ;;  %v807_v48 = vmax.f32 %v805_v30, %v806_v41 }
 0x112   :  { %v701_v33 = vsel %vm190_vm0, %v699_v28, %v700_v29  ;;  %v367_v34 = vpop.f32.mrf.mxu1  ;;  %v881_v55 = vadd.f32 %v4739_v26, %v807_v48 }
 0x113   :  { %v749_v36 = vadd.f32 %v701_v33, %v637_v31  ;;  %v591_v37 = vrot.slane %v367_v34, 1  ;;  %v254_v38 = vpop.f32.mrf.mxu0 }
 0x114   :  { %v1020_v0 = vrot.slane %v881_v55, 2 }
 0x115   :  { %v808_v7 = vsel %vm758_vm3, %v749_v36, -inf  ;;  %v592_v40 = vsel %vm565_vm2, %v590_v32, %v591_v37 }
 0x116   :  { %v809_v42 = vrot.slane %v808_v7, 4  ;;  %v638_v43 = vadd.f32 %v592_v40, %v251_v19  ;;  %v1022_v11 = vsel %vm1021_vm10, %v1020_v0, %v1019_v9 }
 0x117   :  { %v485_v45 = vpop.f32.mrf.mxu2 }
 0x118   :  { %v810_v47 = vmax.f32 %v808_v7, %v809_v42  ;;  %v702_v59 = vrot.slane %v485_v45, 2 }
 0x11a   :  { %v811_v49 = vrot.slane %v810_v47, 2  ;;  %v370_v50 = vpop.f32.mrf.mxu1 }
 0x11b   :  { %v256_v51 = vpop.f32.mrf.mxu0  ;;  %v593_v63 = vrot.slane %v370_v50, 1 }
 0x11c   :  { %v812_v53 = vmax.f32 %v810_v47, %v811_v49 }
 0x11e   :  { %v813_v56 = vrot.slane %v812_v53, 1 }
 0x11f   :  { %v488_v57 = vpop.f32.mrf.mxu2 }
 0x120   :  { %v703_v60 = vrot.slane %v488_v57, 2  ;;  %v814_v61 = vmax.f32 %v812_v53, %v813_v56 }
 0x122   :  { %v704_v1 = vsel %vm190_vm0, %v702_v59, %v703_v60  ;;  %v373_v2 = vpop.f32.mrf.mxu1  ;;  %v882_v3 = vadd.f32 %v4739_v26, %v814_v61 }
 0x123   :  { %v750_v4 = vadd.f32 %v704_v1, %v638_v43  ;;  %v594_v5 = vrot.slane %v373_v2, 1  ;;  %v259_v8 = vpop.f32.mrf.mxu0 }
 0x124   :  { %v1023_v10 = vrot.slane %v882_v3, 1 }
 0x125   :  { %v595_v12 = vsel %vm565_vm2, %v593_v63, %v594_v5  ;;  %v815_v16 = vsel %vm758_vm3, %v750_v4, -inf }
 0x126   :  { %v4860_v13 = vsel %vm1024_vm11, %v1023_v10, %v1022_v11  ;;  %v639_v14 = vadd.f32 %v595_v12, %v256_v51  ;;  %v816_v18 = vrot.slane %v815_v16, 4 }
 0x127   :  { %v491_v15 = vpop.f32.mrf.mxu2  ;;  %4004 = vmatmul.msk.f32.vlgmr.msra.gmra.mxu3 %vm758_vm3, %v4860_v13 }
 0x128   :  { %v817_v21 = vmax.f32 %v815_v16, %v816_v18  ;;  %v705_v22 = vrot.slane %v491_v15, 2 }
 0x12a   :  { %v376_v20 = vpop.f32.mrf.mxu1  ;;  %v818_v31 = vrot.slane %v817_v21, 2 }
 0x12b   :  { %v261_v17 = vpop.f32.mrf.mxu0  ;;  %v596_v24 = vrot.slane %v376_v20, 1 }
 0x12c   :  { %v819_v37 = vmax.f32 %v817_v21, %v818_v31 }
 0x12e   :  { %v820_v41 = vrot.slane %v819_v37, 1 }
 0x12f   :  { %v494_v19 = vpop.f32.mrf.mxu2 }
 0x130   :  { %v706_v23 = vrot.slane %v494_v19, 2  ;;  %v821_v45 = vmax.f32 %v819_v37, %v820_v41 }
 0x132   :  { %v707_v25 = vsel %vm190_vm0, %v705_v22, %v706_v23  ;;  %v379_v27 = vpop.f32.mrf.mxu1  ;;  %v883_v56 = vadd.f32 %v4739_v26, %v821_v45 }
 0x133   :  { %v751_v28 = vadd.f32 %v707_v25, %v639_v14  ;;  %v597_v29 = vrot.slane %v379_v27, 1  ;;  %v264_v30 = vpop.f32.mrf.mxu0 }
 0x135   :  { %v822_v32 = vsel %vm758_vm3, %v751_v28, -inf  ;;  %v598_v33 = vsel %vm565_vm2, %v596_v24, %v597_v29 }
 0x136   :  { %v823_v34 = vrot.slane %v822_v32, 4  ;;  %v640_v35 = vadd.f32 %v598_v33, %v261_v17 }
 0x137   :  { %v497_v36 = vpop.f32.mrf.mxu2 }
 0x138   :  { %v824_v38 = vmax.f32 %v822_v32, %v823_v34  ;;  %v708_v47 = vrot.slane %v497_v36, 2 }
 0x13a   :  { %v825_v39 = vrot.slane %v824_v38, 2  ;;  %v382_v7 = vpop.f32.mrf.mxu1 }
 0x13b   :  { %v266_v40 = vpop.f32.mrf.mxu0  ;;  %v599_v49 = vrot.slane %v382_v7, 1  ;;  %v988_v7 = vld [vmem:[%s6139_s8 + $0x68] sm:$0x3] }
 0x13c   :  { %v826_v42 = vmax.f32 %v824_v38, %v825_v39  ;;  %4006 = vmatpush.msk.msrb.mxu3 %vm1044_vm7, %v988_v7 }
 0x13e   :  { %v827_v43 = vrot.slane %v826_v42, 1 }
 0x13f   :  { %v500_v44 = vpop.f32.mrf.mxu2 }
 0x140   :  { %v828_v46 = vmax.f32 %v826_v42, %v827_v43  ;;  %v709_v48 = vrot.slane %v500_v44, 2  ;;  %v986_v42 = vld [vmem:[%s6139_s8 + $0x58] sm:$0xff] }
 0x141   :  { %1084 = vmatpush.msrb.mxu3 %v986_v42 }
 0x142   :  { %v884_v50 = vadd.f32 %v4739_v26, %v828_v46  ;;  %v710_v52 = vsel %vm190_vm0, %v708_v47, %v709_v48  ;;  %v385_v51 = vpop.f32.mrf.mxu1  ;;  %v984_v46 = vld [vmem:[%s6139_s8 + $0x48] sm:$0xff] }
 0x143   :  { %v752_v53 = vadd.f32 %v710_v52, %v640_v35  ;;  %v600_v54 = vrot.slane %v385_v51, 1  ;;  %v269_v55 = vpop.f32.mrf.mxu0  ;;  %1085 = vmatpush.msrb.mxu3 %v984_v46 }
 0x144   :  { %v1026_v57 = vrot.slane %v884_v50, 7  ;;  %v982_v50 = vld [vmem:[%s6139_s8 + $0x38] sm:$0xff] }
 0x145   :  { %v829_v58 = vsel %vm758_vm3, %v752_v53, -inf  ;;  %v601_v59 = vsel %vm565_vm2, %v599_v49, %v600_v54  ;;  %1086 = vmatpush.msrb.mxu3 %v982_v50  ;;  %v980_v53 = vld [vmem:[%s6139_s8 + $0x28] sm:$0xff] }
 0x146   :  { %v830_v60 = vrot.slane %v829_v58, 4  ;;  %v641_v61 = vadd.f32 %v601_v59, %v266_v40  ;;  %v1027_v62 = vsel %vm1006_vm4, %v1026_v57, %v883_v56  ;;  %v978_v56 = vld [vmem:[%s6139_s8 + $0x18] sm:$0xff] }
 0x147   :  { %v503_v63 = vpop.f32.mrf.mxu2  ;;  %1087 = vmatpush.msrb.mxu3 %v980_v53 }
 0x148   :  { %v831_v0 = vmax.f32 %v829_v58, %v830_v60  ;;  %v711_v9 = vrot.slane %v503_v63, 2  ;;  %v976_v58 = vld [vmem:[%s6139_s8 + $0x8] sm:$0xff]  ;;  %v929_v60 = vld [vmem:[%s6138_s7 + $0xf0] sm:$0xff] }
 0x149   :  { %1088 = vmatpush.msrb.mxu3 %v978_v56 }
 0x14a   :  { %v832_v1 = vrot.slane %v831_v0, 2  ;;  %v388_v2 = vpop.f32.mrf.mxu1 }
 0x14b   :  { %v271_v3 = vpop.f32.mrf.mxu0  ;;  %v602_v23 = vrot.slane %v388_v2, 1  ;;  %1089 = vmatpush.msrb.mxu3 %v976_v58  ;;  %v925_v2 = vld [vmem:[%s6138_s7 + $0xd0] sm:$0xff] }
 0x14c   :  { %v833_v4 = vmax.f32 %v831_v0, %v832_v1 }
 0x14d   :  { %1111 = vmatpush.msra.mxu3 %v929_v60 }
 0x14e   :  { %v834_v5 = vrot.slane %v833_v4, 1 }
 0x14f   :  { %v506_v6 = vpop.f32.mrf.mxu2 }
 0x150   :  { %v835_v8 = vmax.f32 %v833_v4, %v834_v5  ;;  %v712_v10 = vrot.slane %v506_v6, 2  ;;  %v923_v6 = vld [vmem:[%s6138_s7 + $0xc0] sm:$0xff] }
 0x152   :  { %v885_v11 = vadd.f32 %v4739_v26, %v835_v8  ;;  %v713_v12 = vsel %vm190_vm0, %v711_v9, %v712_v10  ;;  %v391_v14 = vpop.f32.mrf.mxu1 }
 0x153   :  { %v753_v15 = vadd.f32 %v713_v12, %v641_v61  ;;  %v274_v16 = vpop.f32.mrf.mxu0  ;;  %v603_v25 = vrot.slane %v391_v14, 1 }
 0x154   :  { %v1028_v20 = vrot.slane %v885_v11, 6  ;;  %v921_v11 = vld [vmem:[%s6138_s7 + $0xb0] sm:$0xff] }
 0x155   :  { %v836_v17 = vsel %vm758_vm3, %v753_v15, -inf  ;;  %v604_v31 = vsel %vm565_vm2, %v602_v23, %v603_v25  ;;  %v919_v15 = vld [vmem:[%s6138_s7 + $0xa0] sm:$0xff] }
 0x156   :  { %v837_v18 = vrot.slane %v836_v17, 4  ;;  %v1029_v19 = vsel %vm1009_vm5, %v1028_v20, %v1027_v62  ;;  %v642_v36 = vadd.f32 %v604_v31, %v271_v3  ;;  %v927_v62 = vld [vmem:[%s6138_s7 + $0xe0] sm:$0xff] }
 0x157   :  { %v509_v21 = vpop.f32.mrf.mxu2  ;;  %1112 = vmatpush.msra.mxu3 %v927_v62 }
 0x158   :  { %v838_v22 = vmax.f32 %v836_v17, %v837_v18  ;;  %v714_v34 = vrot.slane %v509_v21, 2  ;;  %v917_v18 = vld [vmem:[%s6138_s7 + $0x90] sm:$0xff]  ;;  %v915_v21 = vld [vmem:[%s6138_s7 + $0x80] sm:$0xff] }
 0x159   :  { %1113 = vmatpush.msra.mxu3 %v925_v2 }
 0x15a   :  { %v839_v24 = vrot.slane %v838_v22, 2  ;;  %v4878_v27 = vpop.f32.mrf.mxu1 }
 0x15b   :  { %v4880_v28 = vpop.f32.mrf.mxu0  ;;  %v605_v3 = vrot.slane %v4878_v27, 1  ;;  %1114 = vmatpush.msra.mxu3 %v923_v6 }
 0x15c   :  { %v840_v29 = vmax.f32 %v838_v22, %v839_v24  ;;  %v913_v24 = vld [vmem:[%s6138_s7 + $0x70] sm:$0xff] }
 0x15d   :  { %1115 = vmatpush.msra.mxu3 %v921_v11 }
 0x15e   :  { %v841_v30 = vrot.slane %v840_v29, 1 }
 0x15f   :  { %v512_v32 = vpop.f32.mrf.mxu2  ;;  %1116 = vmatpush.msra.mxu3 %v919_v15 }
 0x160   :  { %v842_v33 = vmax.f32 %v840_v29, %v841_v30  ;;  %v715_v35 = vrot.slane %v512_v32, 2  ;;  %v911_v29 = vld [vmem:[%s6138_s7 + $0x60] sm:$0xff] }
 0x161   :  { %1117 = vmatpush.msra.mxu3 %v917_v18 }
 0x162   :  { %v886_v37 = vadd.f32 %v4739_v26, %v842_v33  ;;  %v716_v38 = vsel %vm190_vm0, %v714_v34, %v715_v35  ;;  %v397_v39 = vpop.f32.mrf.mxu1  ;;  %v909_v33 = vld [vmem:[%s6138_s7 + $0x50] sm:$0xff] }
 0x163   :  { %v754_v40 = vadd.f32 %v716_v38, %v642_v36  ;;  %v279_v41 = vpop.f32.mrf.mxu0  ;;  %v606_v4 = vrot.slane %v397_v39, 1  ;;  %1118 = vmatpush.msra.mxu3 %v915_v21  ;;  %v907_v36 = vld [vmem:[%s6138_s7 + $0x40] sm:$0xff] }
 0x164   :  { %v1030_v43 = vrot.slane %v886_v37, 5  ;;  %v905_v41 = vld [vmem:[%s6138_s7 + $0x30] sm:$0xff]  ;;  %v955_v21 = vld [vmem:[%s6138_s7 + $0x1c0] sm:$0xff] }
 0x165   :  { %v843_v44 = vsel %vm758_vm3, %v754_v40, -inf  ;;  %v607_v14 = vsel %vm565_vm2, %v605_v3, %v606_v4  ;;  %1119 = vmatpush.msra.mxu3 %v913_v24  ;;  %v947_v24 = vld [vmem:[%s6138_s7 + $0x180] sm:$0xff] }
 0x166   :  { %v844_v45 = vrot.slane %v843_v44, 4  ;;  %v1031_v47 = vsel %vm1012_vm6, %v1030_v43, %v1029_v19  ;;  %v643_v19 = vadd.f32 %v607_v14, %v4880_v28 }
 0x167   :  { %v515_v48 = vpop.f32.mrf.mxu2  ;;  %1120 = vmatpush.msra.mxu3 %v911_v29  ;;  %v943_v29 = vld [vmem:[%s6138_s7 + $0x160] sm:$0xff] }
 0x168   :  { %v845_v49 = vmax.f32 %v843_v44, %v844_v45  ;;  %v717_v12 = vrot.slane %v515_v48, 2  ;;  %v903_v44 = vld [vmem:[%s6138_s7 + $0x20] sm:$0xff] }
 0x169   :  { %1121 = vmatpush.msra.mxu3 %v909_v33  ;;  %v899_v48 = vld [vmem:[%s6138_s7] sm:$0xff] }
 0x16a   :  { %v846_v52 = vrot.slane %v845_v49, 2  ;;  %v400_v51 = vpop.f32.mrf.mxu1  ;;  %v935_v33 = vld [vmem:[%s6138_s7 + $0x120] sm:$0xff] }
 0x16b   :  { %v281_v54 = vpop.f32.mrf.mxu0  ;;  %v608_v16 = vrot.slane %v400_v51, 1  ;;  %1122 = vmatpush.msra.mxu3 %v907_v36  ;;  %v931_v36 = vld [vmem:[%s6138_s7 + $0x100] sm:$0xff] }
 0x16c   :  { %v847_v55 = vmax.f32 %v845_v49, %v846_v52 }
 0x16d   :  { %1123 = vmatpush.msra.mxu3 %v905_v41  ;;  %v967_v41 = vld [vmem:[%s6138_s7 + $0x220] sm:$0xff] }
 0x16e   :  { %v848_v57 = vrot.slane %v847_v55, 1 }
 0x16f   :  { %v518_v59 = vpop.f32.mrf.mxu2  ;;  %1124 = vmatpush.msra.mxu3 %v903_v44  ;;  %v5077_v44 = vld [vmem:[%s6154_s29 + $0x20] sm:$0xff] }
 0x170   :  { %v849_v61 = vmax.f32 %v847_v55, %v848_v57  ;;  %v718_v8 = vrot.slane %v518_v59, 2 }
 0x172   :  { %v887_v63 = vadd.f32 %v4739_v26, %v849_v61  ;;  %v403_v0 = vpop.f32.mrf.mxu1  ;;  %v719_v20 = vsel %vm190_vm0, %v717_v12, %v718_v8 }
 0x173   :  { %v284_v1 = vpop.f32.mrf.mxu0  ;;  %v609_v17 = vrot.slane %v403_v0, 1  ;;  %v755_v22 = vadd.f32 %v719_v20, %v643_v19  ;;  %v961_v19 = vld [vmem:[%s6138_s7 + $0x1f0] sm:$0xff] }
 0x174   :  { %v1032_v5 = vrot.slane %v887_v63, 4 }
 0x175   :  { %v610_v25 = vsel %vm565_vm2, %v608_v16, %v609_v17  ;;  %v850_v31 = vsel %vm758_vm3, %v755_v22, -inf  ;;  %v953_v22 = vld [vmem:[%s6138_s7 + $0x1b0] sm:$0xff] }
 0x176   :  { %v4924_v9 = vsel %vm1015_vm8, %v1032_v5, %v1031_v47  ;;  %v644_v32 = vadd.f32 %v610_v25, %v281_v54  ;;  %v851_v37 = vrot.slane %v850_v31, 4  ;;  %v901_v47 = vld [vmem:[%s6138_s7 + $0x10] sm:$0xff]  ;;  %v5010_v25 = vld [vmem:[%s6154_s29] sm:$0xff] }
 0x177   :  { %v521_v10 = vpop.f32.mrf.mxu2  ;;  %1125 = vmatpush.msra.mxu3 %v901_v47  ;;  %v928_v47 = vld [vmem:[%s6138_s7 + $0xe8] sm:$0xff] }
 0x178   :  { %v720_v28 = vrot.slane %v521_v10, 2  ;;  %v852_v42 = vmax.f32 %v850_v31, %v851_v37  ;;  %v5028_v31 = vld [vmem:[%s6154_s29 + $0x18] sm:$0xff]  ;;  %v892_v37 = vld [vmem:[%s6134_s3 + $0x8] sm:$0xff] }
 0x179   :  { %1126 = vmatpush.msra.mxu3 %v899_v48  ;;  %v926_v48 = vld [vmem:[%s6138_s7 + $0xd8] sm:$0xff] }
 0x17a   :  { %v406_v23 = vpop.f32.mrf.mxu1  ;;  %v853_v49 = vrot.slane %v852_v42, 2 }
 0x17b   :  { %v611_v45 = vrot.slane %v406_v23, 1  ;;  %v286_v52 = vpop.f32.mrf.mxu0  ;;  %v949_v23 = vld [vmem:[%s6138_s7 + $0x190] sm:$0xff] }
 0x17c   :  { %v854_v54 = vmax.f32 %v852_v42, %v853_v49  ;;  %v891_v42 = vld [vmem:[%s6134_s3] sm:$0xff]  ;;  %v5095_v49 = vld [vmem:[%s6154_s29 + $0x10] sm:$0xff] }
 0x17e   :  { %v855_v61 = vrot.slane %v854_v54, 1 }
 0x17f   :  { %v524_v27 = vpop.f32.mrf.mxu2 }
 0x180   :  { %v721_v30 = vrot.slane %v524_v27, 2  ;;  %v856_v1 = vmax.f32 %v854_v54, %v855_v61  ;;  %v945_v27 = vld [vmem:[%s6138_s7 + $0x170] sm:$0xff]  ;;  %v5114_v54 = vld [vmem:[%s6154_s29 + $0x28] sm:$0xff] }
 0x181   :  { %v904_v61 = vld [vmem:[%s6138_s7 + $0x28] sm:$0xff] }
 0x182   :  { %v722_v34 = vsel %vm190_vm0, %v720_v28, %v721_v30  ;;  %v409_v7 = vpop.f32.mrf.mxu1  ;;  %v888_v6 = vadd.f32 %v4739_v26, %v856_v1  ;;  %v941_v28 = vld [vmem:[%s6138_s7 + $0x150] sm:$0xff]  ;;  %v939_v30 = vld [vmem:[%s6138_s7 + $0x140] sm:$0xff]  ;;  %v960_v1 = vld [vmem:[%s6138_s7 + $0x1e8] sm:$0xff] }
 0x183   :  { %v756_v35 = vadd.f32 %v722_v34, %v644_v32  ;;  %v612_v46 = vrot.slane %v409_v7, 1  ;;  %v937_v32 = vld [vmem:[%s6138_s7 + $0x130] sm:$0xff]  ;;  %v971_v7 = vld [vmem:[%s6138_s7 + $0x240] sm:$0xff] }
 0x184   :  { %v1034_v12 = vrot.slane %v888_v6, 3  ;;  %v933_v34 = vld [vmem:[%s6138_s7 + $0x110] sm:$0xff]  ;;  %v950_v6 = vld [vmem:[%s6138_s7 + $0x198] sm:$0xff] }
 0x185   :  { %v857_v38 = vsel %vm758_vm3, %v756_v35, -inf  ;;  %v613_v51 = vsel %vm565_vm2, %v611_v45, %v612_v46  ;;  %v4439_v35 = vmov 0   ;;  %v963_v45 = vld [vmem:[%s6138_s7 + $0x200] sm:$0xff]  ;;  %v930_v46 = vld [vmem:[%s6138_s7 + $0xf8] sm:$0xff] }
 0x186   :  { %v858_v39 = vrot.slane %v857_v38, 4  ;;  %v645_v58 = vadd.f32 %v613_v51, %v286_v52  ;;  %v1035_v16 = vsel %vm1018_vm9, %v1034_v12, %v4924_v9  ;;  %v957_v9 = vld [vmem:[%s6138_s7 + $0x1d0] sm:$0xff]  ;;  %4097 = vset.pattern.permute.xlu0 %v4439_v35  ;;  %4099 = vset.pattern.permute.xlu1 %v4439_v35  ;;  %v922_v52 = vld [vmem:[%s6138_s7 + $0xb8] sm:$0xff]  ;;  %v920_v51 = vld [vmem:[%s6138_s7 + $0xa8] sm:$0xff] }
 0x187   :  { %v527_v40 = vpop.f32.mrf.mxu2  ;;  %4098 = vset.pattern.permute.xlu2 %v4439_v35  ;;  %1256 = vperm.xlu0 %4097, %v892_v37   ;;  %v5180_v12 = vld [vmem:[%s6141_s10 + $0x18] sm:$0xff] }
 0x188   :  { %v859_v43 = vmax.f32 %v857_v38, %v858_v39  ;;  %v723_v55 = vrot.slane %v527_v40, 2  ;;  %v973_v38 = vld [vmem:[%s6138_s7 + $0x250] sm:$0xf]  ;;  %v5055_v39 = vld [vmem:[%s6154_s29 + $0x8] sm:$0xff]  ;;  %2493 = vmatpush.msrb.mxu0 %v5180_v12  ;;  %2782 = vmatpush.msra.mxu2 %v5180_v12 }
 0x189   :  { %v969_v40 = vld [vmem:[%s6138_s7 + $0x230] sm:$0xff] }
 0x18a   :  { %v860_v50 = vrot.slane %v859_v43, 2 }
 0x18c   :  { %v861_v57 = vmax.f32 %v859_v43, %v860_v50  ;;  %v965_v43 = vld [vmem:[%s6138_s7 + $0x210] sm:$0xff]  ;;  %v924_v50 = vld [vmem:[%s6138_s7 + $0xc8] sm:$0xff] }
 0x18e   :  { %v862_v63 = vrot.slane %v861_v57, 1 }
 0x18f   :  { %v530_v53 = vpop.f32.mrf.mxu2  ;;  %1251 = vperm.xlu0 %4097, %v891_v42  }
 0x190   :  { %v724_v56 = vrot.slane %v530_v53, 2  ;;  %v863_v3 = vmax.f32 %v861_v57, %v862_v63  ;;  %v918_v53 = vld [vmem:[%s6138_s7 + $0x98] sm:$0xff]  ;;  %v912_v57 = vld [vmem:[%s6138_s7 + $0x68] sm:$0xff] }
 0x191   :  { %v900_v63 = vld [vmem:[%s6138_s7 + $0x8] sm:$0xff] }
 0x192   :  { %v725_v59 = vsel %vm190_vm0, %v723_v55, %v724_v56  ;;  %v889_v8 = vadd.f32 %v4739_v26, %v863_v3  ;;  %v916_v55 = vld [vmem:[%s6138_s7 + $0x88] sm:$0xff]  ;;  %v914_v56 = vld [vmem:[%s6138_s7 + $0x78] sm:$0xff] }
 0x193   :  { %v757_v60 = vadd.f32 %v725_v59, %v645_v58  ;;  %v910_v58 = vld [vmem:[%s6138_s7 + $0x58] sm:$0xff]  ;;  %v908_v59 = vld [vmem:[%s6138_s7 + $0x48] sm:$0xff] }
 0x194   :  { %v1036_v14 = vrot.slane %v889_v8, 2  ;;  %v956_v3 = vld [vmem:[%s6138_s7 + $0x1c8] sm:$0xff] }
 0x195   :  { %v864_v62 = vsel %vm758_vm3, %v757_v60, -inf  ;;  %v906_v60 = vld [vmem:[%s6138_s7 + $0x38] sm:$0xff]  ;;  %v948_v8 = vld [vmem:[%s6138_s7 + $0x188] sm:$0xff] }
 0x196   :  { %v865_v0 = vrot.slane %v864_v62, 4  ;;  %v1037_v17 = vsel %vm1021_vm10, %v1036_v14, %v1035_v16  ;;  %v942_v14 = vld [vmem:[%s6138_s7 + $0x158] sm:$0xff]  ;;  %v940_v16 = vld [vmem:[%s6138_s7 + $0x148] sm:$0xff] }
 0x198   :  { %v866_v2 = vmax.f32 %v864_v62, %v865_v0  ;;  %v902_v62 = vld [vmem:[%s6138_s7 + $0x18] sm:$0xff] }
 0x199   :  { %v962_v0 = vld [vmem:[%s6138_s7 + $0x1f8] sm:$0xff] }
 0x19a   :  { %v867_v4 = vrot.slane %v866_v2, 2 }
 0x19c   :  { %v868_v5 = vmax.f32 %v866_v2, %v867_v4  ;;  %v958_v2 = vld [vmem:[%s6138_s7 + $0x1d8] sm:$0xff] }
 0x19d   :  { %v954_v4 = vld [vmem:[%s6138_s7 + $0x1b8] sm:$0xff] }
 0x19e   :  { %v869_v10 = vrot.slane %v868_v5, 1 }
 0x1a0   :  { %v870_v11 = vmax.f32 %v868_v5, %v869_v10  ;;  %v952_v5 = vld [vmem:[%s6138_s7 + $0x1a8] sm:$0xff]  ;;  %v946_v10 = vld [vmem:[%s6138_s7 + $0x178] sm:$0xff] }
 0x1a2   :  { %v890_v15 = vadd.f32 %v4739_v26, %v870_v11  ;;  %v959_v26 = vld [vmem:[%s6138_s7 + $0x1e0] sm:$0xff]  ;;  %v944_v11 = vld [vmem:[%s6138_s7 + $0x168] sm:$0xff] }
 0x1a4   :  { %v1038_v20 = vrot.slane %v890_v15, 1  ;;  %v5189_v15 = vld [vmem:[%s6141_s10 + $0x10] sm:$0xff] }
 0x1a5   :  { %2494 = vmatpush.msrb.mxu0 %v5189_v15  ;;  %2783 = vmatpush.msra.mxu2 %v5189_v15 }
 0x1a6   :  { %v1039_v18 = vsel %vm1024_vm11, %v1038_v20, %v1037_v17  ;;  %v938_v20 = vld [vmem:[%s6138_s7 + $0x138] sm:$0xff]  ;;  %v936_v17 = vld [vmem:[%s6138_s7 + $0x128] sm:$0xff] }
 0x1a7   :  { %4005 = vmatmul.msk.f32.gmra.mxu3 %vm758_vm3, %v1039_v18 }
 0x1af   :  { %4007 = vmatmul.msk.f32.vlgmr.msrb.gmra.mxu3 %vm758_vm3, %v4860_v13  ;;  %v951_v13 = vld [vmem:[%s6138_s7 + $0x1a0] sm:$0xff] }
 0x1b0   :  { %1134 = vmatpush.msrb.mxu3 %v961_v19  ;;  %v934_v19 = vld [vmem:[%s6138_s7 + $0x118] sm:$0xff] }
 0x1b2   :  { %1135 = vmatpush.msrb.mxu3 %v959_v26  ;;  %v5215_v26 = vld [vmem:[%s6141_s10] sm:$0xff] }
 0x1b4   :  { %1136 = vmatpush.msrb.mxu3 %v957_v9  ;;  %v932_v9 = vld [vmem:[%s6138_s7 + $0x108] sm:$0xff] }
 0x1b6   :  { %1137 = vmatpush.msrb.mxu3 %v955_v21  ;;  %v974_v21 = vld [vmem:[%s6138_s7 + $0x258] sm:$0xf] }
 0x1b7   :  { %4008 = vmatmul.msk.f32.gmra.mxu3 %vm758_vm3, %v1039_v18  ;;  %v5206_v18 = vld [vmem:[%s6141_s10 + $0x8] sm:$0xff]  ;;  %s4442_s10 = smov 32  }
 0x1b8   :  { %1138 = vmatpush.msrb.mxu3 %v953_v22  ;;  %2495 = vmatpush.msrb.mxu0 %v5206_v18  ;;  %v972_v22 = vld [vmem:[%s6138_s7 + $0x248] sm:$0xff] }
 0x1b9   :  { %2784 = vmatpush.msra.mxu2 %v5206_v18 }
 0x1ba   :  { %1139 = vmatpush.msrb.mxu3 %v951_v13  ;;  %2496 = vmatpush.msrb.mxu0 %v5215_v26  ;;  %v5237_v13 = vld [vmem:[%s6142_s11 + $0x18] sm:$0xff] }
 0x1bb   :  { %2785 = vmatpush.msra.mxu2 %v5215_v26  ;;  %3212 = vmatpush.msrb.mxu1 %v5237_v13 }
 0x1bc   :  { %1140 = vmatpush.msrb.mxu3 %v949_v23  ;;  %3071 = vmatpush.msra.mxu0 %v5180_v12  ;;  %v970_v23 = vld [vmem:[%s6138_s7 + $0x238] sm:$0xff] }
 0x1bd   :  { %3356 = vmatpush.msrb.mxu2 %v5180_v12 }
 0x1be   :  { %1141 = vmatpush.msrb.mxu3 %v947_v24  ;;  %3072 = vmatpush.msra.mxu0 %v5189_v15  ;;  %v5248_v24 = vld [vmem:[%s6142_s11 + $0x10] sm:$0xff] }
 0x1bf   :  { %1127 = vmatmul.f32.vlgmr.msra.gmra.mxu3 %v5010_v25  ;;  %3357 = vmatpush.msrb.mxu2 %v5189_v15 }
 0x1c0   :  { %1142 = vmatpush.msrb.mxu3 %v945_v27  ;;  %3073 = vmatpush.msra.mxu0 %v5206_v18  ;;  %v5259_v27 = vld [vmem:[%s6142_s11 + $0x8] sm:$0xff] }
 0x1c1   :  { %3358 = vmatpush.msrb.mxu2 %v5206_v18  ;;  %3213 = vmatpush.msrb.mxu1 %v5248_v24 }
 0x1c2   :  { %1143 = vmatpush.msrb.mxu3 %v943_v29  ;;  %3074 = vmatpush.msra.mxu0 %v5215_v26  ;;  %v966_v29 = vld [vmem:[%s6138_s7 + $0x218] sm:$0xff] }
 0x1c3   :  { %3359 = vmatpush.msrb.mxu2 %v5215_v26  ;;  %3214 = vmatpush.msrb.mxu1 %v5259_v27 }
 0x1c4   :  { %1144 = vmatpush.msrb.mxu3 %v941_v28  ;;  %v5269_v28 = vld [vmem:[%s6142_s11] sm:$0xff] }
 0x1c5   :  { %3215 = vmatpush.msrb.mxu1 %v5269_v28 }
 0x1c6   :  { %1145 = vmatpush.msrb.mxu3 %v939_v30  ;;  %v1068_v30 = vpop.f32.mrf.mxu3 }
 0x1c7   :  { %1130 = vmatmul.f32.gmra.mxu3 %v5028_v31 }
 0x1c8   :  { %1146 = vmatpush.msrb.mxu3 %v937_v32 }
 0x1ca   :  { %1147 = vmatpush.msrb.mxu3 %v935_v33 }
 0x1cc   :  { %1148 = vmatpush.msrb.mxu3 %v933_v34  ;;  %v4440_v34 = vmov 0.0  }
 0x1ce   :  { %1149 = vmatpush.msrb.mxu3 %v931_v36 }
 0x1cf   :  { %1150 = vmatmul.f32.vlgmr.msrb.gmra.mxu3 %v5055_v39 }
 0x1d0   :  { %4009 = vmatpush.msk.msra.mxu3 %vm1104_vm12, %v973_v38 }
 0x1d2   :  { %1168 = vmatpush.msra.mxu3 %v971_v7 }
 0x1d4   :  { %1169 = vmatpush.msra.mxu3 %v969_v40 }
 0x1d6   :  { %1170 = vmatpush.msra.mxu3 %v967_v41 }
 0x1d7   :  { %1153 = vmatmul.f32.gmra.mxu3 %v5077_v44 }
 0x1d8   :  { %1171 = vmatpush.msra.mxu3 %v965_v43 }
 0x1da   :  { %1172 = vmatpush.msra.mxu3 %v963_v45 }
 0x1dc   :  { %1180 = vmatpush.msrb.mxu3 %v930_v46 }
 0x1de   :  { %1181 = vmatpush.msrb.mxu3 %v928_v47 }
 0x1df   :  { %4010 = vmatmul.msk.f32.vlgmr.msra.gmra.mxu3 %vm1097_vm13, %v5095_v49 }
 0x1e0   :  { %1182 = vmatpush.msrb.mxu3 %v926_v48 }
 0x1e2   :  { %1183 = vmatpush.msrb.mxu3 %v924_v50 }
 0x1e4   :  { %1184 = vmatpush.msrb.mxu3 %v922_v52 }
 0x1e6   :  { %1185 = vmatpush.msrb.mxu3 %v920_v51 }
 0x1e7   :  { %4011 = vmatmul.msk.f32.gmra.mxu3 %vm1097_vm13, %v5114_v54 }
 0x1e8   :  { %1186 = vmatpush.msrb.mxu3 %v918_v53 }
 0x1ea   :  { %1187 = vmatpush.msrb.mxu3 %v916_v55  ;;  %v1263_v55 = vld [vmem:[%s6140_s9] sm:$0x3]  ;;  %s4441_s9 = smov 64  }
 0x1ec   :  { %1188 = vmatpush.msrb.mxu3 %v914_v56 }
 0x1ee   :  { %1189 = vmatpush.msrb.mxu3 %v912_v57 }
 0x1f0   :  { %1190 = vmatpush.msrb.mxu3 %v910_v58  ;;  %v1265_v58 = vperm.slane %v1263_v55, 0 }
 0x1f2   :  { %1191 = vmatpush.msrb.mxu3 %v908_v59 }
 0x1f4   :  { %1192 = vmatpush.msrb.mxu3 %v906_v60 }
 0x1f6   :  { %1193 = vmatpush.msrb.mxu3 %v904_v61 }
 0x1f8   :  { %1194 = vmatpush.msrb.mxu3 %v902_v62 }
 0x1f9   :  { %v1257_v51 = vpop.permute.xlu0 %1256 }
 0x1fa   :  { %1195 = vmatpush.msrb.mxu3 %v900_v63 }
 0x1fb   :  { %1196 = vmatmul.f32.vlgmr.msrb.gmra.mxu3 %v5010_v25  ;;  %v968_v25 = vld [vmem:[%s6138_s7 + $0x228] sm:$0xff] }
 0x1fc   :  { %1203 = vmatpush.msra.mxu3 %v962_v0 }
 0x1fe   :  { %1204 = vmatpush.msra.mxu3 %v960_v1 }
 0x200   :  { %1205 = vmatpush.msra.mxu3 %v958_v2 }
 0x201   :  { %v1252_v61 = vpop.permute.xlu0 %1251 }
 0x202   :  { %1206 = vmatpush.msra.mxu3 %v956_v3 }
 0x203   :  { %1199 = vmatmul.f32.gmra.mxu3 %v5028_v31  ;;  %v964_v31 = vld [vmem:[%s6138_s7 + $0x208] sm:$0xff] }
 0x204   :  { %1207 = vmatpush.msra.mxu3 %v954_v4 }
 0x206   :  { %1208 = vmatpush.msra.mxu3 %v952_v5 }
 0x208   :  { %1209 = vmatpush.msra.mxu3 %v950_v6  ;;  %v1266_v6 = vperm.slane %v1263_v55, 1 }
 0x20a   :  { %1210 = vmatpush.msra.mxu3 %v948_v8 }
 0x20c   :  { %1211 = vmatpush.msra.mxu3 %v946_v10 }
 0x20e   :  { %1212 = vmatpush.msra.mxu3 %v944_v11 }
 0x210   :  { %1213 = vmatpush.msra.mxu3 %v942_v14 }
 0x212   :  { %1214 = vmatpush.msra.mxu3 %v940_v16 }
 0x214   :  { %1215 = vmatpush.msra.mxu3 %v938_v20 }
 0x216   :  { %1216 = vmatpush.msra.mxu3 %v936_v17 }
 0x218   :  { %1217 = vmatpush.msra.mxu3 %v934_v19 }
 0x21a   :  { %1218 = vmatpush.msra.mxu3 %v932_v9 }
 0x21b   :  { %1219 = vmatmul.f32.vlgmr.msra.gmra.mxu3 %v5055_v39 }
 0x21c   :  { %4012 = vmatpush.msk.msrb.mxu3 %vm1104_vm12, %v974_v21 }
 0x21e   :  { %1237 = vmatpush.msrb.mxu3 %v972_v22 }
 0x220   :  { %1238 = vmatpush.msrb.mxu3 %v970_v23 }
 0x222   :  { %1239 = vmatpush.msrb.mxu3 %v968_v25 }
 0x223   :  { %1222 = vmatmul.f32.gmra.mxu3 %v5077_v44 }
 0x224   :  { %1240 = vmatpush.msrb.mxu3 %v966_v29 }
 0x226   :  { %1241 = vmatpush.msrb.mxu3 %v964_v31 }
 0x228   :  { %1298 = vmatpush.msra.mxu3 %v5180_v12 }
 0x22a   :  { %1299 = vmatpush.msra.mxu3 %v5189_v15  ;;  %v1071_v32 = vpop.f32.mrf.mxu3 }
 0x22b   :  { %4013 = vmatmul.msk.f32.vlgmr.msrb.gmra.mxu3 %vm1097_vm13, %v5095_v49 }
 0x22c   :  { %1300 = vmatpush.msra.mxu3 %v5206_v18 }
 0x22e   :  { %1301 = vmatpush.msra.mxu3 %v5215_v26 }
 0x230   :  { %1435 = vmatpush.msrb.mxu3 %v5237_v13 }
 0x232   :  { %1436 = vmatpush.msrb.mxu3 %v5248_v24  ;;  %v1091_v33 = vpop.f32.mrf.mxu3 }
 0x233   :  { %4014 = vmatmul.msk.f32.gmra.mxu3 %vm1097_vm13, %v5114_v54 }
 0x234   :  { %1437 = vmatpush.msrb.mxu3 %v5259_v27 }
 0x236   :  { %1438 = vmatpush.msrb.mxu3 %v5269_v28 }
 0x23a   :  { %v1094_v36 = vpop.f32.mrf.mxu3 }
 0x23b   :  { %1302 = vmatmul.f32.vlgmr.msra.gmra.mxu3 %v4440_v34 }
 0x23c   :  { %1582 = vmatpush.msra.mxu3 %v5180_v12 }
 0x23e   :  { %1583 = vmatpush.msra.mxu3 %v5189_v15 }
 0x240   :  { %1584 = vmatpush.msra.mxu3 %v5206_v18 }
 0x242   :  { %1585 = vmatpush.msra.mxu3 %v5215_v26  ;;  %v1128_v37 = vpop.f32.mrf.mxu3 }
 0x243   :  { %1439 = vmatmul.f32.vlgmr.msrb.gmra.mxu3 %v4440_v34  ;;  %v1129_v39 = vadd.f32 %v1128_v37, %v1068_v30 }
 0x244   :  { %1727 = vmatpush.msrb.mxu3 %v5237_v13 }
 0x246   :  { %1728 = vmatpush.msrb.mxu3 %v5248_v24 }
 0x248   :  { %1729 = vmatpush.msrb.mxu3 %v5259_v27 }
 0x24a   :  { %1730 = vmatpush.msrb.mxu3 %v5269_v28  ;;  %v1131_v38 = vpop.f32.mrf.mxu3 }
 0x24b   :  { %v1132_v41 = vadd.f32 %v1131_v38, %v1071_v32 }
 0x252   :  { %v1151_v7 = vpop.f32.mrf.mxu3 }
 0x253   :  { %v1152_v40 = vadd.f32 %v1151_v7, %v1129_v39 }
 0x25a   :  { %v1154_v42 = vpop.f32.mrf.mxu3 }
 0x25b   :  { %v1155_v43 = vadd.f32 %v1154_v42, %v1132_v41 }
 0x262   :  { %v1174_v44 = vpop.f32.mrf.mxu3 }
 0x263   :  { %v1175_v45 = vadd.f32 %v1174_v44, %v1152_v40 }
 0x265   :  { %v1259_v3 = vmul.f32 %v1252_v61, %v1175_v45 }
 0x267   :  { %v5304_v10 = vadd.f32 %v1265_v58, %v1259_v3 }
 0x26a   :  { %v1177_v46 = vpop.f32.mrf.mxu3 }
 0x26b   :  { %v1178_v54 = vadd.f32 %v1177_v46, %v1155_v43 }
 0x26d   :  { %v1261_v56 = vmul.f32 %v1257_v51, %v1178_v54 }
 0x26f   :  { %v5301_v62 = vadd.f32 %v1265_v58, %v1261_v56 }
 0x27e   :  { %v1197_v47 = vpop.f32.mrf.mxu3 }
 0x27f   :  { %v1198_v57 = vadd.f32 %v1197_v47, %v1091_v33 }
 0x286   :  { %v1200_v48 = vpop.f32.mrf.mxu3 }
 0x287   :  { %v1201_v1 = vadd.f32 %v1200_v48, %v1094_v36 }
 0x29e   :  { %v1220_v49 = vpop.f32.mrf.mxu3 }
 0x29f   :  { %v1221_v59 = vadd.f32 %v1220_v49, %v1198_v57 }
 0x2a6   :  { %v1223_v50 = vpop.f32.mrf.mxu3 }
 0x2a7   :  { %v1224_v4 = vadd.f32 %v1223_v50, %v1201_v1 }
 0x2ae   :  { %v1243_v52 = vpop.f32.mrf.mxu3 }
 0x2af   :  { %v1244_v63 = vadd.f32 %v1243_v52, %v1221_v59 }
 0x2b1   :  { %v1260_v5 = vmul.f32 %v1252_v61, %v1244_v63 }
 0x2b3   :  { %v5306_v14 = vadd.f32 %v1266_v6, %v1260_v5 }
 0x2b6   :  { %v1246_v53 = vpop.f32.mrf.mxu3 }
 0x2b7   :  { %v1247_v8 = vadd.f32 %v1246_v53, %v1224_v4 }
 0x2b9   :  { %v1262_v17 = vmul.f32 %v1257_v51, %v1247_v8 }
 0x2bb   :  { %v5311_v22 = vadd.f32 %v1266_v6, %v1262_v17 }
 0x2be   :  { %v1303_v60 = vpop.f32.mrf.mxu3 }
 0x2bf   :  { %v1307_v0 = vrot.slane %v1303_v60, 1  ;;  %v1310_v20 = vadd.f32 %v1303_v60, %v5304_v10 }
 0x2c1   :  { %v1311_v2 = vadd.f32 %v1307_v0, %v5301_v62  ;;  %v4015_v38 = vmul.f32 -1.442695, %v1310_v20 }
 0x2c3   :  { %4118 = vtanh.f32 %v1311_v2  ;;  %v4016_v36 = vmul.f32 -1.442695, %v1311_v2 }
 0x2c6   :  { %v1440_v11 = vpop.f32.mrf.mxu3 }
 0x2c7   :  { %v1444_v16 = vrot.slane %v1440_v11, 1  ;;  %v1445_v21 = vrot.slane %v1440_v11, 2 }
 0x2c9   :  { %v1448_v19 = vadd.f32 %v1444_v16, %v5306_v14  ;;  %v4119_v9 = vpop.eup %4118  ;;  %v1449_v23 = vadd.f32 %v1445_v21, %v5311_v22 }
 0x2ca   :  { %1358 = vrot.lane.b32.xlu1 %v4119_v9, %s4441_s9 }
 0x2cb   :  { %4120 = vtanh.f32 %v1448_v19  ;;  %v4017_v31 = vmul.f32 -1.442695, %v1448_v19  ;;  %v4018_v39 = vmul.f32 -1.442695, %v1449_v23 }
 0x2cc   :  { %4122 = vtanh.f32 %v1310_v20 }
 0x2cd   :  { %4124 = vtanh.f32 %v1449_v23 }
 0x2ce   :  { %4126 = vpow2.f32 %v4017_v31 }
 0x2d1   :  { %v4121_v25 = vpop.eup %4120 }
 0x2d2   :  { %v4123_v29 = vpop.eup %4122  ;;  %1494 = vrot.lane.b32.xlu2 %v4121_v25, %s4441_s9 }
 0x2d3   :  { %1356 = vrot.lane.b32.xlu1 %v4123_v29, %s4441_s9  ;;  %v4125_v30 = vpop.eup %4124 }
 0x2d4   :  { %v4127_v32 = vpop.eup %4126 }
 0x2d5   :  { %v1456_v33 = vadd.f32 1.0, %v4127_v32 }
 0x2d7   :  { %4128 = vrcp.f32 %v1456_v33  ;;  %v1469_v49 = vand.u32 2147483648, %v1456_v33  ;;  %vm1463_vm15 = vweird.f32 %v1456_v33  ;;  %v1467_v52 = vand.u32 2147483647, %v1456_v33 }
 0x2d8   :  { %4130 = vpow2.f32 %v4016_v36 }
 0x2d9   :  { %4132 = vpow2.f32 %v4015_v38  ;;  %v1470_v53 = vor.u32 1.1754944e-38, %v1469_v49  ;;  %vm1468_vm1 = vcmp.eq.f32.partialorder %v1467_v52, 8.507059e+37 }
 0x2da   :  { %1496 = vrot.lane.b32.xlu2 %v4125_v30, %s4441_s9  ;;  %4134 = vpow2.f32 %v4018_v39 }
 0x2dd   :  { %v4129_v37 = vpop.eup %4128 }
 0x2de   :  { %v1459_v7 = vmul.f32 %v4129_v37, %v1456_v33  ;;  %v4131_v40 = vpop.eup %4130  ;;  %vm1464_vm14 = vweird.f32 %v4129_v37 }
 0x2df   :  { %v1319_v41 = vadd.f32 1.0, %v4131_v40  ;;  %v4133_v43 = vpop.eup %4132  ;;  %vm1465_vm0 = vmor %vm1463_vm15, %vm1464_vm14  ;;  %vm1282_vm15 = vcmask 261120  }
 0x2e0   :  { %v1460_v42 = vsub.f32 1.0, %v1459_v7  ;;  %v4135_v45 = vpop.eup %4134  ;;  %v1318_v46 = vadd.f32 1.0, %v4133_v43 }
 0x2e1   :  { %4136 = vrcp.f32 %v1319_v41  ;;  %v1457_v47 = vadd.f32 1.0, %v4135_v45  ;;  %v1346_v4 = vand.u32 2147483648, %v1319_v41  ;;  %vm1340_vm3 = vweird.f32 %v1319_v41 }
 0x2e2   :  { %v1461_v44 = vmul.f32 %v4129_v37, %v1460_v42  ;;  %4138 = vrcp.f32 %v1318_v46  ;;  %v1344_v5 = vand.u32 2147483647, %v1319_v41  ;;  %vm1325_vm9 = vweird.f32 %v1318_v46 }
 0x2e3   :  { %4140 = vrcp.f32 %v1457_v47  ;;  %v1347_v16 = vor.u32 1.1754944e-38, %v1346_v4  ;;  %v1484_v23 = vand.u32 2147483648, %v1457_v47  ;;  %v1331_v25 = vand.u32 2147483648, %v1318_v46 }
 0x2e4   :  { %v1462_v48 = vadd.f32 %v4129_v37, %v1461_v44  ;;  %vm1345_vm6 = vcmp.eq.f32.partialorder %v1344_v5, 8.507059e+37  ;;  %vm1478_vm10 = vweird.f32 %v1457_v47  ;;  %v1482_v29 = vand.u32 2147483647, %v1457_v47 }
 0x2e5   :  { %v1329_v30 = vand.u32 2147483647, %v1318_v46  ;;  %v1485_v33 = vor.u32 1.1754944e-38, %v1484_v23 }
 0x2e6   :  { %v1466_v51 = vsel %vm1465_vm0, %v4129_v37, %v1462_v48  ;;  %v1332_v37 = vor.u32 1.1754944e-38, %v1331_v25  ;;  %vm1483_vm13 = vcmp.eq.f32.partialorder %v1482_v29, 8.507059e+37  ;;  %vm1420_vm0 = vcmask 253952  }
 0x2e7   :  { %v4137_v50 = vpop.eup %4136  ;;  %v5317_v56 = vsel %vm1468_vm1, %v1470_v53, %v1466_v51  ;;  %vm1330_vm14 = vcmp.eq.f32.partialorder %v1329_v30, 8.507059e+37 }
 0x2e8   :  { %v1336_v54 = vmul.f32 %v4137_v50, %v1319_v41  ;;  %v4139_v58 = vpop.eup %4138  ;;  %vm1341_vm2 = vweird.f32 %v4137_v50  ;;  %v1490_v42 = vmul.f32 0.0, %v5317_v56 }
 0x2e9   :  { %v4141_v60 = vpop.eup %4140  ;;  %v1321_v0 = vmul.f32 %v4139_v58, %v1318_v46  ;;  %vm1342_vm5 = vmor %vm1340_vm3, %vm1341_vm2  ;;  %vm1326_vm7 = vweird.f32 %v4139_v58 }
 0x2ea   :  { %v1337_v59 = vsub.f32 1.0, %v1336_v54  ;;  %v1474_v61 = vmul.f32 %v4141_v60, %v1457_v47  ;;  %vm1479_vm8 = vweird.f32 %v4141_v60  ;;  %vm1327_vm11 = vmor %vm1325_vm9, %vm1326_vm7 }
 0x2eb   :  { %v1322_v3 = vsub.f32 1.0, %v1321_v0  ;;  %vm1480_vm12 = vmor %vm1478_vm10, %vm1479_vm8 }
 0x2ec   :  { %v1338_v63 = vmul.f32 %v4137_v50, %v1337_v59  ;;  %v1475_v1 = vsub.f32 1.0, %v1474_v61  ;;  %v5336_v59 = vld [vmem:[%s6133_s2] sm:$0x3]  ;;  %v4443_v61 = vmov 7  }
 0x2ed   :  { %v1323_v11 = vmul.f32 %v4139_v58, %v1322_v3 }
 0x2ee   :  { %v1339_v2 = vadd.f32 %v4137_v50, %v1338_v63  ;;  %v1476_v6 = vmul.f32 %v4141_v60, %v1475_v1 }
 0x2ef   :  { %v1324_v21 = vadd.f32 %v4139_v58, %v1323_v11 }
 0x2f0   :  { %v1343_v8 = vsel %vm1342_vm5, %v4137_v50, %v1339_v2  ;;  %v1477_v19 = vadd.f32 %v4141_v60, %v1476_v6 }
 0x2f1   :  { %v5321_v17 = vsel %vm1345_vm6, %v1347_v16, %v1343_v8  ;;  %v1328_v32 = vsel %vm1327_vm11, %v4139_v58, %v1324_v21 }
 0x2f2   :  { %v1481_v31 = vsel %vm1480_vm12, %v4141_v60, %v1477_v19  ;;  %v1333_v7 = vsel %vm1330_vm14, %v1332_v37, %v1328_v32  ;;  %v1353_v46 = vmul.f32 0.0, %v5321_v17  ;;  %v5339_v60 = vsub.f32 1.0, %v5336_v59 }
 0x2f3   :  { %v1486_v38 = vsel %vm1483_vm13, %v1485_v33, %v1481_v31  ;;  %v1352_v50 = vmul.f32 0.0, %v1333_v7 }
 0x2f4   :  { %v1491_v49 = vmul.f32 0.0, %v1486_v38 }
 0x32c   :  { %v1495_v55 = vpop.permute.xlu2 %1494 }
 0x32d   :  { %v1500_v57 = vmul.f32 %v1495_v55, %v5317_v56 }
 0x32f   :  { %1504 = vrot.lane.b32.xlu2 %v1500_v57, %s4442_s10 }
 0x334   :  { %v1497_v36 = vpop.permute.xlu2 %1496 }
 0x335   :  { %v1501_v40 = vmul.f32 %v1497_v36, %v1486_v38 }
 0x33c   :  { %v1359_v20 = vpop.permute.xlu1 %1358 }
 0x33d   :  { %v1363_v9 = vmul.f32 %v1359_v20, %v5321_v17 }
 0x33f   :  { %1368 = vrot.lane.b32.xlu0 %v1363_v9, %s4442_s10 }
 0x345   :  { %v1357_v39 = vpop.permute.xlu1 %1356 }
 0x346   :  { %v1362_v41 = vmul.f32 %v1357_v39, %v1333_v7 }
 0x347   :  { %1506 = vrot.lane.b32.xlu0 %v1501_v40, %s4442_s10 }
 0x348   :  { %1366 = vrot.lane.b32.xlu1 %v1362_v41, %s4442_s10 }
 0x389   :  { %v1505_v43 = vpop.permute.xlu2 %1504 }
 0x38a   :  { %v1510_v44 = vadd.f32 %v1505_v43, %v1490_v42 }
 0x38c   :  { %4142 = vtanh.f32 %v1510_v44  ;;  %v1545_v0 = vrot.slane %v1510_v44, 7 }
 0x392   :  { %v4143_v45 = vpop.eup %4142 }
 0x393   :  { %1516 = vrot.lane.b32.xlu0 %v4143_v45, %s4441_s9 }
 0x3b1   :  { %v1369_v47 = vpop.permute.xlu0 %1368 }
 0x3b2   :  { %v1373_v48 = vadd.f32 %v1369_v47, %v1353_v46 }
 0x3b4   :  { %4144 = vtanh.f32 %v1373_v48  ;;  %v1409_v1 = vrot.slane %v1373_v48, 7 }
 0x3b9   :  { %v1507_v52 = vpop.permute.xlu0 %1506 }
 0x3ba   :  { %v1367_v51 = vpop.permute.xlu1 %1366  ;;  %v4145_v53 = vpop.eup %4144  ;;  %v1511_v54 = vadd.f32 %v1507_v52, %v1491_v49 }
 0x3bb   :  { %v1372_v55 = vadd.f32 %v1367_v51, %v1352_v50  ;;  %1380 = vrot.lane.b32.xlu1 %v4145_v53, %s4441_s9 }
 0x3bc   :  { %4146 = vtanh.f32 %v1511_v54  ;;  %v1546_v63 = vrot.slane %v1511_v54, 6 }
 0x3bd   :  { %4148 = vtanh.f32 %v1372_v55  ;;  %v1410_v3 = vsel %vm1006_vm4, %v1409_v1, %v1372_v55 }
 0x3be   :  { %v1547_v2 = vsel %vm1006_vm4, %v1546_v63, %v1545_v0 }
 0x3c2   :  { %v4147_v57 = vpop.eup %4146 }
 0x3c3   :  { %v4149_v58 = vpop.eup %4148  ;;  %1518 = vrot.lane.b32.xlu1 %v4147_v57, %s4441_s9 }
 0x3c4   :  { %1378 = vrot.lane.b32.xlu2 %v4149_v58, %s4441_s9 }
 0x3cb   :  { %1402 = vperm.xlu1 %4099, %v5339_v60  }
 0x3cc   :  { %1388 = vperm.xlu2 %4098, %v5336_v59  }
 0x3d3   :  { %4101 = vset.pattern.permute.xlu1 %v4443_v61 }
 0x3d4   :  { %4100 = vset.pattern.permute.xlu2 %v4443_v61  ;;  %1538 = vperm.xlu1 %4101, %v5339_v60  }
 0x3d5   :  { %1525 = vperm.xlu2 %4100, %v5336_v59  }
 0x3dc   :  { %1548 = vrot.lane.b32.xlu1 %v1547_v2, %s4444_s6 }
 0x3dd   :  { %1411 = vrot.lane.b32.xlu2 %v1410_v3, %s4444_s6 }
 0x405   :  { %v1517_v16 = vpop.permute.xlu0 %1516 }
 0x406   :  { %v1522_v19 = vmul.f32 %v1517_v16, %v5317_v56 }
 0x408   :  { %v1530_v23 = vrot.slane %v1522_v19, 7 }
 0x41e   :  { %v1379_v4 = vpop.permute.xlu2 %1378 }
 0x41f   :  { %v1384_v8 = vmul.f32 %v1379_v4, %v1333_v7 }
 0x426   :  { %v5355_v30 = vpop.permute.xlu2 %1388 }
 0x42d   :  { %v1381_v5 = vpop.permute.xlu1 %1380 }
 0x42e   :  { %v1385_v6 = vmul.f32 %v1381_v5, %v5321_v17 }
 0x42f   :  { %v5368_v37 = vpop.permute.xlu2 %1525 }
 0x430   :  { %v1393_v11 = vrot.slane %v1385_v6, 7 }
 0x432   :  { %v1394_v20 = vsel %vm1006_vm4, %v1393_v11, %v1384_v8 }
 0x433   :  { %1395 = vrot.lane.b32.xlu0 %v1394_v20, %s4442_s10 }
 0x435   :  { %v1519_v9 = vpop.permute.xlu1 %1518 }
 0x436   :  { %v1523_v21 = vmul.f32 %v1519_v9, %v1486_v38 }
 0x437   :  { %v1412_v47 = vpop.permute.xlu2 %1411 }
 0x438   :  { %v1531_v25 = vrot.slane %v1523_v21, 6  ;;  %v1414_v52 = vmul.f32 %v1412_v47, %v5355_v30 }
 0x43a   :  { %v1532_v29 = vsel %vm1006_vm4, %v1531_v25, %v1530_v23 }
 0x43b   :  { %1533 = vrot.lane.b32.xlu0 %v1532_v29, %s4442_s10 }
 0x43d   :  { %v5357_v17 = vpop.permute.xlu1 %1402 }
 0x43e   :  { %v1405_v32 = vmul.f32 0.0, %v5357_v17 }
 0x440   :  { %v5392_v55 = vadd.f32 %v1414_v52, %v1405_v32 }
 0x442   :  { %v1637_v58 = vrot.slane %v5392_v55, 7 }
 0x446   :  { %v5371_v39 = vpop.permute.xlu1 %1538 }
 0x447   :  { %v1541_v40 = vmul.f32 0.0, %v5371_v39 }
 0x44e   :  { %v1549_v0 = vpop.permute.xlu1 %1548 }
 0x44f   :  { %v1551_v1 = vmul.f32 %v1549_v0, %v5368_v37 }
 0x451   :  { %v5403_v2 = vadd.f32 %v1551_v1, %v1541_v40 }
 0x453   :  { %v1783_v3 = vrot.slane %v5403_v2, 2 }
 0x4a5   :  { %v1396_v31 = vpop.permute.xlu0 %1395 }
 0x4a6   :  { %v1398_v33 = vmul.f32 %v1396_v31, %v5355_v30 }
 0x4a8   :  { %v5361_v36 = vadd.f32 %v1405_v32, %v1398_v33 }
 0x4aa   :  { %4019 = vmatmul.msk.f32.vlgmr.msra.gmra.mxu3 %vm1282_vm15, %v5361_v36  ;;  %v1416_v56 = vmul.f32 %v5361_v36, %v5355_v30 }
 0x4ab   :  { %1883 = vmatpush.msra.mxu3 %v5180_v12 }
 0x4ac   :  { %1421 = vst.msk [vmem:[#allocation2] sm:$0x1] %vm1420_vm0, %v1416_v56  ;;  %v1418_v38 = vrot.slane %v1416_v56, 1 }
 0x4ad   :  { %v1534_v7 = vpop.permute.xlu0 %1533  ;;  %1884 = vmatpush.msra.mxu3 %v5189_v15 }
 0x4ae   :  { %v1536_v41 = vmul.f32 %v1534_v7, %v5368_v37  ;;  %1422 = vst.msk [vmem:[#allocation2 + $0x8] sm:$0x1] %vm1420_vm0, %v1418_v38 }
 0x4af   :  { %1885 = vmatpush.msra.mxu3 %v5206_v18 }
 0x4b0   :  { %v5378_v42 = vadd.f32 %v1541_v40, %v1536_v41 }
 0x4b1   :  { %1886 = vmatpush.msra.mxu3 %v5215_v26 }
 0x4b2   :  { %4022 = vmatmul.msk.f32.vlgmr.msrb.gmra.mxu3 %vm1282_vm15, %v5378_v42 }
 0x4b3   :  { %2032 = vmatpush.msrb.mxu3 %v5237_v13 }
 0x4b5   :  { %2033 = vmatpush.msrb.mxu3 %v5248_v24 }
 0x4b7   :  { %2034 = vmatpush.msrb.mxu3 %v5259_v27 }
 0x4b9   :  { %2035 = vmatpush.msrb.mxu3 %v5269_v28 }
 0x52d   :  { %v1587_v43 = vpop.f32.mrf.mxu3 }
 0x52e   :  { %v1591_v44 = vrot.slane %v1587_v43, 7  ;;  %v1595_v45 = vadd.f32 %v1587_v43, %v5301_v62 }
 0x530   :  { %v1594_v46 = vadd.f32 %v1591_v44, %v5304_v10  ;;  %4150 = vtanh.f32 %v1595_v45  ;;  %v4021_v4 = vmul.f32 -1.442695, %v1595_v45 }
 0x532   :  { %4152 = vtanh.f32 %v1594_v46  ;;  %v4020_v16 = vmul.f32 -1.442695, %v1594_v46 }
 0x535   :  { %v1732_v48 = vpop.f32.mrf.mxu3 }
 0x536   :  { %v4151_v49 = vpop.eup %4150  ;;  %v1736_v50 = vrot.slane %v1732_v48, 2  ;;  %v1737_v51 = vrot.slane %v1732_v48, 3 }
 0x537   :  { %1650 = vrot.lane.b32.xlu2 %v4151_v49, %s4441_s9 }
 0x538   :  { %v1740_v53 = vadd.f32 %v1736_v50, %v5306_v14  ;;  %v4153_v54 = vpop.eup %4152  ;;  %v1741_v57 = vadd.f32 %v1737_v51, %v5311_v22 }
 0x539   :  { %1648 = vrot.lane.b32.xlu0 %v4153_v54, %s4441_s9 }
 0x53a   :  { %4154 = vtanh.f32 %v1740_v53  ;;  %v4023_v9 = vmul.f32 -1.442695, %v1740_v53  ;;  %v4024_v25 = vmul.f32 -1.442695, %v1741_v57 }
 0x53b   :  { %4156 = vtanh.f32 %v1741_v57 }
 0x53c   :  { %4158 = vpow2.f32 %v4021_v4 }
 0x53f   :  { %1638 = vrot.lane.b32.xlu2 %v1637_v58, %s4442_s10 }
 0x540   :  { %v4155_v61 = vpop.eup %4154 }
 0x541   :  { %1795 = vrot.lane.b32.xlu0 %v4155_v61, %s4441_s9  ;;  %v4157_v63 = vpop.eup %4156 }
 0x542   :  { %1797 = vrot.lane.b32.xlu1 %v4157_v63, %s4441_s9  ;;  %v4159_v5 = vpop.eup %4158 }
 0x543   :  { %v1603_v6 = vadd.f32 1.0, %v4159_v5 }
 0x545   :  { %4160 = vrcp.f32 %v1603_v6  ;;  %v1630_v29 = vand.u32 2147483648, %v1603_v6  ;;  %vm1624_vm2 = vweird.f32 %v1603_v6  ;;  %v1628_v32 = vand.u32 2147483647, %v1603_v6 }
 0x546   :  { %4162 = vpow2.f32 %v4020_v16 }
 0x547   :  { %4164 = vpow2.f32 %v4023_v9  ;;  %v1631_v56 = vor.u32 1.1754944e-38, %v1630_v29  ;;  %vm1629_vm5 = vcmp.eq.f32.partialorder %v1628_v32, 8.507059e+37 }
 0x548   :  { %4166 = vpow2.f32 %v4024_v25 }
 0x549   :  { %1640 = vrot.lane.b32.xlu0 %v5392_v55, %s4442_s10 }
 0x54b   :  { %v4161_v8 = vpop.eup %4160 }
 0x54c   :  { %v1620_v11 = vmul.f32 %v4161_v8, %v1603_v6  ;;  %v4163_v21 = vpop.eup %4162  ;;  %vm1625_vm1 = vweird.f32 %v4161_v8 }
 0x54d   :  { %v1602_v31 = vadd.f32 1.0, %v4163_v21  ;;  %vm1626_vm3 = vmor %vm1624_vm2, %vm1625_vm1  ;;  %v4165_v38 = vpop.eup %4164 }
 0x54e   :  { %v1621_v20 = vsub.f32 1.0, %v1620_v11  ;;  %v1748_v43 = vadd.f32 1.0, %v4165_v38  ;;  %v4167_v44 = vpop.eup %4166 }
 0x54f   :  { %4168 = vrcp.f32 %v1602_v31  ;;  %v1749_v46 = vadd.f32 1.0, %v4167_v44  ;;  %v1615_v58 = vand.u32 2147483648, %v1602_v31  ;;  %vm1609_vm7 = vweird.f32 %v1602_v31 }
 0x550   :  { %v1622_v19 = vmul.f32 %v4161_v8, %v1621_v20  ;;  %4170 = vrcp.f32 %v1748_v43  ;;  %v1613_v61 = vand.u32 2147483647, %v1602_v31  ;;  %v1761_v16 = vand.u32 2147483648, %v1748_v43 }
 0x551   :  { %1785 = vrot.lane.b32.xlu0 %v1783_v3, %s4442_s10  ;;  %4172 = vrcp.f32 %v1749_v46  ;;  %v1616_v3 = vor.u32 1.1754944e-38, %v1615_v58  ;;  %vm1755_vm11 = vweird.f32 %v1748_v43  ;;  %v1759_v20 = vand.u32 2147483647, %v1748_v43 }
 0x552   :  { %v1623_v23 = vadd.f32 %v4161_v8, %v1622_v19  ;;  %vm1614_vm9 = vcmp.eq.f32.partialorder %v1613_v61, 8.507059e+37  ;;  %v1776_v21 = vand.u32 2147483648, %v1749_v46  ;;  %vm1770_vm14 = vweird.f32 %v1749_v46 }
 0x553   :  { %v1774_v25 = vand.u32 2147483647, %v1749_v46  ;;  %vm1760_vm1 = vcmp.eq.f32.partialorder %v1759_v20, 8.507059e+37 }
 0x554   :  { %v1627_v33 = vsel %vm1626_vm3, %v4161_v8, %v1623_v23  ;;  %v1762_v23 = vor.u32 1.1754944e-38, %v1761_v16  ;;  %v1777_v38 = vor.u32 1.1754944e-38, %v1776_v21 }
 0x555   :  { %v5407_v7 = vsel %vm1629_vm5, %v1631_v56, %v1627_v33  ;;  %v4169_v45 = vpop.eup %4168  ;;  %v1784_v56 = vrot.slane %v5403_v2, 3  ;;  %vm1775_vm3 = vcmp.eq.f32.partialorder %v1774_v25, 8.507059e+37 }
 0x556   :  { %v1605_v47 = vmul.f32 %v4169_v45, %v1602_v31  ;;  %v4171_v49 = vpop.eup %4170  ;;  %vm1610_vm6 = vweird.f32 %v4169_v45 }
 0x557   :  { %v1751_v52 = vmul.f32 %v4171_v49, %v1748_v43  ;;  %v4173_v51 = vpop.eup %4172  ;;  %vm1611_vm8 = vmor %vm1609_vm7, %vm1610_vm6  ;;  %vm1756_vm10 = vweird.f32 %v4171_v49 }
 0x558   :  { %v1606_v48 = vsub.f32 1.0, %v1605_v47  ;;  %v1766_v54 = vmul.f32 %v4173_v51, %v1749_v46  ;;  %vm1757_vm12 = vmor %vm1755_vm11, %vm1756_vm10  ;;  %vm1771_vm13 = vweird.f32 %v4173_v51 }
 0x559   :  { %v1752_v57 = vsub.f32 1.0, %v1751_v52  ;;  %vm1772_vm2 = vmor %vm1770_vm14, %vm1771_vm13  ;;  %v4446_v52 = vmov 6  }
 0x55a   :  { %v1607_v50 = vmul.f32 %v4169_v45, %v1606_v48  ;;  %v1767_v0 = vsub.f32 1.0, %v1766_v54 }
 0x55b   :  { %v1753_v1 = vmul.f32 %v4171_v49, %v1752_v57 }
 0x55c   :  { %v1608_v53 = vadd.f32 %v4169_v45, %v1607_v50  ;;  %v1768_v8 = vmul.f32 %v4173_v51, %v1767_v0 }
 0x55d   :  { %v1754_v11 = vadd.f32 %v4171_v49, %v1753_v1 }
 0x55e   :  { %v1612_v63 = vsel %vm1611_vm8, %v4169_v45, %v1608_v53  ;;  %v1769_v19 = vadd.f32 %v4173_v51, %v1768_v8 }
 0x55f   :  { %v5411_v4 = vsel %vm1614_vm9, %v1616_v3, %v1612_v63  ;;  %v1758_v9 = vsel %vm1757_vm12, %v4171_v49, %v1754_v11  ;;  %v4445_v49 = vmov 1  }
 0x560   :  { %v5415_v31 = vsel %vm1760_vm1, %v1762_v23, %v1758_v9  ;;  %v1773_v32 = vsel %vm1772_vm2, %v4173_v51, %v1769_v19  ;;  %4102 = vset.pattern.permute.xlu2 %v4445_v49  ;;  %4103 = vset.pattern.permute.xlu1 %v4445_v49 }
 0x591   :  { %v1651_v40 = vpop.permute.xlu2 %1650 }
 0x592   :  { %v1655_v41 = vmul.f32 %v1651_v40, %v5407_v7 }
 0x594   :  { %1660 = vrot.lane.b32.xlu2 %v1655_v41, %s4442_s10  ;;  %v1778_v41 = vsel %vm1775_vm3, %v1777_v38, %v1773_v32 }
 0x599   :  { %v1639_v44 = vpop.permute.xlu2 %1638 }
 0x59a   :  { %v1644_v61 = vmul.f32 %v1639_v44, %v5411_v4 }
 0x5ab   :  { %v1649_v5 = vpop.permute.xlu0 %1648 }
 0x5ac   :  { %v1654_v6 = vmul.f32 %v1649_v5, %v5411_v4 }
 0x5ae   :  { %1658 = vrot.lane.b32.xlu1 %v1654_v6, %s4442_s10 }
 0x5b3   :  { %v1796_v29 = vpop.permute.xlu0 %1795 }
 0x5b4   :  { %v1801_v33 = vmul.f32 %v1796_v29, %v5415_v31  ;;  %v1798_v40 = vpop.permute.xlu1 %1797 }
 0x5b5   :  { %v1802_v43 = vmul.f32 %v1798_v40, %v1778_v41 }
 0x5b6   :  { %1787 = vrot.lane.b32.xlu1 %v1784_v56, %s4442_s10  ;;  %1805 = vrot.lane.b32.xlu2 %v1801_v33, %s4442_s10 }
 0x5b7   :  { %1807 = vrot.lane.b32.xlu0 %v1802_v43, %s4442_s10 }
 0x5bb   :  { %v1641_v45 = vpop.permute.xlu0 %1640 }
 0x5bc   :  { %v1645_v46 = vmul.f32 %v1641_v45, %v5407_v7 }
 0x5c3   :  { %v1786_v51 = vpop.permute.xlu0 %1785 }
 0x5c4   :  { %v1791_v53 = vmul.f32 %v1786_v51, %v5415_v31 }
 0x5ee   :  { %v1661_v47 = vpop.permute.xlu2 %1660 }
 0x5ef   :  { %v1665_v48 = vadd.f32 %v1661_v47, %v1645_v46 }
 0x5f1   :  { %4174 = vtanh.f32 %v1665_v48 }
 0x5f7   :  { %v4175_v50 = vpop.eup %4174 }
 0x5f8   :  { %1672 = vrot.lane.b32.xlu2 %v4175_v50, %s4441_s9 }
 0x600   :  { %1679 = vperm.xlu2 %4102, %v5336_v59  }
 0x608   :  { %4104 = vset.pattern.permute.xlu2 %v4446_v52 }
 0x609   :  { %1826 = vperm.xlu2 %4104, %v5336_v59  }
 0x610   :  { %v1806_v54 = vpop.permute.xlu2 %1805 }
 0x611   :  { %v1811_v57 = vadd.f32 %v1806_v54, %v1791_v53 }
 0x613   :  { %4176 = vtanh.f32 %v1811_v57  ;;  %v1846_v20 = vrot.slane %v1811_v57, 6 }
 0x619   :  { %v4177_v58 = vpop.eup %4176 }
 0x61a   :  { %1817 = vrot.lane.b32.xlu0 %v4177_v58, %s4441_s9 }
 0x620   :  { %v1659_v63 = vpop.permute.xlu1 %1658 }
 0x621   :  { %v1664_v0 = vadd.f32 %v1659_v63, %v1644_v61 }
 0x623   :  { %4178 = vtanh.f32 %v1664_v0  ;;  %v1698_v1 = vrot.slane %v1664_v0, 1 }
 0x625   :  { %v1699_v3 = vsel %vm1006_vm4, %v1665_v48, %v1698_v1 }
 0x626   :  { %1700 = vrot.lane.b32.xlu2 %v1699_v3, %s4444_s6 }
 0x628   :  { %v1788_v5 = vpop.permute.xlu1 %1787 }
 0x629   :  { %v4179_v6 = vpop.eup %4178  ;;  %v1792_v8 = vmul.f32 %v1788_v5, %v1778_v41  ;;  %v1808_v11 = vpop.permute.xlu0 %1807 }
 0x62a   :  { %1670 = vrot.lane.b32.xlu1 %v4179_v6, %s4441_s9 }
 0x62b   :  { %v1812_v16 = vadd.f32 %v1808_v11, %v1792_v8 }
 0x62d   :  { %4180 = vtanh.f32 %v1812_v16  ;;  %v1847_v19 = vrot.slane %v1812_v16, 5 }
 0x62f   :  { %v1848_v9 = vsel %vm1006_vm4, %v1847_v19, %v1846_v20 }
 0x630   :  { %1849 = vrot.lane.b32.xlu2 %v1848_v9, %s4444_s6 }
 0x633   :  { %v4181_v21 = vpop.eup %4180 }
 0x634   :  { %1819 = vrot.lane.b32.xlu1 %v4181_v21, %s4441_s9 }
 0x63c   :  { %1691 = vperm.xlu1 %4103, %v5339_v60  }
 0x644   :  { %4105 = vset.pattern.permute.xlu1 %v4446_v52 }
 0x645   :  { %1839 = vperm.xlu1 %4105, %v5339_v60  }
 0x652   :  { %v1673_v23 = vpop.permute.xlu2 %1672 }
 0x653   :  { %v1677_v33 = vmul.f32 %v1673_v23, %v5407_v7 }
 0x65a   :  { %v5437_v25 = vpop.permute.xlu2 %1679 }
 0x663   :  { %v5443_v40 = vpop.permute.xlu2 %1826 }
 0x680   :  { %v1701_v50 = vpop.permute.xlu2 %1700 }
 0x68a   :  { %v1850_v20 = vpop.permute.xlu2 %1849 }
 0x68b   :  { %v1852_v21 = vmul.f32 %v1850_v20, %v5443_v40 }
 0x68c   :  { %v1818_v43 = vpop.permute.xlu0 %1817 }
 0x68d   :  { %v1823_v44 = vmul.f32 %v1818_v43, %v5415_v31 }
 0x68f   :  { %v1831_v47 = vrot.slane %v1823_v44, 6 }
 0x69c   :  { %v1671_v29 = vpop.permute.xlu1 %1670 }
 0x69d   :  { %v1676_v32 = vmul.f32 %v1671_v29, %v5411_v4  ;;  %v1703_v4 = vmul.f32 %v1701_v50, %v5437_v25 }
 0x69f   :  { %v1684_v56 = vrot.slane %v1676_v32, 1 }
 0x6a1   :  { %v1685_v38 = vsel %vm1006_vm4, %v1677_v33, %v1684_v56 }
 0x6a2   :  { %1686 = vrot.lane.b32.xlu0 %v1685_v38, %s4442_s10 }
 0x6a6   :  { %v1820_v45 = vpop.permute.xlu1 %1819 }
 0x6a7   :  { %v1824_v46 = vmul.f32 %v1820_v45, %v1778_v41 }
 0x6a9   :  { %v1832_v48 = vrot.slane %v1824_v46, 5 }
 0x6ab   :  { %v1833_v49 = vsel %vm1006_vm4, %v1832_v48, %v1831_v47 }
 0x6ac   :  { %1834 = vrot.lane.b32.xlu0 %v1833_v49, %s4442_s10 }
 0x6ae   :  { %v5448_v7 = vpop.permute.xlu1 %1691 }
 0x6af   :  { %v1704_v52 = vmul.f32 %v5448_v7, %v5392_v55  ;;  %v1694_v53 = vmul.f32 %v5448_v7, %v5361_v36 }
 0x6b1   :  { %v5453_v51 = vadd.f32 %v1704_v52, %v1703_v4 }
 0x6b3   :  { %v1939_v31 = vrot.slane %v5453_v51, 6  ;;  %v1940_v9 = vrot.slane %v5453_v51, 7 }
 0x6b5   :  { %1941 = vrot.lane.b32.xlu2 %v1939_v31, %s4442_s10 }
 0x6b7   :  { %v5470_v36 = vpop.permute.xlu1 %1839 }
 0x6b8   :  { %v1842_v63 = vmul.f32 %v5470_v36, %v5378_v42  ;;  %v1853_v19 = vmul.f32 %v5470_v36, %v5403_v2 }
 0x6ba   :  { %v5498_v23 = vadd.f32 %v1853_v19, %v1852_v21 }
 0x6bc   :  { %v2088_v29 = vrot.slane %v5498_v23, 3 }
 0x714   :  { %v1687_v41 = vpop.permute.xlu0 %1686 }
 0x715   :  { %v1689_v54 = vmul.f32 %v1687_v41, %v5437_v25 }
 0x717   :  { %v5460_v57 = vadd.f32 %v1694_v53, %v1689_v54 }
 0x719   :  { %4025 = vmatmul.msk.f32.vlgmr.msra.gmra.mxu3 %vm1282_vm15, %v5460_v57  ;;  %v1706_v55 = vmul.f32 %v5460_v57, %v5437_v25 }
 0x71a   :  { %2188 = vmatpush.msra.mxu3 %v5180_v12 }
 0x71b   :  { %1710 = vst.msk [vmem:[#allocation2 + $0x1] sm:$0x1] %vm1420_vm0, %v1706_v55  ;;  %v1708_v58 = vrot.slane %v1706_v55, 1 }
 0x71c   :  { %2189 = vmatpush.msra.mxu3 %v5189_v15 }
 0x71d   :  { %1711 = vst.msk [vmem:[#allocation2 + $0x9] sm:$0x1] %vm1420_vm0, %v1708_v58 }
 0x71e   :  { %2190 = vmatpush.msra.mxu3 %v5206_v18  ;;  %v1835_v61 = vpop.permute.xlu0 %1834 }
 0x71f   :  { %v1837_v0 = vmul.f32 %v1835_v61, %v5443_v40 }
 0x720   :  { %2191 = vmatpush.msra.mxu3 %v5215_v26 }
 0x721   :  { %v5477_v12 = vadd.f32 %v1842_v63, %v1837_v0 }
 0x723   :  { %4028 = vmatmul.msk.f32.vlgmr.msrb.gmra.mxu3 %vm1282_vm15, %v5477_v12 }
 0x724   :  { %2337 = vmatpush.msrb.mxu3 %v5237_v13 }
 0x726   :  { %2338 = vmatpush.msrb.mxu3 %v5248_v24 }
 0x728   :  { %2339 = vmatpush.msrb.mxu3 %v5259_v27 }
 0x72a   :  { %2340 = vmatpush.msrb.mxu3 %v5269_v28 }
 0x79c   :  { %v1888_v15 = vpop.f32.mrf.mxu3 }
 0x79d   :  { %v1892_v18 = vrot.slane %v1888_v15, 6  ;;  %v1893_v26 = vrot.slane %v1888_v15, 7 }
 0x79f   :  { %v1896_v1 = vadd.f32 %v1892_v18, %v5304_v10  ;;  %v1897_v3 = vadd.f32 %v1893_v26, %v5301_v62 }
 0x7a1   :  { %4182 = vtanh.f32 %v1896_v1  ;;  %v4026_v32 = vmul.f32 -1.442695, %v1896_v1  ;;  %v4027_v33 = vmul.f32 -1.442695, %v1897_v3 }
 0x7a2   :  { %4184 = vtanh.f32 %v1897_v3 }
 0x7a6   :  { %v2037_v8 = vpop.f32.mrf.mxu3 }
 0x7a7   :  { %v4183_v5 = vpop.eup %4182  ;;  %v2041_v13 = vrot.slane %v2037_v8, 3  ;;  %v2042_v24 = vrot.slane %v2037_v8, 4 }
 0x7a8   :  { %v4185_v6 = vpop.eup %4184  ;;  %1951 = vrot.lane.b32.xlu0 %v4183_v5, %s4441_s9 }
 0x7a9   :  { %1953 = vrot.lane.b32.xlu1 %v4185_v6, %s4441_s9  ;;  %v2045_v27 = vadd.f32 %v2041_v13, %v5306_v14  ;;  %v2046_v28 = vadd.f32 %v2042_v24, %v5311_v22 }
 0x7ab   :  { %4186 = vtanh.f32 %v2045_v27  ;;  %v4029_v2 = vmul.f32 -1.442695, %v2045_v27  ;;  %v4030_v45 = vmul.f32 -1.442695, %v2046_v28 }
 0x7ac   :  { %4188 = vtanh.f32 %v2046_v28 }
 0x7ad   :  { %4190 = vpow2.f32 %v4026_v32 }
 0x7ae   :  { %4192 = vpow2.f32 %v4027_v33 }
 0x7b1   :  { %v4187_v11 = vpop.eup %4186 }
 0x7b2   :  { %2100 = vrot.lane.b32.xlu0 %v4187_v11, %s4441_s9  ;;  %v4189_v16 = vpop.eup %4188 }
 0x7b3   :  { %2102 = vrot.lane.b32.xlu1 %v4189_v16, %s4441_s9  ;;  %v4191_v56 = vpop.eup %4190 }
 0x7b4   :  { %v4193_v38 = vpop.eup %4192  ;;  %v1904_v43 = vadd.f32 1.0, %v4191_v56 }
 0x7b5   :  { %v1905_v44 = vadd.f32 1.0, %v4193_v38 }
 0x7b6   :  { %4194 = vrcp.f32 %v1904_v43  ;;  %v1917_v15 = vand.u32 2147483648, %v1904_v43  ;;  %vm1911_vm7 = vweird.f32 %v1904_v43  ;;  %v1915_v1 = vand.u32 2147483647, %v1904_v43 }
 0x7b7   :  { %4196 = vpow2.f32 %v4029_v2  ;;  %v1932_v26 = vand.u32 2147483648, %v1905_v44  ;;  %vm1926_vm8 = vweird.f32 %v1905_v44  ;;  %v1930_v3 = vand.u32 2147483647, %v1905_v44 }
 0x7b8   :  { %4198 = vrcp.f32 %v1905_v44  ;;  %v1918_v13 = vor.u32 1.1754944e-38, %v1917_v15  ;;  %vm1916_vm11 = vcmp.eq.f32.partialorder %v1915_v1, 8.507059e+37  ;;  %v2089_v2 = vrot.slane %v5498_v23, 4 }
 0x7b9   :  { %4200 = vpow2.f32 %v4030_v45  ;;  %v1933_v27 = vor.u32 1.1754944e-38, %v1932_v26  ;;  %vm1931_vm12 = vcmp.eq.f32.partialorder %v1930_v3, 8.507059e+37 }
 0x7ba   :  { %1943 = vrot.lane.b32.xlu0 %v1940_v9, %s4442_s10 }
 0x7bc   :  { %v4195_v46 = vpop.eup %4194 }
 0x7bd   :  { %v4197_v47 = vpop.eup %4196  ;;  %v1907_v4 = vmul.f32 %v4195_v46, %v1904_v43  ;;  %vm1912_vm5 = vweird.f32 %v4195_v46 }
 0x7be   :  { %v4199_v48 = vpop.eup %4198  ;;  %v2053_v50 = vadd.f32 1.0, %v4197_v47  ;;  %vm1913_vm9 = vmor %vm1911_vm7, %vm1912_vm5 }
 0x7bf   :  { %v4201_v49 = vpop.eup %4200  ;;  %v1922_v52 = vmul.f32 %v4199_v48, %v1905_v44  ;;  %v1908_v41 = vsub.f32 1.0, %v1907_v4  ;;  %vm1927_vm6 = vweird.f32 %v4199_v48 }
 0x7c0   :  { %v5502_v31 = vadd.f32 1.0, %v4201_v49  ;;  %4202 = vrcp.f32 %v2053_v50  ;;  %vm1928_vm10 = vmor %vm1926_vm8, %vm1927_vm6  ;;  %v2066_v56 = vand.u32 2147483648, %v2053_v50  ;;  %vm2060_vm14 = vweird.f32 %v2053_v50 }
 0x7c1   :  { %v1923_v53 = vsub.f32 1.0, %v1922_v52  ;;  %v1909_v54 = vmul.f32 %v4195_v46, %v1908_v41  ;;  %v2064_v38 = vand.u32 2147483647, %v2053_v50 }
 0x7c2   :  { %2090 = vrot.lane.b32.xlu0 %v2088_v29, %s4442_s10  ;;  %4204 = vrcp.f32 %v5502_v31  ;;  %v2081_v44 = vand.u32 2147483648, %v5502_v31  ;;  %vm2075_vm3 = vweird.f32 %v5502_v31  ;;  %v2067_v47 = vor.u32 1.1754944e-38, %v2066_v56 }
 0x7c3   :  { %v1924_v55 = vmul.f32 %v4199_v48, %v1923_v53  ;;  %v1910_v61 = vadd.f32 %v4195_v46, %v1909_v54  ;;  %vm2065_vm6 = vcmp.eq.f32.partialorder %v2064_v38, 8.507059e+37 }
 0x7c4   :  { %v2082_v4 = vor.u32 1.1754944e-38, %v2081_v44 }
 0x7c5   :  { %v1925_v0 = vadd.f32 %v4199_v48, %v1924_v55  ;;  %v1914_v5 = vsel %vm1913_vm9, %v4195_v46, %v1910_v61  ;;  %v2079_v46 = vand.u32 2147483647, %v5502_v31  ;;  %v1942_v55 = vpop.permute.xlu2 %1941 }
 0x7c6   :  { %v4203_v58 = vpop.eup %4202  ;;  %v5506_v11 = vsel %vm1916_vm11, %v1918_v13, %v1914_v5 }
 0x7c7   :  { %v2056_v18 = vmul.f32 %v4203_v58, %v2053_v50  ;;  %v1929_v8 = vsel %vm1928_vm10, %v4199_v48, %v1925_v0  ;;  %vm2061_vm13 = vweird.f32 %v4203_v58  ;;  %vm2080_vm7 = vcmp.eq.f32.partialorder %v2079_v46, 8.507059e+37 }
 0x7c8   :  { %v4205_v63 = vpop.eup %4204  ;;  %v5508_v20 = vsel %vm1931_vm12, %v1933_v27, %v1929_v8  ;;  %vm2062_vm2 = vmor %vm2060_vm14, %vm2061_vm13 }
 0x7c9   :  { %v2071_v6 = vmul.f32 %v4205_v63, %v5502_v31  ;;  %v2057_v24 = vsub.f32 1.0, %v2056_v18  ;;  %vm2076_vm1 = vweird.f32 %v4205_v63  ;;  %v4447_v31 = vmov 2  }
 0x7ca   :  { %vm2077_vm5 = vmor %vm2075_vm3, %vm2076_vm1  ;;  %4106 = vset.pattern.permute.xlu2 %v4447_v31  ;;  %4107 = vset.pattern.permute.xlu1 %v4447_v31 }
 0x7cb   :  { %v2072_v9 = vsub.f32 1.0, %v2071_v6  ;;  %v2058_v29 = vmul.f32 %v4203_v58, %v2057_v24  ;;  %v1947_v6 = vmul.f32 %v1942_v55, %v5506_v11 }
 0x7cd   :  { %v2073_v32 = vmul.f32 %v4205_v63, %v2072_v9  ;;  %v2059_v33 = vadd.f32 %v4203_v58, %v2058_v29 }
 0x7cf   :  { %v2074_v43 = vadd.f32 %v4205_v63, %v2073_v32  ;;  %v2063_v45 = vsel %vm2062_vm2, %v4203_v58, %v2059_v33 }
 0x7d0   :  { %v5519_v50 = vsel %vm2065_vm6, %v2067_v47, %v2063_v45 }
 0x7d1   :  { %v2078_v48 = vsel %vm2077_vm5, %v4205_v63, %v2074_v43 }
 0x7d2   :  { %v2083_v53 = vsel %vm2080_vm7, %v2082_v4, %v2078_v48 }
 0x81a   :  { %v1952_v28 = vpop.permute.xlu0 %1951 }
 0x81b   :  { %v1954_v16 = vpop.permute.xlu1 %1953  ;;  %v1957_v19 = vmul.f32 %v1952_v28, %v5506_v11  ;;  %v4448_v28 = vmov 5  }
 0x81c   :  { %v1958_v21 = vmul.f32 %v1954_v16, %v5508_v20 }
 0x81d   :  { %1961 = vrot.lane.b32.xlu1 %v1957_v19, %s4442_s10 }
 0x81e   :  { %1963 = vrot.lane.b32.xlu2 %v1958_v21, %s4442_s10 }
 0x824   :  { %v2101_v49 = vpop.permute.xlu0 %2100 }
 0x825   :  { %2092 = vrot.lane.b32.xlu1 %v2089_v2, %s4442_s10  ;;  %v2106_v52 = vmul.f32 %v2101_v49, %v5519_v50  ;;  %v2103_v41 = vpop.permute.xlu1 %2102 }
 0x826   :  { %v2107_v54 = vmul.f32 %v2103_v41, %v2083_v53 }
 0x827   :  { %2110 = vrot.lane.b32.xlu2 %v2106_v52, %s4442_s10 }
 0x828   :  { %2112 = vrot.lane.b32.xlu0 %v2107_v54, %s4442_s10 }
 0x82c   :  { %v1944_v58 = vpop.permute.xlu0 %1943 }
 0x82d   :  { %v1948_v61 = vmul.f32 %v1944_v58, %v5508_v20 }
 0x834   :  { %v2091_v15 = vpop.permute.xlu0 %2090 }
 0x835   :  { %v2096_v26 = vmul.f32 %v2091_v15, %v5519_v50 }
 0x878   :  { %v1964_v63 = vpop.permute.xlu2 %1963 }
 0x879   :  { %v1968_v0 = vadd.f32 %v1964_v63, %v1948_v61 }
 0x87b   :  { %4206 = vtanh.f32 %v1968_v0  ;;  %v2003_v24 = vrot.slane %v1968_v0, 1 }
 0x881   :  { %v4207_v18 = vpop.eup %4206  ;;  %v2111_v1 = vpop.permute.xlu2 %2110 }
 0x882   :  { %1975 = vrot.lane.b32.xlu2 %v4207_v18, %s4441_s9  ;;  %v2116_v3 = vadd.f32 %v2111_v1, %v2096_v26 }
 0x884   :  { %4208 = vtanh.f32 %v2116_v3  ;;  %v2151_v33 = vrot.slane %v2116_v3, 5 }
 0x88a   :  { %1982 = vperm.xlu2 %4106, %v5336_v59   ;;  %v4209_v5 = vpop.eup %4208 }
 0x88b   :  { %2122 = vrot.lane.b32.xlu0 %v4209_v5, %s4441_s9  ;;  %v5574_v5 = vld [vmem:[%s6142_s11 + $0x18] sm:$0xff] }
 0x88f   :  { %v1962_v8 = vpop.permute.xlu1 %1961 }
 0x890   :  { %v1967_v13 = vadd.f32 %v1962_v8, %v1947_v6  ;;  %v5581_v6 = vld [vmem:[%s6142_s11 + $0x10] sm:$0xff]  ;;  %v5588_v8 = vld [vmem:[%s6142_s11 + $0x8] sm:$0xff] }
 0x892   :  { %4210 = vtanh.f32 %v1967_v13  ;;  %v2002_v27 = vrot.slane %v1967_v13, 2  ;;  %4108 = vset.pattern.permute.xlu2 %v4448_v28  ;;  %v5594_v13 = vld [vmem:[%s6142_s11] sm:$0xff] }
 0x893   :  { %2131 = vperm.xlu2 %4108, %v5336_v59  }
 0x894   :  { %v5532_v16 = vsel %vm1006_vm4, %v2003_v24, %v2002_v27 }
 0x897   :  { %v2093_v9 = vpop.permute.xlu1 %2092 }
 0x898   :  { %v4211_v19 = vpop.eup %4210  ;;  %v2097_v21 = vmul.f32 %v2093_v9, %v2083_v53 }
 0x899   :  { %1973 = vrot.lane.b32.xlu1 %v4211_v19, %s4441_s9 }
 0x89a   :  { %v2113_v29 = vpop.permute.xlu0 %2112 }
 0x89b   :  { %v2117_v32 = vadd.f32 %v2113_v29, %v2097_v21 }
 0x89d   :  { %4212 = vtanh.f32 %v2117_v32  ;;  %v2152_v56 = vrot.slane %v2117_v32, 4 }
 0x89f   :  { %v2153_v38 = vsel %vm1006_vm4, %v2152_v56, %v2151_v33 }
 0x8a0   :  { %2154 = vrot.lane.b32.xlu2 %v2153_v38, %s4444_s6 }
 0x8a3   :  { %v4213_v43 = vpop.eup %4212 }
 0x8a4   :  { %2124 = vrot.lane.b32.xlu1 %v4213_v43, %s4441_s9 }
 0x8ac   :  { %1995 = vperm.xlu1 %4107, %v5339_v60  }
 0x8b4   :  { %4109 = vset.pattern.permute.xlu1 %v4448_v28 }
 0x8b5   :  { %2144 = vperm.xlu1 %4109, %v5339_v60  }
 0x8dc   :  { %v1976_v59 = vpop.permute.xlu2 %1975 }
 0x8dd   :  { %v1980_v2 = vmul.f32 %v1976_v59, %v5508_v20 }
 0x8df   :  { %v1988_v46 = vrot.slane %v1980_v2, 1 }
 0x8e4   :  { %v5544_v49 = vpop.permute.xlu2 %1982 }
 0x8ed   :  { %v5547_v58 = vpop.permute.xlu2 %2131 }
 0x8fa   :  { %v2155_v61 = vpop.permute.xlu2 %2154 }
 0x8fb   :  { %v2157_v0 = vmul.f32 %v2155_v61, %v5547_v58 }
 0x8fd   :  { %v2123_v4 = vpop.permute.xlu0 %2122 }
 0x8fe   :  { %v2128_v52 = vmul.f32 %v2123_v4, %v5519_v50 }
 0x900   :  { %v2136_v31 = vrot.slane %v2128_v52, 5 }
 0x90b   :  { %v1974_v44 = vpop.permute.xlu1 %1973 }
 0x90c   :  { %v1979_v45 = vmul.f32 %v1974_v44, %v5506_v11 }
 0x90e   :  { %v1987_v47 = vrot.slane %v1979_v45, 2 }
 0x910   :  { %v1989_v48 = vsel %vm1006_vm4, %v1988_v46, %v1987_v47 }
 0x911   :  { %1990 = vrot.lane.b32.xlu0 %v1989_v48, %s4442_s10 }
 0x916   :  { %v2125_v41 = vpop.permute.xlu1 %2124 }
 0x917   :  { %v2129_v54 = vmul.f32 %v2125_v41, %v2083_v53 }
 0x919   :  { %v2137_v55 = vrot.slane %v2129_v54, 4 }
 0x91b   :  { %v2138_v20 = vsel %vm1006_vm4, %v2137_v55, %v2136_v31 }
 0x91c   :  { %2139 = vrot.lane.b32.xlu0 %v2138_v20, %s4442_s10 }
 0x91e   :  { %v5551_v11 = vpop.permute.xlu1 %1995 }
 0x91f   :  { %v1998_v26 = vmul.f32 %v5551_v11, %v5460_v57 }
 0x927   :  { %v5553_v63 = vpop.permute.xlu1 %2144 }
 0x928   :  { %v2158_v50 = vmul.f32 %v5553_v63, %v5498_v23  ;;  %v2147_v27 = vmul.f32 %v5553_v63, %v5477_v12 }
 0x92a   :  { %v5558_v15 = vadd.f32 %v2158_v50, %v2157_v0 }
 0x92c   :  { %v2393_v53 = vrot.slane %v5558_v15, 4  ;;  %v2394_v44 = vrot.slane %v5558_v15, 5 }
 0x92e   :  { %2395 = vrot.lane.b32.xlu2 %v2393_v53, %s4442_s10 }
 0x983   :  { %v1991_v18 = vpop.permute.xlu0 %1990 }
 0x984   :  { %v1993_v1 = vmul.f32 %v1991_v18, %v5544_v49 }
 0x986   :  { %v5565_v3 = vadd.f32 %v1998_v26, %v1993_v1 }
 0x988   :  { %4031 = vmatmul.msk.f32.vlgmr.msra.gmra.mxu3 %vm1282_vm15, %v5565_v3  ;;  %v2011_v23 = vmul.f32 %v5565_v3, %v5544_v49 }
 0x989   :  { %2634 = vmatpush.msra.mxu3 %v5574_v5 }
 0x98a   :  { %2015 = vst.msk [vmem:[#allocation2 + $0x2] sm:$0x1] %vm1420_vm0, %v2011_v23  ;;  %v2013_v57 = vrot.slane %v2011_v23, 1 }
 0x98b   :  { %2635 = vmatpush.msra.mxu3 %v5581_v6 }
 0x98c   :  { %2016 = vst.msk [vmem:[#allocation2 + $0xa] sm:$0x1] %vm1420_vm0, %v2013_v57 }
 0x98d   :  { %2636 = vmatpush.msra.mxu3 %v5588_v8 }
 0x98e   :  { %v2140_v24 = vpop.permute.xlu0 %2139 }
 0x98f   :  { %2637 = vmatpush.msra.mxu3 %v5594_v13  ;;  %v2142_v28 = vmul.f32 %v2140_v24, %v5547_v58 }
 0x991   :  { %v5600_v19 = vadd.f32 %v2147_v27, %v2142_v28 }
 0x993   :  { %4034 = vmatmul.msk.f32.vlgmr.msrb.gmra.mxu3 %vm1282_vm15, %v5600_v19 }
 0x994   :  { %2923 = vmatpush.msrb.mxu3 %v5574_v5 }
 0x996   :  { %2924 = vmatpush.msrb.mxu3 %v5581_v6 }
 0x998   :  { %2925 = vmatpush.msrb.mxu3 %v5588_v8 }
 0x99a   :  { %2926 = vmatpush.msrb.mxu3 %v5594_v13 }
 0xa0b   :  { %v5608_v9 = vpop.f32.mrf.mxu3 }
 0xa0c   :  { %v2197_v59 = vrot.slane %v5608_v9, 5 }
 0xa0e   :  { %v2201_v2 = vadd.f32 %v2197_v59, %v5304_v10 }
 0xa10   :  { %v4032_v54 = vmul.f32 -1.442695, %v2201_v2 }
 0xa16   :  { %v2342_v21 = vpop.f32.mrf.mxu3 }
 0xa17   :  { %v2346_v29 = vrot.slane %v2342_v21, 4  ;;  %v2347_v32 = vrot.slane %v2342_v21, 5  ;;  %v2198_v21 = vrot.slane %v5608_v9, 6 }
 0xa19   :  { %v2350_v33 = vadd.f32 %v2346_v29, %v5306_v14  ;;  %v2351_v56 = vadd.f32 %v2347_v32, %v5311_v22  ;;  %v2202_v59 = vadd.f32 %v2198_v21, %v5301_v62  ;;  %v2396_v21 = vpop.permute.xlu2 %2395 }
 0xa1b   :  { %4214 = vtanh.f32 %v2350_v33  ;;  %v4035_v46 = vmul.f32 -1.442695, %v2350_v33  ;;  %v4036_v47 = vmul.f32 -1.442695, %v2351_v56 }
 0xa1c   :  { %4216 = vtanh.f32 %v2351_v56 }
 0xa1d   :  { %4218 = vtanh.f32 %v2201_v2 }
 0xa1e   :  { %4220 = vpow2.f32 %v4035_v46 }
 0xa1f   :  { %4222 = vpow2.f32 %v4036_v47 }
 0xa21   :  { %v4215_v38 = vpop.eup %4214 }
 0xa22   :  { %v4217_v43 = vpop.eup %4216  ;;  %2405 = vrot.lane.b32.xlu0 %v4215_v38, %s4441_s9 }
 0xa23   :  { %2407 = vrot.lane.b32.xlu1 %v4217_v43, %s4441_s9  ;;  %v4219_v45 = vpop.eup %4218 }
 0xa24   :  { %v4221_v48 = vpop.eup %4220 }
 0xa25   :  { %v4223_v4 = vpop.eup %4222  ;;  %v2358_v52 = vadd.f32 1.0, %v4221_v48 }
 0xa26   :  { %v2359_v41 = vadd.f32 1.0, %v4223_v4 }
 0xa27   :  { %4224 = vrcp.f32 %v2358_v52  ;;  %v2371_v57 = vand.u32 2147483648, %v2358_v52  ;;  %vm2365_vm10 = vweird.f32 %v2358_v52  ;;  %v2369_v28 = vand.u32 2147483647, %v2358_v52 }
 0xa28   :  { %4226 = vrcp.f32 %v2359_v41  ;;  %v2386_v27 = vand.u32 2147483648, %v2359_v41  ;;  %vm2380_vm11 = vweird.f32 %v2359_v41  ;;  %v2384_v29 = vand.u32 2147483647, %v2359_v41 }
 0xa29   :  { %4228 = vpow2.f32 %v4032_v54  ;;  %v2372_v56 = vor.u32 1.1754944e-38, %v2371_v57  ;;  %vm2370_vm14 = vcmp.eq.f32.partialorder %v2369_v28, 8.507059e+37  ;;  %v2009_v54 = vmul.f32 %v5551_v11, %v5453_v51 }
 0xa2a   :  { %2397 = vrot.lane.b32.xlu0 %v2394_v44, %s4442_s10  ;;  %v2387_v43 = vor.u32 1.1754944e-38, %v2386_v27  ;;  %vm2385_vm1 = vcmp.eq.f32.partialorder %v2384_v29, 8.507059e+37 }
 0xa2b   :  { %2005 = vrot.lane.b32.xlu1 %v5532_v16, %s4444_s6 }
 0xa2d   :  { %v4225_v31 = vpop.eup %4224 }
 0xa2e   :  { %v4227_v55 = vpop.eup %4226  ;;  %v2361_v20 = vmul.f32 %v4225_v31, %v2358_v52  ;;  %vm2366_vm8 = vweird.f32 %v4225_v31 }
 0xa2f   :  { %v4229_v16 = vpop.eup %4228  ;;  %v2376_v61 = vmul.f32 %v4227_v55, %v2359_v41  ;;  %vm2381_vm9 = vweird.f32 %v4227_v55  ;;  %vm2367_vm12 = vmor %vm2365_vm10, %vm2366_vm8 }
 0xa30   :  { %v2209_v0 = vadd.f32 1.0, %v4229_v16  ;;  %v2362_v50 = vsub.f32 1.0, %v2361_v20  ;;  %vm2382_vm13 = vmor %vm2380_vm11, %vm2381_vm9 }
 0xa31   :  { %v2377_v53 = vsub.f32 1.0, %v2376_v61 }
 0xa32   :  { %4230 = vrcp.f32 %v2209_v0  ;;  %v2363_v18 = vmul.f32 %v4225_v31, %v2362_v50  ;;  %v2222_v20 = vand.u32 2147483648, %v2209_v0  ;;  %vm2216_vm3 = vweird.f32 %v2209_v0 }
 0xa33   :  { %2256 = vrot.lane.b32.xlu1 %v4219_v45, %s4441_s9  ;;  %v2378_v26 = vmul.f32 %v4227_v55, %v2377_v53  ;;  %4232 = vtanh.f32 %v2202_v59  ;;  %v2220_v61 = vand.u32 2147483647, %v2209_v0 }
 0xa34   :  { %v2364_v1 = vadd.f32 %v4225_v31, %v2363_v18 }
 0xa35   :  { %v2379_v23 = vadd.f32 %v4227_v55, %v2378_v26  ;;  %v2223_v26 = vor.u32 1.1754944e-38, %v2222_v20  ;;  %vm2221_vm6 = vcmp.eq.f32.partialorder %v2220_v61, 8.507059e+37 }
 0xa36   :  { %v2368_v32 = vsel %vm2367_vm12, %v4225_v31, %v2364_v1 }
 0xa37   :  { %v2383_v33 = vsel %vm2382_vm13, %v4227_v55, %v2379_v23  ;;  %v5623_v44 = vsel %vm2370_vm14, %v2372_v56, %v2368_v32 }
 0xa38   :  { %v4231_v24 = vpop.eup %4230  ;;  %v5625_v46 = vsel %vm2385_vm1, %v2387_v43, %v2383_v33  ;;  %v2401_v33 = vmul.f32 %v2396_v21, %v5623_v44 }
 0xa39   :  { %v2212_v38 = vmul.f32 %v4231_v24, %v2209_v0  ;;  %v4233_v41 = vpop.eup %4232  ;;  %vm2217_vm2 = vweird.f32 %v4231_v24  ;;  %v4033_v0 = vmul.f32 -1.442695, %v2202_v59 }
 0xa3a   :  { %vm2218_vm5 = vmor %vm2216_vm3, %vm2217_vm2 }
 0xa3b   :  { %v2213_v48 = vsub.f32 1.0, %v2212_v38  ;;  %4234 = vpow2.f32 %v4033_v0 }
 0xa3d   :  { %v2214_v4 = vmul.f32 %v4231_v24, %v2213_v48 }
 0xa3f   :  { %v2215_v55 = vadd.f32 %v4231_v24, %v2214_v4 }
 0xa41   :  { %v2219_v18 = vsel %vm2218_vm5, %v4231_v24, %v2215_v55  ;;  %v4235_v57 = vpop.eup %4234 }
 0xa42   :  { %v5641_v51 = vsel %vm2221_vm6, %v2223_v26, %v2219_v18  ;;  %v2210_v27 = vadd.f32 1.0, %v4235_v57 }
 0xa44   :  { %4236 = vrcp.f32 %v2210_v27  ;;  %vm2231_vm8 = vweird.f32 %v2210_v27 }
 0xa4a   :  { %v4237_v28 = vpop.eup %4236 }
 0xa4b   :  { %v2227_v24 = vmul.f32 %v4237_v28, %v2210_v27  ;;  %vm2232_vm7 = vweird.f32 %v4237_v28 }
 0xa4c   :  { %vm2233_vm9 = vmor %vm2231_vm8, %vm2232_vm7 }
 0xa4d   :  { %v2228_v29 = vsub.f32 1.0, %v2227_v24 }
 0xa4f   :  { %v2229_v32 = vmul.f32 %v4237_v28, %v2228_v29 }
 0xa51   :  { %v2230_v43 = vadd.f32 %v4237_v28, %v2229_v32 }
 0xa53   :  { %v2234_v59 = vsel %vm2233_vm9, %v4237_v28, %v2230_v43 }
 0xa94   :  { %v2406_v2 = vpop.permute.xlu0 %2405 }
 0xa95   :  { %v2408_v45 = vpop.permute.xlu1 %2407  ;;  %v2411_v9 = vmul.f32 %v2406_v2, %v5623_v44  ;;  %v2237_v2 = vand.u32 2147483648, %v2210_v27 }
 0xa96   :  { %v2412_v47 = vmul.f32 %v2408_v45, %v5625_v46  ;;  %v2235_v45 = vand.u32 2147483647, %v2210_v27 }
 0xa97   :  { %2415 = vrot.lane.b32.xlu2 %v2411_v9, %s4442_s10  ;;  %v2238_v9 = vor.u32 1.1754944e-38, %v2237_v2 }
 0xa98   :  { %2417 = vrot.lane.b32.xlu0 %v2412_v47, %s4442_s10  ;;  %vm2236_vm10 = vcmp.eq.f32.partialorder %v2235_v45, 8.507059e+37 }
 0xa99   :  { %v2239_v47 = vsel %vm2236_vm10, %v2238_v9, %v2234_v59 }
 0xa9d   :  { %v2006_v52 = vpop.permute.xlu1 %2005 }
 0xa9e   :  { %v2008_v31 = vmul.f32 %v2006_v52, %v5544_v49 }
 0xa9f   :  { %2258 = vrot.lane.b32.xlu2 %v4233_v41, %s4441_s9  ;;  %v4449_v41 = vmov 4  }
 0xaa0   :  { %v5635_v16 = vadd.f32 %v2009_v54, %v2008_v31  ;;  %4111 = vset.pattern.permute.xlu2 %v4449_v41  ;;  %4110 = vset.pattern.permute.xlu0 %v4449_v41  ;;  %v2398_v54 = vpop.permute.xlu0 %2397  ;;  %v4396_v31 = vld [vmem:[%s6133_s2] sm:$0x3] }
 0xaa1   :  { %v2402_v55 = vmul.f32 %v2398_v54, %v5625_v46 }
 0xaa2   :  { %v2245_v50 = vrot.slane %v5635_v16, 6  ;;  %v2244_v53 = vrot.slane %v5635_v16, 5 }
 0xaa4   :  { %2248 = vrot.lane.b32.xlu1 %v2245_v50, %s4442_s10  ;;  %2246 = vrot.lane.b32.xlu0 %v2244_v53, %s4442_s10 }
 0xaa5   :  { %v2257_v1 = vpop.permute.xlu1 %2256 }
 0xaa6   :  { %v2262_v23 = vmul.f32 %v2257_v1, %v5641_v51  ;;  %v4450_v1 = vmov 3  }
 0xaa8   :  { %2266 = vrot.lane.b32.xlu2 %v2262_v23, %s4442_s10 }
 0xaf1   :  { %v2416_v56 = vpop.permute.xlu2 %2415 }
 0xaf2   :  { %v2421_v38 = vadd.f32 %v2416_v56, %v2401_v33 }
 0xaf4   :  { %4238 = vtanh.f32 %v2421_v38  ;;  %v2456_v50 = vrot.slane %v2421_v38, 4 }
 0xaf9   :  { %v2259_v48 = vpop.permute.xlu2 %2258 }
 0xafa   :  { %v4239_v4 = vpop.eup %4238  ;;  %v2263_v52 = vmul.f32 %v2259_v48, %v2239_v47 }
 0xafb   :  { %2427 = vrot.lane.b32.xlu1 %v4239_v4, %s4441_s9 }
 0xafc   :  { %2268 = vrot.lane.b32.xlu0 %v2263_v52, %s4442_s10 }
 0xb02   :  { %v2267_v0 = vpop.permute.xlu2 %2266 }
 0xb04   :  { %2436 = vperm.xlu0 %4110, %v4396_v31  }
 0xb0a   :  { %v2418_v20 = vpop.permute.xlu0 %2417 }
 0xb0b   :  { %v2422_v61 = vadd.f32 %v2418_v20, %v2402_v55 }
 0xb0c   :  { %4112 = vset.pattern.permute.xlu0 %v4450_v1 }
 0xb0d   :  { %4240 = vtanh.f32 %v2422_v61  ;;  %v2457_v53 = vrot.slane %v2422_v61, 3  ;;  %2287 = vperm.xlu0 %4112, %v4396_v31  }
 0xb0f   :  { %v2458_v18 = vsel %vm1006_vm4, %v2457_v53, %v2456_v50 }
 0xb13   :  { %v4241_v26 = vpop.eup %4240 }
 0xb14   :  { %2429 = vrot.lane.b32.xlu2 %v4241_v26, %s4441_s9 }
 0xb15   :  { %4114 = vset.pattern.permute.xlu0 %v4439_v35 }
 0xb16   :  { %v2249_v23 = vpop.permute.xlu1 %2248  ;;  %v2247_v57 = vpop.permute.xlu0 %2246 }
 0xb17   :  { %v2252_v27 = vmul.f32 %v2247_v57, %v5641_v51  ;;  %v2253_v28 = vmul.f32 %v2249_v23, %v2239_v47 }
 0xb19   :  { %v2272_v24 = vadd.f32 %v2267_v0, %v2252_v27 }
 0xb1b   :  { %v2307_v2 = vrot.slane %v2272_v24, 3 }
 0xb1c   :  { %2449 = vperm.xlu2 %4111, %v5339_v60  }
 0xb24   :  { %4113 = vset.pattern.permute.xlu2 %v4450_v1 }
 0xb6d   :  { %v2428_v21 = vpop.permute.xlu1 %2427 }
 0xb6e   :  { %v2433_v29 = vmul.f32 %v2428_v21, %v5623_v44  ;;  %v2430_v32 = vpop.permute.xlu2 %2429  ;;  %v2269_v33 = vpop.permute.xlu0 %2268 }
 0xb6f   :  { %v2434_v56 = vmul.f32 %v2430_v32, %v5625_v46  ;;  %v2273_v38 = vadd.f32 %v2269_v33, %v2253_v28 }
 0xb70   :  { %v2441_v43 = vrot.slane %v2433_v29, 4 }
 0xb71   :  { %v2442_v45 = vrot.slane %v2434_v56, 3  ;;  %4242 = vtanh.f32 %v2273_v38  ;;  %v2308_v59 = vrot.slane %v2273_v38, 2 }
 0xb72   :  { %4244 = vtanh.f32 %v2272_v24 }
 0xb73   :  { %v2443_v9 = vsel %vm1006_vm4, %v2442_v45, %v2441_v43  ;;  %v2309_v35 = vsel %vm1006_vm4, %v2308_v59, %v2307_v2 }
 0xb74   :  { %2444 = vrot.lane.b32.xlu1 %v2443_v9, %s4442_s10 }
 0xb76   :  { %v5665_v46 = vpop.permute.xlu2 %2449  ;;  %v5667_v4 = vpop.permute.xlu0 %2436 }
 0xb77   :  { %v4243_v48 = vpop.eup %4242  ;;  %v2452_v54 = vmul.f32 %v5665_v46, %v5600_v19  ;;  %v2463_v32 = vmul.f32 %v5665_v46, %v5558_v15 }
 0xb78   :  { %2280 = vrot.lane.b32.xlu2 %v4243_v48, %s4441_s9  ;;  %v4245_v44 = vpop.eup %4244 }
 0xb7c   :  { %2278 = vrot.lane.b32.xlu1 %v4245_v44, %s4441_s9 }
 0xb80   :  { %2300 = vperm.xlu2 %4113, %v5339_v60  }
 0xbd2   :  { %v2281_v55 = vpop.permute.xlu2 %2280 }
 0xbd3   :  { %v2285_v20 = vmul.f32 %v2281_v55, %v2239_v47  ;;  %v5687_v47 = vpop.permute.xlu0 %2287 }
 0xbd5   :  { %v2293_v50 = vrot.slane %v2285_v20, 2 }
 0xbe6   :  { %v2445_v52 = vpop.permute.xlu1 %2444 }
 0xbe7   :  { %v2447_v41 = vmul.f32 %v2445_v52, %v5667_v4 }
 0xbe9   :  { %v5672_v31 = vadd.f32 %v2452_v54, %v2447_v41 }
 0xbeb   :  { %4040 = vmatmul.msk.f32.vlgmr.msra.gmra.mxu3 %vm1282_vm15, %v5672_v31 }
 0xbec   :  { %3486 = vmatpush.msra.mxu3 %v5574_v5  ;;  %v5685_v5 = vpop.permute.xlu2 %2300 }
 0xbee   :  { %v2279_v60 = vpop.permute.xlu1 %2278  ;;  %3487 = vmatpush.msra.mxu3 %v5581_v6 }
 0xbef   :  { %v2284_v61 = vmul.f32 %v2279_v60, %v5641_v51 }
 0xbf0   :  { %3488 = vmatpush.msra.mxu3 %v5588_v8  ;;  %v2303_v8 = vmul.f32 %v5685_v5, %v5565_v3 }
 0xbf1   :  { %v2292_v53 = vrot.slane %v2284_v61, 3 }
 0xbf2   :  { %3489 = vmatpush.msra.mxu3 %v5594_v13 }
 0xbf3   :  { %v2294_v26 = vsel %vm1006_vm4, %v2293_v50, %v2292_v53 }
 0xbf4   :  { %2295 = vrot.lane.b32.xlu1 %v2294_v26, %s4442_s10 }
 0xbfc   :  { %2459 = vrot.lane.b32.xlu1 %v2458_v18, %s4444_s6 }
 0xc04   :  { %2310 = vrot.lane.b32.xlu1 %v2309_v35, %s4444_s6 }
 0xc66   :  { %v2296_v6 = vpop.permute.xlu1 %2295 }
 0xc67   :  { %v2298_v51 = vmul.f32 %v2296_v6, %v5687_v47  ;;  %v2314_v6 = vmul.f32 %v5685_v5, %v5635_v16 }
 0xc69   :  { %v5692_v1 = vadd.f32 %v2303_v8, %v2298_v51 }
 0xc6b   :  { %v2316_v13 = vmul.f32 %v5692_v1, %v5687_v47  ;;  %4037 = vmatmul.msk.f32.vlgmr.msrb.gmra.mxu0 %vm1282_vm15, %v5692_v1 }
 0xc6d   :  { %2320 = vst.msk [vmem:[#allocation2 + $0x3] sm:$0x1] %vm1420_vm0, %v2316_v13  ;;  %v2318_v18 = vrot.slane %v2316_v13, 1 }
 0xc6e   :  { %v2639_v23 = vpop.f32.mrf.mxu3  ;;  %v2460_v28 = vpop.permute.xlu1 %2459 }
 0xc6f   :  { %v2643_v0 = vrot.slane %v2639_v23, 5  ;;  %v2644_v57 = vrot.slane %v2639_v23, 6  ;;  %2321 = vst.msk [vmem:[#allocation2 + $0xb] sm:$0x1] %vm1420_vm0, %v2318_v18  ;;  %v2462_v24 = vmul.f32 %v2460_v28, %v5667_v4 }
 0xc71   :  { %v2647_v27 = vadd.f32 %v2643_v0, %v5306_v14  ;;  %v2648_v3 = vadd.f32 %v2644_v57, %v5311_v22  ;;  %v5707_v33 = vadd.f32 %v2463_v32, %v2462_v24 }
 0xc73   :  { %4246 = vtanh.f32 %v2647_v27  ;;  %v2690_v56 = vrot.slane %v5707_v33, 5  ;;  %v2691_v38 = vrot.slane %v5707_v33, 6  ;;  %v4041_v43 = vmul.f32 -1.442695, %v2647_v27 }
 0xc74   :  { %4248 = vtanh.f32 %v2648_v3  ;;  %v4042_v48 = vmul.f32 -1.442695, %v2648_v3 }
 0xc75   :  { %4250 = vpow2.f32 %v4041_v43 }
 0xc76   :  { %v2311_v55 = vpop.permute.xlu1 %2310 }
 0xc77   :  { %v2313_v50 = vmul.f32 %v2311_v55, %v5687_v47 }
 0xc79   :  { %v4247_v21 = vpop.eup %4246  ;;  %v5720_v8 = vadd.f32 %v2314_v6, %v2313_v50 }
 0xc7a   :  { %v4249_v29 = vpop.eup %4248  ;;  %2702 = vrot.lane.b32.xlu2 %v4247_v21, %s4441_s9 }
 0xc7b   :  { %2704 = vrot.lane.b32.xlu0 %v4249_v29, %s4441_s9  ;;  %v4251_v2 = vpop.eup %4250  ;;  %v2550_v13 = vrot.slane %v5720_v8, 5 }
 0xc7c   :  { %v2655_v45 = vadd.f32 1.0, %v4251_v2 }
 0xc7e   :  { %4252 = vrcp.f32 %v2655_v45  ;;  %v2668_v52 = vand.u32 2147483648, %v2655_v45  ;;  %vm2662_vm12 = vweird.f32 %v2655_v45  ;;  %v2666_v41 = vand.u32 2147483647, %v2655_v45 }
 0xc7f   :  { %4254 = vpow2.f32 %v4042_v48 }
 0xc80   :  { %v2669_v20 = vor.u32 1.1754944e-38, %v2668_v52  ;;  %vm2667_vm14 = vcmp.eq.f32.partialorder %v2666_v41, 8.507059e+37 }
 0xc82   :  { %2692 = vrot.lane.b32.xlu2 %v2690_v56, %s4442_s10 }
 0xc83   :  { %2694 = vrot.lane.b32.xlu0 %v2691_v38, %s4442_s10 }
 0xc84   :  { %v4253_v15 = vpop.eup %4252 }
 0xc85   :  { %v2658_v59 = vmul.f32 %v4253_v15, %v2655_v45  ;;  %vm2663_vm11 = vweird.f32 %v4253_v15  ;;  %v4255_v26 = vpop.eup %4254 }
 0xc86   :  { %vm2664_vm13 = vmor %vm2662_vm12, %vm2663_vm11  ;;  %v2656_v51 = vadd.f32 1.0, %v4255_v26 }
 0xc87   :  { %v2659_v9 = vsub.f32 1.0, %v2658_v59 }
 0xc88   :  { %4256 = vrcp.f32 %v2656_v51  ;;  %v2683_v32 = vand.u32 2147483648, %v2656_v51  ;;  %vm2677_vm2 = vweird.f32 %v2656_v51  ;;  %v2681_v38 = vand.u32 2147483647, %v2656_v51 }
 0xc89   :  { %v2660_v35 = vmul.f32 %v4253_v15, %v2659_v9  ;;  %v2549_v9 = vrot.slane %v5720_v8, 4 }
 0xc8a   :  { %v2684_v45 = vor.u32 1.1754944e-38, %v2683_v32  ;;  %vm2682_vm5 = vcmp.eq.f32.partialorder %v2681_v38, 8.507059e+37 }
 0xc8b   :  { %v2661_v44 = vadd.f32 %v4253_v15, %v2660_v35 }
 0xc8d   :  { %v2665_v54 = vsel %vm2664_vm13, %v4253_v15, %v2661_v44 }
 0xc8e   :  { %v5713_v60 = vsel %vm2667_vm14, %v2669_v20, %v2665_v54  ;;  %v4257_v18 = vpop.eup %4256 }
 0xc8f   :  { %v2673_v23 = vmul.f32 %v4257_v18, %v2656_v51  ;;  %vm2678_vm1 = vweird.f32 %v4257_v18 }
 0xc90   :  { %vm2679_vm3 = vmor %vm2677_vm2, %vm2678_vm1 }
 0xc91   :  { %v2674_v3 = vsub.f32 1.0, %v2673_v23 }
 0xc93   :  { %v2675_v24 = vmul.f32 %v4257_v18, %v2674_v3 }
 0xc95   :  { %v2676_v21 = vadd.f32 %v4257_v18, %v2675_v24 }
 0xc97   :  { %v2680_v43 = vsel %vm2679_vm3, %v4257_v18, %v2676_v21 }
 0xc98   :  { %v5728_v15 = vsel %vm2682_vm5, %v2684_v45, %v2680_v43 }
 0xcd4   :  { %v2703_v61 = vpop.permute.xlu2 %2702 }
 0xcd5   :  { %v2708_v53 = vmul.f32 %v2703_v61, %v5713_v60 }
 0xcd7   :  { %2712 = vrot.lane.b32.xlu0 %v2708_v53, %s4442_s10 }
 0xcdc   :  { %v2693_v53 = vpop.permute.xlu2 %2692 }
 0xcdd   :  { %v2698_v6 = vmul.f32 %v2693_v53, %v5713_v60 }
 0xcdf   :  { %2553 = vrot.lane.b32.xlu0 %v2550_v13, %s4442_s10 }
 0xce8   :  { %v2498_v0 = vpop.f32.mrf.mxu0 }
 0xce9   :  { %v2502_v57 = vrot.slane %v2498_v0, 4  ;;  %v2503_v27 = vrot.slane %v2498_v0, 5 }
 0xceb   :  { %v2506_v28 = vadd.f32 %v2502_v57, %v5304_v10  ;;  %v2507_v16 = vadd.f32 %v2503_v27, %v5301_v62 }
 0xced   :  { %4258 = vtanh.f32 %v2506_v28  ;;  %v2705_v2 = vpop.permute.xlu0 %2704  ;;  %v4039_v35 = vmul.f32 -1.442695, %v2507_v16  ;;  %v4038_v41 = vmul.f32 -1.442695, %v2506_v28 }
 0xcee   :  { %4260 = vtanh.f32 %v2507_v16  ;;  %v2709_v59 = vmul.f32 %v2705_v2, %v5728_v15 }
 0xcef   :  { %4262 = vpow2.f32 %v4039_v35 }
 0xcf3   :  { %v4259_v29 = vpop.eup %4258 }
 0xcf4   :  { %v4261_v56 = vpop.eup %4260  ;;  %2561 = vrot.lane.b32.xlu1 %v4259_v29, %s4441_s9 }
 0xcf5   :  { %2563 = vrot.lane.b32.xlu2 %v4261_v56, %s4441_s9  ;;  %v4263_v48 = vpop.eup %4262  ;;  %v2695_v20 = vpop.permute.xlu0 %2694 }
 0xcf6   :  { %v2515_v44 = vadd.f32 1.0, %v4263_v48 }
 0xcf8   :  { %4264 = vrcp.f32 %v2515_v44  ;;  %v2542_v18 = vand.u32 2147483648, %v2515_v44  ;;  %vm2536_vm7 = vweird.f32 %v2515_v44  ;;  %v2540_v0 = vand.u32 2147483647, %v2515_v44 }
 0xcf9   :  { %4266 = vpow2.f32 %v4038_v41 }
 0xcfa   :  { %v2543_v27 = vor.u32 1.1754944e-38, %v2542_v18  ;;  %vm2541_vm9 = vcmp.eq.f32.partialorder %v2540_v0, 8.507059e+37 }
 0xcfc   :  { %2714 = vrot.lane.b32.xlu1 %v2709_v59, %s4442_s10 }
 0xcfd   :  { %2551 = vrot.lane.b32.xlu2 %v2549_v9, %s4442_s10 }
 0xcfe   :  { %v4265_v52 = vpop.eup %4264 }
 0xcff   :  { %v2532_v54 = vmul.f32 %v4265_v52, %v2515_v44  ;;  %v4267_v61 = vpop.eup %4266  ;;  %vm2537_vm6 = vweird.f32 %v4265_v52  ;;  %v2699_v44 = vmul.f32 %v2695_v20, %v5728_v15 }
 0xd00   :  { %v2514_v26 = vadd.f32 1.0, %v4267_v61  ;;  %vm2538_vm8 = vmor %vm2536_vm7, %vm2537_vm6 }
 0xd01   :  { %v2533_v55 = vsub.f32 1.0, %v2532_v54 }
 0xd02   :  { %4268 = vrcp.f32 %v2514_v26  ;;  %v2527_v43 = vand.u32 2147483648, %v2514_v26  ;;  %vm2521_vm11 = vweird.f32 %v2514_v26  ;;  %v2525_v2 = vand.u32 2147483647, %v2514_v26 }
 0xd03   :  { %v2534_v50 = vmul.f32 %v4265_v52, %v2533_v55 }
 0xd04   :  { %v2528_v59 = vor.u32 1.1754944e-38, %v2527_v43  ;;  %vm2526_vm13 = vcmp.eq.f32.partialorder %v2525_v2, 8.507059e+37 }
 0xd05   :  { %v2535_v51 = vadd.f32 %v4265_v52, %v2534_v50 }
 0xd07   :  { %v2539_v57 = vsel %vm2538_vm8, %v4265_v52, %v2535_v51 }
 0xd08   :  { %v2544_v3 = vsel %vm2541_vm9, %v2543_v27, %v2539_v57  ;;  %v4269_v16 = vpop.eup %4268 }
 0xd09   :  { %v2517_v29 = vmul.f32 %v4269_v16, %v2514_v26  ;;  %vm2522_vm10 = vweird.f32 %v4269_v16 }
 0xd0a   :  { %vm2523_vm12 = vmor %vm2521_vm11, %vm2522_vm10 }
 0xd0b   :  { %v2518_v32 = vsub.f32 1.0, %v2517_v29 }
 0xd0d   :  { %v2519_v56 = vmul.f32 %v4269_v16, %v2518_v32 }
 0xd0f   :  { %v2520_v38 = vadd.f32 %v4269_v16, %v2519_v56 }
 0xd11   :  { %v2524_v45 = vsel %vm2523_vm12, %v4269_v16, %v2520_v38 }
 0xd12   :  { %v2529_v9 = vsel %vm2526_vm13, %v2528_v59, %v2524_v45 }
 0xd49   :  { %v2713_v13 = vpop.permute.xlu0 %2712 }
 0xd4a   :  { %v2718_v23 = vadd.f32 %v2713_v13, %v2698_v6 }
 0xd4c   :  { %4270 = vtanh.f32 %v2718_v23  ;;  %v2745_v54 = vrot.slane %v2718_v23, 3 }
 0xd4f   :  { %v2564_v28 = vpop.permute.xlu2 %2563 }
 0xd50   :  { %v2568_v24 = vmul.f32 %v2564_v28, %v2544_v3 }
 0xd51   :  { %v2554_v26 = vpop.permute.xlu0 %2553 }
 0xd52   :  { %v4271_v21 = vpop.eup %4270  ;;  %2573 = vrot.lane.b32.xlu2 %v2568_v24, %s4442_s10  ;;  %v2558_v6 = vmul.f32 %v2554_v26, %v2544_v3 }
 0xd53   :  { %2724 = vrot.lane.b32.xlu0 %v4271_v21, %s4441_s9 }
 0xd57   :  { %v2552_v53 = vpop.permute.xlu2 %2551 }
 0xd58   :  { %v2557_v20 = vmul.f32 %v2552_v53, %v2529_v9 }
 0xd66   :  { %v2562_v35 = vpop.permute.xlu1 %2561 }
 0xd67   :  { %v2567_v48 = vmul.f32 %v2562_v35, %v2529_v9 }
 0xd69   :  { %2571 = vrot.lane.b32.xlu1 %v2567_v48, %s4442_s10 }
 0xd6e   :  { %v2715_v52 = vpop.permute.xlu1 %2714 }
 0xd6f   :  { %v2719_v41 = vadd.f32 %v2715_v52, %v2699_v44 }
 0xd71   :  { %4272 = vtanh.f32 %v2719_v41  ;;  %v2746_v55 = vrot.slane %v2719_v41, 2 }
 0xd73   :  { %v2747_v61 = vsel %vm1006_vm4, %v2746_v55, %v2745_v54 }
 0xd77   :  { %v4273_v50 = vpop.eup %4272 }
 0xd78   :  { %2726 = vrot.lane.b32.xlu1 %v4273_v50, %s4441_s9 }
 0xdac   :  { %v2574_v51 = vpop.permute.xlu2 %2573 }
 0xdad   :  { %v2578_v13 = vadd.f32 %v2574_v51, %v2558_v6 }
 0xdaf   :  { %4274 = vtanh.f32 %v2578_v13  ;;  %v2605_v57 = vrot.slane %v2578_v13, 3 }
 0xdb5   :  { %v4275_v18 = vpop.eup %4274 }
 0xdb6   :  { %2585 = vrot.lane.b32.xlu0 %v4275_v18, %s4441_s9 }
 0xdbe   :  { %2748 = vrot.lane.b32.xlu0 %v2747_v61, %s4444_s6 }
 0xdc5   :  { %v2725_v24 = vpop.permute.xlu0 %2724 }
 0xdc6   :  { %v2730_v21 = vmul.f32 %v2725_v24, %v5713_v60 }
 0xdc8   :  { %v2734_v56 = vrot.slane %v2730_v21, 3 }
 0xddb   :  { %v2572_v23 = vpop.permute.xlu1 %2571 }
 0xddc   :  { %v2577_v0 = vadd.f32 %v2572_v23, %v2557_v20  ;;  %v2752_v23 = vmul.f32 %v5707_v33, %v5685_v5 }
 0xdde   :  { %4276 = vtanh.f32 %v2577_v0  ;;  %v2604_v27 = vrot.slane %v2577_v0, 4 }
 0xde0   :  { %v2606_v28 = vsel %vm1006_vm4, %v2605_v57, %v2604_v27 }
 0xde1   :  { %2607 = vrot.lane.b32.xlu0 %v2606_v28, %s4444_s6 }
 0xde4   :  { %v4277_v16 = vpop.eup %4276 }
 0xde5   :  { %2583 = vrot.lane.b32.xlu2 %v4277_v16, %s4441_s9 }
 0xdea   :  { %v2727_v29 = vpop.permute.xlu1 %2726 }
 0xdeb   :  { %v2731_v32 = vmul.f32 %v2727_v29, %v5728_v15  ;;  %v2741_v15 = vmul.f32 %v5672_v31, %v5685_v5 }
 0xded   :  { %v2735_v38 = vrot.slane %v2731_v32, 2 }
 0xdef   :  { %v2736_v43 = vsel %vm1006_vm4, %v2735_v38, %v2734_v56 }
 0xdf0   :  { %2737 = vrot.lane.b32.xlu1 %v2736_v43, %s4442_s10 }
 0xe28   :  { %v2586_v2 = vpop.permute.xlu0 %2585 }
 0xe29   :  { %v2590_v45 = vmul.f32 %v2586_v2, %v2544_v3 }
 0xe2b   :  { %v2594_v48 = vrot.slane %v2590_v45, 3  ;;  %v2611_v45 = vmul.f32 %v5665_v46, %v5720_v8 }
 0xe30   :  { %v2749_v13 = vpop.permute.xlu0 %2748 }
 0xe31   :  { %v2751_v18 = vmul.f32 %v2749_v13, %v5687_v47 }
 0xe33   :  { %v5773_v0 = vadd.f32 %v2752_v23, %v2751_v18 }
 0xe35   :  { %v2979_v57 = vrot.slane %v5773_v0, 6  ;;  %v2980_v27 = vrot.slane %v5773_v0, 7 }
 0xe3f   :  { %v2584_v59 = vpop.permute.xlu2 %2583 }
 0xe40   :  { %v2589_v35 = vmul.f32 %v2584_v59, %v2529_v9  ;;  %v2600_v9 = vmul.f32 %v5665_v46, %v5692_v1 }
 0xe42   :  { %v2593_v44 = vrot.slane %v2589_v35, 4 }
 0xe44   :  { %v2595_v52 = vsel %vm1006_vm4, %v2594_v48, %v2593_v44 }
 0xe45   :  { %2596 = vrot.lane.b32.xlu2 %v2595_v52, %s4442_s10 }
 0xe53   :  { %v2608_v32 = vpop.permute.xlu0 %2607 }
 0xe54   :  { %v2610_v43 = vmul.f32 %v2608_v32, %v5667_v4 }
 0xe56   :  { %v5786_v59 = vadd.f32 %v2611_v45, %v2610_v43 }
 0xe58   :  { %v2838_v35 = vrot.slane %v5786_v59, 3 }
 0xe62   :  { %v2738_v60 = vpop.permute.xlu1 %2737 }
 0xe63   :  { %v2740_v41 = vmul.f32 %v2738_v60, %v5687_v47 }
 0xe65   :  { %v5755_v54 = vadd.f32 %v2741_v15, %v2740_v41 }
 0xe67   :  { %4046 = vmatmul.msk.f32.vlgmr.msrb.gmra.mxu3 %vm1282_vm15, %v5755_v54 }
 0xe9f   :  { %v2597_v3 = vpop.permute.xlu2 %2596 }
 0xea0   :  { %v2599_v55 = vmul.f32 %v2597_v3, %v5667_v4 }
 0xea2   :  { %v5762_v61 = vadd.f32 %v2600_v9, %v2599_v55 }
 0xea4   :  { %4043 = vmatmul.msk.f32.vlgmr.msra.gmra.mxu2 %vm1282_vm15, %v5762_v61 }
 0xeea   :  { %v2928_v50 = vpop.f32.mrf.mxu3 }
 0xeeb   :  { %v2932_v53 = vrot.slane %v2928_v50, 6  ;;  %v2933_v26 = vrot.slane %v2928_v50, 7 }
 0xeed   :  { %v2936_v6 = vadd.f32 %v2932_v53, %v5306_v14  ;;  %v2937_v51 = vadd.f32 %v2933_v26, %v5311_v22 }
 0xeef   :  { %4278 = vtanh.f32 %v2936_v6  ;;  %v4048_v28 = vmul.f32 -1.442695, %v2937_v51  ;;  %v4047_v44 = vmul.f32 -1.442695, %v2936_v6 }
 0xef0   :  { %4280 = vtanh.f32 %v2937_v51 }
 0xef1   :  { %4282 = vpow2.f32 %v4048_v28 }
 0xef5   :  { %v4279_v1 = vpop.eup %4278 }
 0xef6   :  { %v4281_v20 = vpop.eup %4280  ;;  %2991 = vrot.lane.b32.xlu1 %v4279_v1, %s4441_s9 }
 0xef7   :  { %2993 = vrot.lane.b32.xlu2 %v4281_v20, %s4441_s9  ;;  %v4283_v29 = vpop.eup %4282 }
 0xef8   :  { %v2945_v56 = vadd.f32 1.0, %v4283_v29  ;;  %v2839_v29 = vrot.slane %v5786_v59, 4 }
 0xefa   :  { %v2972_v46 = vand.u32 2147483648, %v2945_v56  ;;  %vm2966_vm1 = vweird.f32 %v2945_v56  ;;  %v2970_v8 = vand.u32 2147483647, %v2945_v56 }
 0xefc   :  { %v2973_v50 = vor.u32 1.1754944e-38, %v2972_v46  ;;  %vm2971_vm3 = vcmp.eq.f32.partialorder %v2970_v8, 8.507059e+37 }
 0xefe   :  { %2981 = vrot.lane.b32.xlu1 %v2979_v57, %s4442_s10 }
 0xeff   :  { %2983 = vrot.lane.b32.xlu2 %v2980_v27, %s4442_s10 }
 0xf27   :  { %v2787_v16 = vpop.f32.mrf.mxu2 }
 0xf28   :  { %v2791_v24 = vrot.slane %v2787_v16, 3  ;;  %v2792_v21 = vrot.slane %v2787_v16, 4 }
 0xf2a   :  { %v2795_v5 = vadd.f32 %v2791_v24, %v5304_v10  ;;  %v2796_v33 = vadd.f32 %v2792_v21, %v5301_v62 }
 0xf2c   :  { %4284 = vtanh.f32 %v2795_v5  ;;  %v4044_v32 = vmul.f32 -1.442695, %v2795_v5 }
 0xf2d   :  { %4286 = vtanh.f32 %v2796_v33 }
 0xf2e   :  { %4288 = vrcp.f32 %v2945_v56 }
 0xf2f   :  { %4290 = vpow2.f32 %v4047_v44 }
 0xf32   :  { %v4285_v38 = vpop.eup %4284 }
 0xf33   :  { %v4287_v2 = vpop.eup %4286  ;;  %2850 = vrot.lane.b32.xlu0 %v4285_v38, %s4441_s9 }
 0xf34   :  { %2852 = vrot.lane.b32.xlu1 %v4287_v2, %s4441_s9  ;;  %v4289_v48 = vpop.eup %4288 }
 0xf35   :  { %v2962_v52 = vmul.f32 %v4289_v48, %v2945_v56  ;;  %v4291_v15 = vpop.eup %4290  ;;  %vm2967_vm14 = vweird.f32 %v4289_v48  ;;  %v4045_v56 = vmul.f32 -1.442695, %v2796_v33 }
 0xf36   :  { %v2944_v3 = vadd.f32 1.0, %v4291_v15  ;;  %vm2968_vm2 = vmor %vm2966_vm1, %vm2967_vm14 }
 0xf37   :  { %v2963_v60 = vsub.f32 1.0, %v2962_v52 }
 0xf38   :  { %4292 = vrcp.f32 %v2944_v3  ;;  %v2957_v23 = vand.u32 2147483648, %v2944_v3  ;;  %vm2951_vm6 = vweird.f32 %v2944_v3  ;;  %v2955_v57 = vand.u32 2147483647, %v2944_v3 }
 0xf39   :  { %v2964_v41 = vmul.f32 %v4289_v48, %v2963_v60  ;;  %4294 = vpow2.f32 %v4044_v32 }
 0xf3a   :  { %v2958_v28 = vor.u32 1.1754944e-38, %v2957_v23  ;;  %vm2956_vm8 = vcmp.eq.f32.partialorder %v2955_v57, 8.507059e+37  ;;  %4296 = vpow2.f32 %v4045_v56 }
 0xf3b   :  { %v2965_v9 = vadd.f32 %v4289_v48, %v2964_v41 }
 0xf3c   :  { %2840 = vrot.lane.b32.xlu1 %v2838_v35, %s4442_s10 }
 0xf3d   :  { %v2969_v55 = vsel %vm2968_vm2, %v4289_v48, %v2965_v9 }
 0xf3e   :  { %v5790_v53 = vsel %vm2971_vm3, %v2973_v50, %v2969_v55  ;;  %v4293_v6 = vpop.eup %4292 }
 0xf3f   :  { %v2947_v13 = vmul.f32 %v4293_v6, %v2944_v3  ;;  %vm2952_vm5 = vweird.f32 %v4293_v6  ;;  %v4295_v38 = vpop.eup %4294 }
 0xf40   :  { %vm2953_vm7 = vmor %vm2951_vm6, %vm2952_vm5  ;;  %v4297_v43 = vpop.eup %4296  ;;  %v2803_v2 = vadd.f32 1.0, %v4295_v38 }
 0xf41   :  { %v2948_v18 = vsub.f32 1.0, %v2947_v13  ;;  %v2804_v45 = vadd.f32 1.0, %v4297_v43 }
 0xf42   :  { %4298 = vrcp.f32 %v2803_v2  ;;  %v2816_v33 = vand.u32 2147483648, %v2803_v2  ;;  %vm2810_vm11 = vweird.f32 %v2803_v2  ;;  %v2814_v55 = vand.u32 2147483647, %v2803_v2 }
 0xf43   :  { %v2949_v1 = vmul.f32 %v4293_v6, %v2948_v18  ;;  %4300 = vrcp.f32 %v2804_v45  ;;  %v2831_v8 = vand.u32 2147483648, %v2804_v45  ;;  %vm2825_vm12 = vweird.f32 %v2804_v45 }
 0xf44   :  { %v2829_v50 = vand.u32 2147483647, %v2804_v45  ;;  %vm2815_vm1 = vcmp.eq.f32.partialorder %v2814_v55, 8.507059e+37 }
 0xf45   :  { %v2950_v20 = vadd.f32 %v4293_v6, %v2949_v1  ;;  %v2832_v13 = vor.u32 1.1754944e-38, %v2831_v8 }
 0xf46   :  { %vm2830_vm2 = vcmp.eq.f32.partialorder %v2829_v50, 8.507059e+37 }
 0xf47   :  { %v2954_v27 = vsel %vm2953_vm7, %v4293_v6, %v2950_v20 }
 0xf48   :  { %v5794_v24 = vsel %vm2956_vm8, %v2958_v28, %v2954_v27  ;;  %v4299_v35 = vpop.eup %4298 }
 0xf49   :  { %v4301_v48 = vpop.eup %4300  ;;  %v2806_v44 = vmul.f32 %v4299_v35, %v2803_v2  ;;  %vm2811_vm9 = vweird.f32 %v4299_v35 }
 0xf4a   :  { %v2821_v52 = vmul.f32 %v4301_v48, %v2804_v45  ;;  %vm2826_vm10 = vweird.f32 %v4301_v48  ;;  %vm2812_vm13 = vmor %vm2810_vm11, %vm2811_vm9 }
 0xf4b   :  { %v2807_v60 = vsub.f32 1.0, %v2806_v44  ;;  %vm2827_vm14 = vmor %vm2825_vm12, %vm2826_vm10 }
 0xf4c   :  { %v2822_v15 = vsub.f32 1.0, %v2821_v52 }
 0xf4d   :  { %v2808_v41 = vmul.f32 %v4299_v35, %v2807_v60 }
 0xf4e   :  { %v2823_v3 = vmul.f32 %v4301_v48, %v2822_v15 }
 0xf4f   :  { %v2809_v46 = vadd.f32 %v4299_v35, %v2808_v41 }
 0xf50   :  { %v2824_v5 = vadd.f32 %v4301_v48, %v2823_v3 }
 0xf51   :  { %v2994_v26 = vpop.permute.xlu2 %2993 }
 0xf52   :  { %v2998_v51 = vmul.f32 %v2994_v26, %v5790_v53  ;;  %v2813_v26 = vsel %vm2812_vm13, %v4299_v35, %v2809_v46  ;;  %v2828_v6 = vsel %vm2827_vm14, %v4301_v48, %v2824_v5 }
 0xf53   :  { %v2833_v23 = vsel %vm2830_vm2, %v2832_v13, %v2828_v6 }
 0xf54   :  { %3003 = vrot.lane.b32.xlu0 %v2998_v51, %s4442_s10  ;;  %v2817_v51 = vor.u32 1.1754944e-38, %v2816_v33 }
 0xf56   :  { %v2818_v1 = vsel %vm2815_vm1, %v2817_v51, %v2813_v26 }
 0xf59   :  { %v2984_v28 = vpop.permute.xlu2 %2983 }
 0xf68   :  { %v2992_v16 = vpop.permute.xlu1 %2991 }
 0xf69   :  { %v2997_v21 = vmul.f32 %v2992_v16, %v5794_v24 }
 0xf6b   :  { %3001 = vrot.lane.b32.xlu2 %v2997_v21, %s4442_s10  ;;  %v2988_v21 = vmul.f32 %v2984_v28, %v5790_v53 }
 0xf70   :  { %v2982_v9 = vpop.permute.xlu1 %2981 }
 0xf71   :  { %v2987_v16 = vmul.f32 %v2982_v9, %v5794_v24 }
 0xf73   :  { %2842 = vrot.lane.b32.xlu2 %v2839_v29, %s4442_s10 }
 0xfa5   :  { %v2851_v18 = vpop.permute.xlu0 %2850 }
 0xfa6   :  { %v2853_v20 = vpop.permute.xlu1 %2852  ;;  %v2856_v57 = vmul.f32 %v2851_v18, %v2818_v1 }
 0xfa7   :  { %v2857_v27 = vmul.f32 %v2853_v20, %v2833_v23 }
 0xfa8   :  { %2860 = vrot.lane.b32.xlu0 %v2856_v57, %s4442_s10 }
 0xfa9   :  { %2862 = vrot.lane.b32.xlu1 %v2857_v27, %s4442_s10 }
 0xfae   :  { %v2841_v44 = vpop.permute.xlu1 %2840 }
 0xfaf   :  { %v2846_v60 = vmul.f32 %v2841_v44, %v2818_v1 }
 0xfc5   :  { %v3002_v29 = vpop.permute.xlu2 %3001 }
 0xfc6   :  { %v3004_v32 = vpop.permute.xlu0 %3003  ;;  %v3007_v56 = vadd.f32 %v3002_v29, %v2987_v16 }
 0xfc7   :  { %v3008_v38 = vadd.f32 %v3004_v32, %v2988_v21 }
 0xfc8   :  { %4302 = vtanh.f32 %v3007_v56  ;;  %v3034_v43 = vrot.slane %v3007_v56, 2 }
 0xfc9   :  { %4304 = vtanh.f32 %v3008_v38  ;;  %v3035_v2 = vrot.slane %v3008_v38, 1 }
 0xfcb   :  { %v3036_v45 = vsel %vm1006_vm4, %v3035_v2, %v3034_v43 }
 0xfcd   :  { %v2843_v52 = vpop.permute.xlu2 %2842 }
 0xfce   :  { %v4303_v35 = vpop.eup %4302  ;;  %v2847_v15 = vmul.f32 %v2843_v52, %v2833_v23 }
 0xfcf   :  { %v4305_v48 = vpop.eup %4304  ;;  %3013 = vrot.lane.b32.xlu2 %v4303_v35, %s4441_s9 }
 0xfd0   :  { %3015 = vrot.lane.b32.xlu0 %v4305_v48, %s4441_s9 }
0x101a   :  { %v2861_v41 = vpop.permute.xlu0 %2860 }
0x101b   :  { %v2863_v3 = vpop.permute.xlu1 %2862  ;;  %v2866_v9 = vadd.f32 %v2861_v41, %v2846_v60 }
0x101c   :  { %v2867_v46 = vadd.f32 %v2863_v3, %v2847_v15 }
0x101d   :  { %4306 = vtanh.f32 %v2866_v9  ;;  %v2893_v55 = vrot.slane %v2866_v9, 5  ;;  %v3041_v9 = vmul.f32 %v5773_v0, %v5551_v11 }
0x101e   :  { %4308 = vtanh.f32 %v2867_v46  ;;  %v2894_v8 = vrot.slane %v2867_v46, 4 }
0x1020   :  { %v2895_v50 = vsel %vm1006_vm4, %v2894_v8, %v2893_v55  ;;  %v2900_v55 = vmul.f32 %v5786_v59, %v5553_v63 }
0x1023   :  { %v4307_v5 = vpop.eup %4306 }
0x1024   :  { %v4309_v33 = vpop.eup %4308  ;;  %2872 = vrot.lane.b32.xlu1 %v4307_v5, %s4441_s9 }
0x1025   :  { %2874 = vrot.lane.b32.xlu2 %v4309_v33, %s4441_s9 }
0x1029   :  { %v3014_v26 = vpop.permute.xlu2 %3013 }
0x102a   :  { %v3019_v6 = vmul.f32 %v3014_v26, %v5794_v24 }
0x102c   :  { %v3023_v18 = vrot.slane %v3019_v6, 2 }
0x102d   :  { %3037 = vrot.lane.b32.xlu2 %v3036_v45, %s4444_s6 }
0x1035   :  { %2896 = vrot.lane.b32.xlu2 %v2895_v50, %s4444_s6 }
0x1042   :  { %v3016_v51 = vpop.permute.xlu0 %3015 }
0x1043   :  { %v3020_v13 = vmul.f32 %v3016_v51, %v5790_v53  ;;  %v3030_v53 = vmul.f32 %v5755_v54, %v5551_v11 }
0x1045   :  { %v3024_v20 = vrot.slane %v3020_v13, 1 }
0x1047   :  { %v3025_v57 = vsel %vm1006_vm4, %v3024_v20, %v3023_v18 }
0x1048   :  { %3026 = vrot.lane.b32.xlu0 %v3025_v57, %s4442_s10 }
0x107f   :  { %v2875_v27 = vpop.permute.xlu2 %2874 }
0x1080   :  { %v2879_v28 = vmul.f32 %v2875_v27, %v2833_v23 }
0x1082   :  { %v2883_v29 = vrot.slane %v2879_v28, 4 }
0x1087   :  { %v3038_v60 = vpop.permute.xlu2 %3037 }
0x1088   :  { %v3040_v41 = vmul.f32 %v3038_v60, %v5544_v49 }
0x108a   :  { %v5839_v46 = vadd.f32 %v3041_v9, %v3040_v41 }
0x108c   :  { %v3267_v5 = vrot.slane %v5839_v46, 7 }
0x108f   :  { %v2897_v33 = vpop.permute.xlu2 %2896 }
0x1090   :  { %v2899_v8 = vmul.f32 %v2897_v33, %v5547_v58 }
0x1092   :  { %v5848_v50 = vadd.f32 %v2900_v55, %v2899_v8 }
0x1094   :  { %v3127_v11 = vrot.slane %v5848_v50, 2 }
0x1096   :  { %v2873_v16 = vpop.permute.xlu1 %2872 }
0x1097   :  { %v2878_v21 = vmul.f32 %v2873_v16, %v2818_v1  ;;  %v2889_v1 = vmul.f32 %v5762_v61, %v5553_v63 }
0x1099   :  { %v2882_v32 = vrot.slane %v2878_v21, 5 }
0x109b   :  { %v2884_v56 = vsel %vm1006_vm4, %v2883_v29, %v2882_v32 }
0x109c   :  { %2885 = vrot.lane.b32.xlu1 %v2884_v56, %s4442_s10 }
0x10ba   :  { %v3027_v24 = vpop.permute.xlu0 %3026 }
0x10bb   :  { %v3029_v38 = vmul.f32 %v3027_v24, %v5544_v49 }
0x10bd   :  { %v5821_v43 = vadd.f32 %v3030_v53, %v3029_v38 }
0x10bf   :  { %4052 = vmatmul.msk.f32.vlgmr.msrb.gmra.mxu1 %vm1282_vm15, %v5821_v43 }
0x110e   :  { %v2886_v23 = vpop.permute.xlu1 %2885 }
0x110f   :  { %v2888_v2 = vmul.f32 %v2886_v23, %v5547_v58 }
0x1111   :  { %v5828_v45 = vadd.f32 %v2889_v1, %v2888_v2 }
0x1113   :  { %4049 = vmatmul.msk.f32.vlgmr.msra.gmra.mxu0 %vm1282_vm15, %v5828_v45 }
0x113c   :  { %v3217_v35 = vpop.f32.mrf.mxu1 }
0x113d   :  { %v3221_v48 = vrot.slane %v3217_v35, 7  ;;  %v3225_v44 = vadd.f32 %v3217_v35, %v5311_v22 }
0x113f   :  { %v3224_v52 = vadd.f32 %v3221_v48, %v5306_v14  ;;  %4310 = vtanh.f32 %v3225_v44  ;;  %v4054_v0 = vmul.f32 -1.442695, %v3225_v44 }
0x1141   :  { %4312 = vtanh.f32 %v3224_v52  ;;  %v4053_v26 = vmul.f32 -1.442695, %v3224_v52 }
0x1142   :  { %4314 = vpow2.f32 %v4054_v0  ;;  %v3128_v0 = vrot.slane %v5848_v50, 3 }
0x1143   :  { %4316 = vpow2.f32 %v4053_v26 }
0x1145   :  { %v4311_v15 = vpop.eup %4310 }
0x1146   :  { %3280 = vrot.lane.b32.xlu1 %v4311_v15, %s4441_s9 }
0x1147   :  { %v4313_v3 = vpop.eup %4312 }
0x1148   :  { %3278 = vrot.lane.b32.xlu0 %v4313_v3, %s4441_s9  ;;  %v4315_v59 = vpop.eup %4314 }
0x1149   :  { %v4317_v20 = vpop.eup %4316  ;;  %v3233_v57 = vadd.f32 1.0, %v4315_v59 }
0x114a   :  { %v3232_v28 = vadd.f32 1.0, %v4317_v20 }
0x114b   :  { %v3260_v2 = vand.u32 2147483648, %v3233_v57  ;;  %vm3254_vm5 = vweird.f32 %v3233_v57  ;;  %v3258_v35 = vand.u32 2147483647, %v3233_v57 }
0x114c   :  { %v3245_v52 = vand.u32 2147483648, %v3232_v28  ;;  %vm3239_vm8 = vweird.f32 %v3232_v28  ;;  %v3243_v15 = vand.u32 2147483647, %v3232_v28 }
0x114d   :  { %v3261_v60 = vor.u32 1.1754944e-38, %v3260_v2  ;;  %vm3259_vm9 = vcmp.eq.f32.partialorder %v3258_v35, 8.507059e+37 }
0x114e   :  { %v3246_v33 = vor.u32 1.1754944e-38, %v3245_v52  ;;  %vm3244_vm11 = vcmp.eq.f32.partialorder %v3243_v15, 8.507059e+37 }
0x1150   :  { %3268 = vrot.lane.b32.xlu0 %v3267_v5, %s4442_s10 }
0x1158   :  { %3270 = vrot.lane.b32.xlu0 %v5839_v46, %s4442_s10 }
0x1160   :  { %3129 = vrot.lane.b32.xlu0 %v3127_v11, %s4442_s10 }
0x1190   :  { %v3076_v6 = vpop.f32.mrf.mxu0 }
0x1191   :  { %v3080_v51 = vrot.slane %v3076_v6, 2  ;;  %v3081_v13 = vrot.slane %v3076_v6, 3 }
0x1193   :  { %v3084_v18 = vadd.f32 %v3080_v51, %v5304_v10  ;;  %v3085_v63 = vadd.f32 %v3081_v13, %v5301_v62 }
0x1195   :  { %4318 = vtanh.f32 %v3084_v18  ;;  %v4051_v26 = vmul.f32 -1.442695, %v3085_v63  ;;  %v4050_v59 = vmul.f32 -1.442695, %v3084_v18 }
0x1196   :  { %4320 = vtanh.f32 %v3085_v63 }
0x1197   :  { %4322 = vrcp.f32 %v3233_v57 }
0x1198   :  { %4324 = vrcp.f32 %v3232_v28 }
0x1199   :  { %4326 = vpow2.f32 %v4051_v26 }
0x119b   :  { %v4319_v27 = vpop.eup %4318 }
0x119c   :  { %v4321_v16 = vpop.eup %4320  ;;  %3139 = vrot.lane.b32.xlu1 %v4319_v27, %s4441_s9 }
0x119d   :  { %3141 = vrot.lane.b32.xlu2 %v4321_v16, %s4441_s9  ;;  %v4323_v21 = vpop.eup %4322 }
0x119e   :  { %v4325_v29 = vpop.eup %4324  ;;  %v3250_v32 = vmul.f32 %v4323_v21, %v3233_v57  ;;  %vm3255_vm3 = vweird.f32 %v4323_v21 }
0x119f   :  { %v3235_v56 = vmul.f32 %v4325_v29, %v3232_v28  ;;  %vm3256_vm6 = vmor %vm3254_vm5, %vm3255_vm3  ;;  %vm3240_vm7 = vweird.f32 %v4325_v29  ;;  %v4327_v6 = vpop.eup %4326 }
0x11a0   :  { %v3251_v24 = vsub.f32 1.0, %v3250_v32  ;;  %vm3241_vm10 = vmor %vm3239_vm8, %vm3240_vm7  ;;  %v3093_v51 = vadd.f32 1.0, %v4327_v6 }
0x11a1   :  { %v3236_v53 = vsub.f32 1.0, %v3235_v56 }
0x11a2   :  { %v3252_v38 = vmul.f32 %v4323_v21, %v3251_v24  ;;  %4328 = vrcp.f32 %v3093_v51  ;;  %vm3114_vm13 = vweird.f32 %v3093_v51  ;;  %v3118_v32 = vand.u32 2147483647, %v3093_v51 }
0x11a3   :  { %v3237_v23 = vmul.f32 %v4325_v29, %v3236_v53  ;;  %4330 = vpow2.f32 %v4050_v59 }
0x11a4   :  { %v3253_v1 = vadd.f32 %v4323_v21, %v3252_v38  ;;  %vm3119_vm1 = vcmp.eq.f32.partialorder %v3118_v32, 8.507059e+37 }
0x11a5   :  { %v3238_v48 = vadd.f32 %v4325_v29, %v3237_v23 }
0x11a6   :  { %v3257_v44 = vsel %vm3256_vm6, %v4323_v21, %v3253_v1 }
0x11a7   :  { %v5856_v41 = vsel %vm3259_vm9, %v3261_v60, %v3257_v44  ;;  %v3242_v9 = vsel %vm3241_vm10, %v4325_v29, %v3238_v48  ;;  %v3120_v29 = vand.u32 2147483648, %v3093_v51 }
0x11a8   :  { %v5859_v55 = vsel %vm3244_vm11, %v3246_v33, %v3242_v9  ;;  %v4329_v13 = vpop.eup %4328 }
0x11a9   :  { %v3110_v20 = vmul.f32 %v4329_v13, %v3093_v51  ;;  %v4331_v27 = vpop.eup %4330  ;;  %vm3115_vm12 = vweird.f32 %v4329_v13  ;;  %v3121_v56 = vor.u32 1.1754944e-38, %v3120_v29 }
0x11aa   :  { %v3092_v16 = vadd.f32 1.0, %v4331_v27  ;;  %vm3116_vm14 = vmor %vm3114_vm13, %vm3115_vm12 }
0x11ab   :  { %v3111_v57 = vsub.f32 1.0, %v3110_v20 }
0x11ac   :  { %4332 = vrcp.f32 %v3092_v16  ;;  %v3105_v44 = vand.u32 2147483648, %v3092_v16  ;;  %vm3099_vm3 = vweird.f32 %v3092_v16  ;;  %v3103_v52 = vand.u32 2147483647, %v3092_v16 }
0x11ad   :  { %v3112_v28 = vmul.f32 %v4329_v13, %v3111_v57 }
0x11ae   :  { %v3106_v15 = vor.u32 1.1754944e-38, %v3105_v44  ;;  %vm3104_vm6 = vcmp.eq.f32.partialorder %v3103_v52, 8.507059e+37 }
0x11af   :  { %v3113_v21 = vadd.f32 %v4329_v13, %v3112_v28 }
0x11b1   :  { %v3117_v63 = vsel %vm3116_vm14, %v4329_v13, %v3113_v21 }
0x11b2   :  { %v5866_v24 = vsel %vm3119_vm1, %v3121_v56, %v3117_v63  ;;  %v4333_v18 = vpop.eup %4332 }
0x11b3   :  { %v3095_v23 = vmul.f32 %v4333_v18, %v3092_v16  ;;  %vm3100_vm2 = vweird.f32 %v4333_v18 }
0x11b4   :  { %vm3101_vm5 = vmor %vm3099_vm3, %vm3100_vm2 }
0x11b5   :  { %v3096_v1 = vsub.f32 1.0, %v3095_v23 }
0x11b7   :  { %v3097_v2 = vmul.f32 %v4333_v18, %v3096_v1 }
0x11b8   :  { %v3281_v3 = vpop.permute.xlu1 %3280 }
0x11b9   :  { %v3285_v5 = vmul.f32 %v3281_v3, %v5856_v41  ;;  %v3098_v48 = vadd.f32 %v4333_v18, %v3097_v2 }
0x11ba   :  { %v3279_v8 = vpop.permute.xlu0 %3278 }
0x11bb   :  { %3290 = vrot.lane.b32.xlu2 %v3285_v5, %s4442_s10  ;;  %v3284_v11 = vmul.f32 %v3279_v8, %v5859_v55  ;;  %v3102_v60 = vsel %vm3101_vm5, %v4333_v18, %v3098_v48 }
0x11bc   :  { %v3107_v3 = vsel %vm3104_vm6, %v3106_v15, %v3102_v60 }
0x11bd   :  { %3288 = vrot.lane.b32.xlu1 %v3284_v11, %s4442_s10 }
0x11c2   :  { %v3269_v35 = vpop.permute.xlu0 %3268 }
0x11c3   :  { %v3274_v6 = vmul.f32 %v3269_v35, %v5859_v55 }
0x11c5   :  { %3131 = vrot.lane.b32.xlu1 %v3128_v0, %s4442_s10 }
0x11ca   :  { %v3271_v33 = vpop.permute.xlu0 %3270 }
0x11cb   :  { %v3275_v8 = vmul.f32 %v3271_v33, %v5856_v41 }
0x11d2   :  { %v3130_v27 = vpop.permute.xlu0 %3129 }
0x11d3   :  { %v3135_v16 = vmul.f32 %v3130_v27, %v3107_v3 }
0x11f7   :  { %v3142_v53 = vpop.permute.xlu2 %3141 }
0x11f8   :  { %v3146_v38 = vmul.f32 %v3142_v53, %v5866_v24 }
0x11fa   :  { %3151 = vrot.lane.b32.xlu0 %v3146_v38, %s4442_s10 }
0x120e   :  { %v3140_v9 = vpop.permute.xlu1 %3139 }
0x120f   :  { %v3145_v5 = vmul.f32 %v3140_v9, %v3107_v3 }
0x1211   :  { %3149 = vrot.lane.b32.xlu2 %v3145_v5, %s4442_s10 }
0x1215   :  { %v3291_v11 = vpop.permute.xlu2 %3290 }
0x1216   :  { %v3295_v0 = vadd.f32 %v3291_v11, %v3275_v8 }
0x1218   :  { %4334 = vtanh.f32 %v3295_v0 }
0x121e   :  { %v4335_v26 = vpop.eup %4334 }
0x121f   :  { %3302 = vrot.lane.b32.xlu2 %v4335_v26, %s4441_s9 }
0x122f   :  { %v3289_v51 = vpop.permute.xlu1 %3288 }
0x1230   :  { %v3294_v13 = vadd.f32 %v3289_v51, %v3274_v6 }
0x1232   :  { %4336 = vtanh.f32 %v3294_v13  ;;  %v3320_v59 = vrot.slane %v3294_v13, 1 }
0x1234   :  { %v3321_v20 = vsel %vm1006_vm4, %v3295_v0, %v3320_v59 }
0x1237   :  { %v3132_v28 = vpop.permute.xlu1 %3131 }
0x1238   :  { %v4337_v57 = vpop.eup %4336  ;;  %v3136_v21 = vmul.f32 %v3132_v28, %v5866_v24 }
0x1239   :  { %3300 = vrot.lane.b32.xlu1 %v4337_v57, %s4441_s9 }
0x126b   :  { %v3150_v29 = vpop.permute.xlu2 %3149 }
0x126c   :  { %v3152_v32 = vpop.permute.xlu0 %3151  ;;  %v3155_v63 = vadd.f32 %v3150_v29, %v3135_v16 }
0x126d   :  { %v3156_v56 = vadd.f32 %v3152_v32, %v3136_v21  ;;  %v3326_v32 = vmul.f32 %v5839_v46, %v5448_v7 }
0x126e   :  { %4338 = vtanh.f32 %v3155_v63  ;;  %v3182_v23 = vrot.slane %v3155_v63, 6 }
0x126f   :  { %4340 = vtanh.f32 %v3156_v56  ;;  %v3183_v38 = vrot.slane %v3156_v56, 5 }
0x1271   :  { %v3184_v1 = vsel %vm1006_vm4, %v3183_v38, %v3182_v23 }
0x1274   :  { %v4339_v53 = vpop.eup %4338 }
0x1275   :  { %v4341_v18 = vpop.eup %4340  ;;  %3161 = vrot.lane.b32.xlu0 %v4339_v53, %s4441_s9  ;;  %v3189_v53 = vmul.f32 %v5848_v50, %v5470_v36 }
0x1276   :  { %3163 = vrot.lane.b32.xlu1 %v4341_v18, %s4441_s9 }
0x1279   :  { %v3303_v2 = vpop.permute.xlu2 %3302 }
0x127a   :  { %v3307_v44 = vmul.f32 %v3303_v2, %v5856_v41  ;;  %v3316_v41 = vmul.f32 %v5821_v43, %v5448_v7 }
0x127e   :  { %3322 = vrot.lane.b32.xlu1 %v3321_v20, %s4444_s6 }
0x1286   :  { %3185 = vrot.lane.b32.xlu1 %v3184_v1, %s4444_s6 }
0x12ab   :  { %v3301_v35 = vpop.permute.xlu1 %3300 }
0x12ac   :  { %v3306_v48 = vmul.f32 %v3301_v35, %v5859_v55 }
0x12ae   :  { %v3310_v52 = vrot.slane %v3306_v48, 1 }
0x12b0   :  { %v3311_v60 = vsel %vm1006_vm4, %v3307_v44, %v3310_v52 }
0x12b1   :  { %3312 = vrot.lane.b32.xlu2 %v3311_v60, %s4442_s10 }
0x12e7   :  { %v3162_v15 = vpop.permute.xlu0 %3161 }
0x12e8   :  { %v3164_v9 = vpop.permute.xlu1 %3163  ;;  %v3167_v5 = vmul.f32 %v3162_v15, %v3107_v3 }
0x12e9   :  { %v3168_v33 = vmul.f32 %v3164_v9, %v5866_v24  ;;  %v3178_v24 = vmul.f32 %v5828_v45, %v5470_v36 }
0x12ea   :  { %v3171_v8 = vrot.slane %v3167_v5, 6 }
0x12eb   :  { %v3172_v11 = vrot.slane %v3168_v33, 5 }
0x12ed   :  { %v3173_v0 = vsel %vm1006_vm4, %v3172_v11, %v3171_v8 }
0x12ee   :  { %3174 = vrot.lane.b32.xlu0 %v3173_v0, %s4442_s10 }
0x12f0   :  { %v3323_v28 = vpop.permute.xlu1 %3322 }
0x12f1   :  { %v3325_v21 = vmul.f32 %v3323_v28, %v5437_v25 }
0x12f3   :  { %v3327_v63 = vadd.f32 %v3326_v32, %v3325_v21 }
0x12f5   :  { %v3541_v56 = vrot.slane %v3327_v63, 1 }
0x130b   :  { %v3313_v26 = vpop.permute.xlu2 %3312 }
0x130c   :  { %v3315_v55 = vmul.f32 %v3313_v26, %v5437_v25 }
0x130e   :  { %v5892_v6 = vadd.f32 %v3316_v41, %v3315_v55 }
0x1310   :  { %4058 = vmatmul.msk.f32.vlgmr.msra.gmra.mxu3 %vm1282_vm15, %v5892_v6 }
0x1360   :  { %v3175_v3 = vpop.permute.xlu0 %3174 }
0x1361   :  { %v3177_v51 = vmul.f32 %v3175_v3, %v5443_v40 }
0x1363   :  { %v5899_v13 = vadd.f32 %v3178_v24, %v3177_v51 }
0x1365   :  { %4055 = vmatmul.msk.f32.vlgmr.msrb.gmra.mxu2 %vm1282_vm15, %v5899_v13 }
0x1393   :  { %v3491_v59 = vpop.f32.mrf.mxu3 }
0x1394   :  { %v3495_v20 = vrot.slane %v3491_v59, 1  ;;  %v3498_v57 = vadd.f32 %v3491_v59, %v5306_v14  ;;  %v3186_v14 = vpop.permute.xlu1 %3185 }
0x1396   :  { %v3499_v27 = vadd.f32 %v3495_v20, %v5311_v22  ;;  %4342 = vtanh.f32 %v3498_v57  ;;  %v3188_v22 = vmul.f32 %v3186_v14, %v5443_v40  ;;  %v4059_v1 = vmul.f32 -1.442695, %v3498_v57 }
0x1398   :  { %4344 = vtanh.f32 %v3499_v27  ;;  %v3190_v18 = vadd.f32 %v3189_v53, %v3188_v22  ;;  %v4060_v23 = vmul.f32 -1.442695, %v3499_v27 }
0x139a   :  { %v3412_v38 = vrot.slane %v3190_v18, 1  ;;  %4346 = vpow2.f32 %v4060_v23  ;;  %v3413_v20 = vrot.slane %v3190_v18, 2 }
0x139c   :  { %v4343_v16 = vpop.eup %4342 }
0x139d   :  { %3552 = vrot.lane.b32.xlu0 %v4343_v16, %s4441_s9 }
0x139e   :  { %v4345_v29 = vpop.eup %4344 }
0x139f   :  { %3554 = vrot.lane.b32.xlu2 %v4345_v29, %s4441_s9 }
0x13a0   :  { %v4347_v7 = vpop.eup %4346 }
0x13a1   :  { %v3507_v46 = vadd.f32 1.0, %v4347_v7 }
0x13a3   :  { %4348 = vrcp.f32 %v3507_v46  ;;  %v3534_v0 = vand.u32 2147483648, %v3507_v46  ;;  %vm3528_vm7 = vweird.f32 %v3507_v46 }
0x13a4   :  { %4350 = vpow2.f32 %v4059_v1 }
0x13a5   :  { %v3535_v26 = vor.u32 1.1754944e-38, %v3534_v0 }
0x13a7   :  { %3544 = vrot.lane.b32.xlu2 %v3541_v56, %s4442_s10 }
0x13a9   :  { %v4349_v2 = vpop.eup %4348 }
0x13aa   :  { %v3524_v48 = vmul.f32 %v4349_v2, %v3507_v46  ;;  %v4351_v15 = vpop.eup %4350  ;;  %vm3529_vm15 = vweird.f32 %v4349_v2 }
0x13ab   :  { %v3506_v9 = vadd.f32 1.0, %v4351_v15  ;;  %vm3530_vm8 = vmor %vm3528_vm7, %vm3529_vm15 }
0x13ac   :  { %v3525_v60 = vsub.f32 1.0, %v3524_v48 }
0x13ad   :  { %v3519_v28 = vand.u32 2147483648, %v3506_v9  ;;  %vm3513_vm11 = vweird.f32 %v3506_v9  ;;  %v3517_v16 = vand.u32 2147483647, %v3506_v9 }
0x13ae   :  { %v3526_v5 = vmul.f32 %v4349_v2, %v3525_v60 }
0x13af   :  { %3542 = vrot.lane.b32.xlu2 %v3327_v63, %s4442_s10  ;;  %v3520_v29 = vor.u32 1.1754944e-38, %v3519_v28  ;;  %vm3518_vm13 = vcmp.eq.f32.partialorder %v3517_v16, 8.507059e+37 }
0x13b0   :  { %v3527_v11 = vadd.f32 %v4349_v2, %v3526_v5 }
0x13b7   :  { %3414 = vrot.lane.b32.xlu2 %v3412_v38, %s4442_s10 }
0x13e8   :  { %v3361_v35 = vpop.f32.mrf.mxu2 }
0x13e9   :  { %v3365_v44 = vrot.slane %v3361_v35, 1  ;;  %v3366_v52 = vrot.slane %v3361_v35, 2 }
0x13eb   :  { %v3369_v36 = vadd.f32 %v3365_v44, %v5304_v10  ;;  %v3370_v50 = vadd.f32 %v3366_v52, %v5301_v62  ;;  %v3532_v10 = vand.u32 2147483647, %v3507_v46  ;;  %v3531_v62 = vsel %vm3530_vm8, %v4349_v2, %v3527_v11 }
0x13ec   :  { %vm1564_vm8 = vcmask 516352  }
0x13ed   :  { %4352 = vtanh.f32 %v3369_v36  ;;  %vm3533_vm9 = vcmp.eq.f32.partialorder %v3532_v10, 8.507059e+37  ;;  %v4056_v14 = vmul.f32 -1.442695, %v3369_v36  ;;  %v4057_v22 = vmul.f32 -1.442695, %v3370_v50 }
0x13ee   :  { %4354 = vtanh.f32 %v3370_v50  ;;  %v5920_v3 = vsel %vm3533_vm9, %v3535_v26, %v3531_v62 }
0x13ef   :  { %4356 = vrcp.f32 %v3506_v9 }
0x13f0   :  { %4358 = vpow2.f32 %v4056_v14 }
0x13f1   :  { %4360 = vpow2.f32 %v4057_v22 }
0x13f3   :  { %v4353_v33 = vpop.eup %4352 }
0x13f4   :  { %v4355_v8 = vpop.eup %4354  ;;  %3424 = vrot.lane.b32.xlu0 %v4353_v33, %s4441_s9 }
0x13f5   :  { %3426 = vrot.lane.b32.xlu1 %v4355_v8, %s4441_s9  ;;  %v4357_v41 = vpop.eup %4356 }
0x13f6   :  { %v3509_v51 = vmul.f32 %v4357_v41, %v3506_v9  ;;  %vm3514_vm10 = vweird.f32 %v4357_v41  ;;  %v4359_v53 = vpop.eup %4358 }
0x13f7   :  { %vm3515_vm12 = vmor %vm3513_vm11, %vm3514_vm10  ;;  %v4361_v18 = vpop.eup %4360  ;;  %v3377_v38 = vadd.f32 1.0, %v4359_v53 }
0x13f8   :  { %v3510_v59 = vsub.f32 1.0, %v3509_v51  ;;  %v3378_v23 = vadd.f32 1.0, %v4361_v18 }
0x13f9   :  { %v3555_v55 = vpop.permute.xlu2 %3554  ;;  %4362 = vrcp.f32 %v3377_v38  ;;  %v3390_v36 = vand.u32 2147483648, %v3377_v38  ;;  %vm3384_vm2 = vweird.f32 %v3377_v38  ;;  %v3388_v15 = vand.u32 2147483647, %v3377_v38 }
0x13fa   :  { %v3559_v24 = vmul.f32 %v3555_v55, %v5920_v3  ;;  %v3511_v57 = vmul.f32 %v4357_v41, %v3510_v59  ;;  %4364 = vrcp.f32 %v3378_v23  ;;  %v3405_v9 = vand.u32 2147483648, %v3378_v23 }
0x13fb   :  { %vm3399_vm5 = vweird.f32 %v3378_v23  ;;  %v3403_v5 = vand.u32 2147483647, %v3378_v23  ;;  %v3391_v8 = vor.u32 1.1754944e-38, %v3390_v36  ;;  %vm3389_vm15 = vcmp.eq.f32.partialorder %v3388_v15, 8.507059e+37 }
0x13fc   :  { %3564 = vrot.lane.b32.xlu0 %v3559_v24, %s4442_s10  ;;  %v3512_v27 = vadd.f32 %v4357_v41, %v3511_v57  ;;  %v3406_v0 = vor.u32 1.1754944e-38, %v3405_v9  ;;  %v2754_v36 = vmul.f32 %v5755_v54, %v5687_v47  ;;  %v2160_v47 = vmul.f32 %v5600_v19, %v5547_v58 }
0x13fd   :  { %vm3404_vm7 = vcmp.eq.f32.partialorder %v3403_v5, 8.507059e+37 }
0x13fe   :  { %v3516_v21 = vsel %vm3515_vm12, %v4357_v41, %v3512_v27  ;;  %v2756_v15 = vrot.slane %v2754_v36, 1  ;;  %v2757_v54 = vperm.slane %v2754_v36, 0 }
0x13ff   :  { %v5925_v32 = vsel %vm3518_vm13, %v3520_v29, %v3516_v21  ;;  %v4363_v7 = vpop.eup %4362 }
0x1400   :  { %v4365_v46 = vpop.eup %4364  ;;  %v3380_v1 = vmul.f32 %v4363_v7, %v3377_v38  ;;  %vm3385_vm14 = vweird.f32 %v4363_v7 }
0x1401   :  { %v3395_v2 = vmul.f32 %v4365_v46, %v3378_v23  ;;  %vm3400_vm1 = vweird.f32 %v4365_v46  ;;  %vm3386_vm3 = vmor %vm3384_vm2, %vm3385_vm14  ;;  %v3545_v51 = vpop.permute.xlu2 %3544  ;;  %v1553_v23 = vmul.f32 %v5378_v42, %v5368_v37  ;;  %vm3756_vm2 = vcmask 80896  }
0x1402   :  { %v3381_v35 = vsub.f32 1.0, %v3380_v1  ;;  %vm3401_vm6 = vmor %vm3399_vm5, %vm3400_vm1  ;;  %v3549_v59 = vmul.f32 %v3545_v51, %v5920_v3 }
0x1403   :  { %v3396_v48 = vsub.f32 1.0, %v3395_v2 }
0x1404   :  { %3416 = vrot.lane.b32.xlu0 %v3413_v20, %s4442_s10  ;;  %v3382_v44 = vmul.f32 %v4363_v7, %v3381_v35 }
0x1405   :  { %v3397_v52 = vmul.f32 %v4365_v46, %v3396_v48 }
0x1406   :  { %v3383_v60 = vadd.f32 %v4363_v7, %v3382_v44  ;;  %v5955_v44 = vmul.f32 %v5892_v6, %v5437_v25  ;;  %v2758_v25 = vperm.slane %v2756_v15, 0 }
0x1407   :  { %v3398_v50 = vadd.f32 %v4365_v46, %v3397_v52  ;;  %v1855_v52 = vmul.f32 %v5477_v12, %v5443_v40 }
0x1408   :  { %v3387_v33 = vsel %vm3386_vm3, %v4363_v7, %v3383_v60  ;;  %v1556_v7 = vperm.slane %v1553_v23, 0 }
0x1409   :  { %v3402_v11 = vsel %vm3401_vm6, %v4365_v46, %v3398_v50  ;;  %v5929_v10 = vsel %vm3389_vm15, %v3391_v8, %v3387_v33  ;;  %v3543_v28 = vpop.permute.xlu2 %3542  ;;  %v5948_v46 = vmul.f32 %v5672_v31, %v5667_v4  ;;  %v3331_v31 = vperm.slane %v5955_v44, 0 }
0x140a   :  { %v5931_v41 = vsel %vm3404_vm7, %v3406_v0, %v3402_v11  ;;  %v3548_v16 = vmul.f32 %v3543_v28, %v5925_v32  ;;  %v1857_v60 = vrot.slane %v1855_v52, 1  ;;  %v1858_v0 = vperm.slane %v1855_v52, 0 }
0x140b   :  { %v2468_v48 = vperm.slane %v5948_v46, 0  ;;  %v3463_v52 = vmul.f32 %v5899_v13, %v5371_v39  ;;  %v3611_v39 = vld [vmem:[%s6143_s12 + $0x20] sm:$0xff]  ;;  %vm3819_vm7 = vcmask 7168  }
0x140c   :  { %v1859_v50 = vperm.slane %v1857_v60, 0 }
0x140f   :  { %v3553_v63 = vpop.permute.xlu0 %3552 }
0x1410   :  { %v3558_v56 = vmul.f32 %v3553_v63, %v5925_v32 }
0x1412   :  { %3562 = vrot.lane.b32.xlu1 %v3558_v56, %s4442_s10  ;;  %v3415_v56 = vpop.permute.xlu2 %3414 }
0x1413   :  { %v3420_v1 = vmul.f32 %v3415_v56, %v5929_v10 }
0x1466   :  { %v3425_v62 = vpop.permute.xlu0 %3424 }
0x1467   :  { %v3427_v26 = vpop.permute.xlu1 %3426  ;;  %v3430_v55 = vmul.f32 %v3425_v62, %v5929_v10  ;;  %v2162_v62 = vrot.slane %v2160_v47, 1 }
0x1468   :  { %v3431_v24 = vmul.f32 %v3427_v26, %v5931_v41 }
0x1469   :  { %3434 = vrot.lane.b32.xlu1 %v3430_v55, %s4442_s10  ;;  %v2164_v26 = vperm.slane %v2162_v62, 0 }
0x146a   :  { %3436 = vrot.lane.b32.xlu2 %v3431_v24, %s4442_s10 }
0x146e   :  { %v3565_v20 = vpop.permute.xlu0 %3564 }
0x146f   :  { %v3569_v57 = vadd.f32 %v3565_v20, %v3549_v59 }
0x1471   :  { %4366 = vtanh.f32 %v3569_v57  ;;  %v2163_v57 = vperm.slane %v2160_v47, 0 }
0x1476   :  { %v3417_v14 = vpop.permute.xlu0 %3416 }
0x1477   :  { %v4367_v27 = vpop.eup %4366  ;;  %v3421_v22 = vmul.f32 %v3417_v14, %v5931_v41  ;;  %v3330_v14 = vrot.slane %v5955_v44, 1 }
0x1478   :  { %3576 = vrot.lane.b32.xlu0 %v4367_v27, %s4441_s9  ;;  %v5983_v27 = vmul.f32 %v5762_v61, %v5667_v4  ;;  %v3191_v4 = vmul.f32 %v5899_v13, %v5443_v40 }
0x1479   :  { %v3332_v40 = vperm.slane %v3330_v14, 0 }
0x1484   :  { %v3563_v21 = vpop.permute.xlu1 %3562 }
0x1485   :  { %v3568_v29 = vadd.f32 %v3563_v21, %v3548_v16  ;;  %v1555_v21 = vrot.slane %v1553_v23, 1 }
0x1487   :  { %4368 = vtanh.f32 %v3568_v29  ;;  %v1557_v61 = vperm.slane %v1555_v21, 0  ;;  %v2467_v29 = vrot.slane %v5948_v46, 1 }
0x148d   :  { %v4369_v63 = vpop.eup %4368 }
0x148e   :  { %3574 = vrot.lane.b32.xlu1 %v4369_v63, %s4441_s9  ;;  %v2469_v63 = vperm.slane %v2467_v29, 0 }
0x14c4   :  { %v3437_v53 = vpop.permute.xlu2 %3436 }
0x14c5   :  { %v3441_v18 = vadd.f32 %v3437_v53, %v3421_v22  ;;  %v3590_v53 = vmul.f32 %v5892_v6, %v5357_v17 }
0x14c7   :  { %4370 = vtanh.f32 %v3441_v18 }
0x14cd   :  { %v4371_v38 = vpop.eup %4370 }
0x14ce   :  { %3448 = vrot.lane.b32.xlu0 %v4371_v38, %s4441_s9 }
0x14d6   :  { %1558 = vrot.lane.b32.xlu0 %v1556_v7, %s4442_s10 }
0x14db   :  { %v3435_v2 = vpop.permute.xlu1 %3434 }
0x14dc   :  { %v3440_v35 = vadd.f32 %v3435_v2, %v3420_v1 }
0x14de   :  { %4372 = vtanh.f32 %v3440_v35  ;;  %2470 = vrot.lane.b32.xlu0 %v2468_v48, %s4442_s10 }
0x14e4   :  { %v4373_v42 = vpop.eup %4372 }
0x14e5   :  { %3446 = vrot.lane.b32.xlu2 %v4373_v42, %s4441_s9 }
0x14e6   :  { %3333 = vrot.lane.b32.xlu0 %v3331_v31, %s4442_s10 }
0x14ea   :  { %v3577_v9 = vpop.permute.xlu0 %3576 }
0x14eb   :  { %v3581_v12 = vmul.f32 %v3577_v9, %v5920_v3  ;;  %v2615_v9 = vrot.slane %v5983_v27, 1 }
0x14ed   :  { %v3584_v33 = vrot.slane %v3581_v12, 7 }
0x14ee   :  { %1862 = vrot.lane.b32.xlu0 %v1859_v50, %s4442_s10 }
0x14f6   :  { %2761 = vrot.lane.b32.xlu0 %v2758_v25, %s4442_s10 }
0x1500   :  { %v3575_v5 = vpop.permute.xlu1 %3574 }
0x1501   :  { %v3580_v8 = vmul.f32 %v3575_v5, %v5925_v32 }
0x1503   :  { %v3585_v11 = vsel %vm1006_vm4, %v3584_v33, %v3580_v8  ;;  %v3610_v33 = vld [vmem:[%s6143_s12 + $0x18] sm:$0xff]  ;;  %v3609_v8 = vld [vmem:[%s6143_s12 + $0x10] sm:$0xff] }
0x1504   :  { %3586 = vrot.lane.b32.xlu1 %v3585_v11, %s4442_s10  ;;  %v3608_v11 = vld [vmem:[%s6143_s12 + $0x8] sm:$0xff] }
0x150c   :  { %1860 = vrot.lane.b32.xlu1 %v1858_v0, %s4442_s10  ;;  %v3607_v0 = vld [vmem:[%s6143_s12] sm:$0xff] }
0x1514   :  { %2759 = vrot.lane.b32.xlu1 %v2757_v54, %s4442_s10 }
0x151c   :  { %2167 = vrot.lane.b32.xlu1 %v2164_v26, %s4442_s10 }
0x153f   :  { %v3447_v3 = vpop.permute.xlu2 %3446 }
0x1540   :  { %v3452_v32 = vmul.f32 %v3447_v3, %v5929_v10  ;;  %v3449_v55 = vpop.permute.xlu0 %3448  ;;  %v3043_v10 = vmul.f32 %v5821_v43, %v5544_v49  ;;  %v3193_v49 = vrot.slane %v3191_v4, 1 }
0x1541   :  { %v3453_v24 = vmul.f32 %v3449_v55, %v5931_v41 }
0x1542   :  { %v3456_v51 = vrot.slane %v3452_v32, 7  ;;  %v3046_v28 = vperm.slane %v3043_v10, 0  ;;  %v3045_v35 = vrot.slane %v3043_v10, 1  ;;  %v4116_v32 = vld [vmem:[%s6144_s13] ss:$0 sm:$0xff] }
0x1543   :  { %v3457_v59 = vrot.slane %v3453_v24, 6 }
0x1544   :  { %v3047_v48 = vperm.slane %v3045_v35, 0  ;;  %v3716_v35 = vld [vmem:[%s6145_s14 + $0x28] sm:$0xff] }
0x1545   :  { %v3458_v20 = vsel %vm1006_vm4, %v3457_v59, %v3456_v51  ;;  %vm3619_vm4 = vcmask 523264  }
0x1546   :  { %3459 = vrot.lane.b32.xlu2 %v3458_v20, %s4442_s10 }
0x1548   :  { %v1559_v19 = vpop.permute.xlu0 %1558 }
0x1549   :  { %1565 = vst.msk [vmem:[#allocation2 + $0x7] sm:$0x1] %vm1564_vm8, %v1559_v19 }
0x154e   :  { %2165 = vrot.lane.b32.xlu2 %v2163_v57, %s4442_s10 }
0x1550   :  { %v2471_v41 = vpop.permute.xlu0 %2470 }
0x1551   :  { %2476 = vst.msk [vmem:[#allocation2 + $0x4] sm:$0x1] %vm1564_vm8, %v2471_v41 }
0x1552   :  { %2617 = vst.msk [vmem:[#allocation2 + $0x4] sm:$0x1] %vm1420_vm0, %v5983_v27 }
0x1556   :  { %3048 = vrot.lane.b32.xlu2 %v3046_v28, %s4442_s10 }
0x1558   :  { %v3334_v16 = vpop.permute.xlu0 %3333 }
0x1559   :  { %3339 = vst.msk [vmem:[#allocation2 + $0x1] sm:$0x1] %vm1564_vm8, %v3334_v16 }
0x155e   :  { %1560 = vrot.lane.b32.xlu2 %v1557_v61, %s4442_s10 }
0x1560   :  { %v1863_v43 = vpop.permute.xlu0 %1862 }
0x1561   :  { %1867 = vst.msk [vmem:[#allocation2 + $0xe] sm:$0x1] %vm1564_vm8, %v1863_v43 }
0x1562   :  { %3196 = vst.msk [vmem:[#allocation2 + $0xe] sm:$0x1] %vm1420_vm0, %v3193_v49 }
0x1566   :  { %2472 = vrot.lane.b32.xlu2 %v2469_v63, %s4442_s10 }
0x1568   :  { %v2762_v56 = vpop.permute.xlu0 %2761 }
0x1569   :  { %2766 = vst.msk [vmem:[#allocation2 + $0xb] sm:$0x1] %vm1564_vm8, %v2762_v56 }
0x156e   :  { %3335 = vrot.lane.b32.xlu2 %v3332_v40, %s4442_s10 }
0x1576   :  { %v3587_v22 = vpop.permute.xlu1 %3586 }
0x1577   :  { %v3589_v18 = vmul.f32 %v3587_v22, %v5355_v30 }
0x1579   :  { %v3591_v38 = vadd.f32 %v3590_v53, %v3589_v18 }
0x157b   :  { %v3592_v23 = vmul.f32 %v3591_v38, %v5355_v30  ;;  %v2902_v30 = vmul.f32 %v5828_v45, %v5547_v58  ;;  %v3614_v58 = vld [vmem:[%s6143_s12 + $0x38] sm:$0xff]  ;;  %v3613_v45 = vld [vmem:[%s6143_s12 + $0x30] sm:$0xff] }
0x157c   :  { %3634 = vmatpush.msrb.mxu0 %v3614_v58 }
0x157d   :  { %v3594_v7 = vrot.slane %v3592_v23, 1  ;;  %v3595_v46 = vperm.slane %v3592_v23, 0  ;;  %v2904_v6 = vrot.slane %v2902_v30, 1 }
0x157e   :  { %v1861_v1 = vpop.permute.xlu1 %1860  ;;  %3635 = vmatpush.msrb.mxu0 %v3613_v45 }
0x157f   :  { %v3596_v2 = vperm.slane %v3594_v7, 0  ;;  %1866 = vst.msk [vmem:[#allocation2 + $0x6] sm:$0x1] %vm1564_vm8, %v1861_v1  ;;  %3597 = vrot.lane.b32.xlu1 %v3595_v46, %s4442_s10  ;;  %v3718_v46 = vld [vmem:[%s6145_s14 + $0x38] sm:$0xff]  ;;  %v3717_v1 = vld [vmem:[%s6145_s14 + $0x30] sm:$0xff] }
0x1580   :  { %3195 = vst.msk [vmem:[#allocation2 + $0x6] sm:$0x1] %vm1420_vm0, %v3191_v4  ;;  %3741 = vmatpush.msra.mxu1 %v3718_v46 }
0x1581   :  { %3599 = vrot.lane.b32.xlu0 %v3596_v2, %s4442_s10 }
0x1582   :  { %3742 = vmatpush.msra.mxu1 %v3717_v1 }
0x1584   :  { %3743 = vmatpush.msra.mxu1 %v3716_v35 }
0x1586   :  { %v2760_v17 = vpop.permute.xlu1 %2759 }
0x1587   :  { %2765 = vst.msk [vmem:[#allocation2 + $0x3] sm:$0x1] %vm1564_vm8, %v2760_v17  ;;  %3050 = vrot.lane.b32.xlu1 %v3047_v48, %s4442_s10  ;;  %v3715_v17 = vld [vmem:[%s6145_s14 + $0x20] sm:$0xff] }
0x1588   :  { %3744 = vmatpush.msra.mxu1 %v3715_v17 }
0x158e   :  { %v2168_v44 = vpop.permute.xlu1 %2167 }
0x158f   :  { %2172 = vst.msk [vmem:[#allocation2 + $0xd] sm:$0x1] %vm1564_vm8, %v2168_v44  ;;  %v3713_v44 = vld [vmem:[%s6145_s14 + $0x10] sm:$0xff] }
0x1590   :  { %2907 = vst.msk [vmem:[#allocation2 + $0xd] sm:$0x1] %vm1420_vm0, %v2904_v6 }
0x15a0   :  { %v3460_v42 = vpop.permute.xlu2 %3459 }
0x15a1   :  { %v3462_v31 = vmul.f32 %v3460_v42, %v5368_v37  ;;  %v3712_v42 = vld [vmem:[%s6145_s14 + $0x8] sm:$0xff] }
0x15a3   :  { %v3464_v60 = vadd.f32 %v3463_v52, %v3462_v31  ;;  %v3711_v31 = vld [vmem:[%s6145_s14] sm:$0xff] }
0x15a5   :  { %v3465_v36 = vmul.f32 %v3464_v60, %v5368_v37  ;;  %v3612_v37 = vld [vmem:[%s6143_s12 + $0x28] sm:$0xff] }
0x15a6   :  { %3636 = vmatpush.msrb.mxu0 %v3612_v37 }
0x15a7   :  { %3469 = vst.msk [vmem:[#allocation2 + $0x7] sm:$0x1] %vm1420_vm0, %v3465_v36  ;;  %v3467_v15 = vrot.slane %v3465_v36, 1 }
0x15a8   :  { %v2166_v50 = vpop.permute.xlu2 %2165  ;;  %3637 = vmatpush.msrb.mxu0 %v3611_v39 }
0x15a9   :  { %2171 = vst.msk [vmem:[#allocation2 + $0x5] sm:$0x1] %vm1564_vm8, %v2166_v50 }
0x15aa   :  { %2906 = vst.msk [vmem:[#allocation2 + $0x5] sm:$0x1] %vm1420_vm0, %v2902_v30  ;;  %3638 = vmatpush.msrb.mxu0 %v3610_v33  ;;  %v3714_v30 = vld [vmem:[%s6145_s14 + $0x18] sm:$0xff]  ;;  %v3760_v33 = vld [vmem:[%s6135_s4 + $0x8] sm:$0xff] }
0x15ab   :  { %3745 = vmatpush.msra.mxu1 %v3714_v30  ;;  %vm3808_vm6 = vcmp.ne.s32.totalorder %v3760_v33, 0 }
0x15ac   :  { %3639 = vmatpush.msrb.mxu0 %v3609_v8 }
0x15ad   :  { %3746 = vmatpush.msra.mxu1 %v3713_v44 }
0x15ae   :  { %3640 = vmatpush.msrb.mxu0 %v3608_v11 }
0x15af   :  { %3747 = vmatpush.msra.mxu1 %v3712_v42 }
0x15b0   :  { %v3049_v13 = vpop.permute.xlu2 %3048  ;;  %3641 = vmatpush.msrb.mxu0 %v3607_v0  ;;  %v3785_v0 = vlaneseq }
0x15b1   :  { %3054 = vst.msk [vmem:[#allocation2 + $0x2] sm:$0x1] %vm1564_vm8, %v3049_v13  ;;  %3748 = vmatpush.msra.mxu1 %v3711_v31 }
0x15b8   :  { %v1561_v25 = vpop.permute.xlu2 %1560 }
0x15b9   :  { %1566 = vst.msk [vmem:[#allocation2 + $0xf] sm:$0x1] %vm1564_vm8, %v1561_v25 }
0x15ba   :  { %3470 = vst.msk [vmem:[#allocation2 + $0xf] sm:$0x1] %vm1420_vm0, %v3467_v15 }
0x15c0   :  { %v2473_v12 = vpop.permute.xlu2 %2472 }
0x15c1   :  { %2477 = vst.msk [vmem:[#allocation2 + $0xc] sm:$0x1] %vm1564_vm8, %v2473_v12 }
0x15c2   :  { %2618 = vst.msk [vmem:[#allocation2 + $0xc] sm:$0x1] %vm1420_vm0, %v2615_v9 }
0x15c8   :  { %v3336_v5 = vpop.permute.xlu2 %3335 }
0x15c9   :  { %3340 = vst.msk [vmem:[#allocation2 + $0x9] sm:$0x1] %vm1564_vm8, %v3336_v5  ;;  %v3759_v5 = vld [vmem:[%s6135_s4] sm:$0xff] }
0x15ca   :  { %vm3807_vm15 = vcmp.ne.s32.totalorder %v3759_v5, 0 }
0x15f1   :  { %v3598_v47 = vpop.permute.xlu1 %3597 }
0x15f2   :  { %3603 = vst.msk [vmem:[#allocation2] sm:$0x1] %vm1564_vm8, %v3598_v47  ;;  %v3786_v47 = vand.u32 127, %v3785_v0 }
0x15f3   :  { %v3600_v54 = vpop.permute.xlu0 %3599 }
0x15f4   :  { %3604 = vst.msk [vmem:[#allocation2 + $0x8] sm:$0x1] %vm1564_vm8, %v3600_v54  ;;  %v4117_v54 = vld [vmem:[%s6146_s15] ss:$0 sm:$0xff] }
0x15f9   :  { %v3051_v62 = vpop.permute.xlu1 %3050  ;;  %v3605_v26 = vld [vmem:[#allocation2] sm:$0xff] }
0x15fa   :  { %3055 = vst.msk [vmem:[#allocation2 + $0xa] sm:$0x1] %vm1564_vm8, %v3051_v62  ;;  %3689 = vrot.lane.b32.xlu1 %v3605_v26, %s4441_s9  ;;  %4061 = vmatmul.msk.f32.vlgmr.msrb.gmra.mxu0 %vm3619_vm4, %v3605_v26 }
0x1601   :  { %v3606_v3 = vld [vmem:[#allocation2 + $0x8] sm:$0xff] }
0x1602   :  { %3691 = vrot.lane.b32.xlu0 %v3606_v3, %s4441_s9  ;;  %4062 = vmatmul.msk.f32.gmra.mxu0 %vm3619_vm4, %v3606_v3 }
0x166c   :  { %v3690_v53 = vpop.permute.xlu1 %3689 }
0x1674   :  { %v3692_v13 = vpop.permute.xlu0 %3691 }
0x1677   :  { %v3643_v55 = vpop.f32.mrf.mxu0 }
0x1678   :  { %v3644_v24 = vadd.f32 %v4116_v32, %v3643_v55 }
0x167a   :  { %v3649_v51 = vmax.f32 %v3644_v24, 0.0  ;;  %v4063_v57 = vmul.f32 -1.442695, %v3644_v24 }
0x167c   :  { %3701 = vrot.lane.b32.xlu2 %v3649_v51, %s4441_s9  ;;  %4374 = vpow2.f32 %v4063_v57 }
0x167f   :  { %v3646_v59 = vpop.f32.mrf.mxu0 }
0x1680   :  { %v3647_v20 = vadd.f32 %v4116_v32, %v3646_v59 }
0x1682   :  { %v3650_v19 = vmax.f32 %v3647_v20, 0.0  ;;  %v4375_v27 = vpop.eup %4374  ;;  %v4064_v21 = vmul.f32 -1.442695, %v3647_v20 }
0x1683   :  { %v3657_v10 = vadd.f32 1.0, %v4375_v27 }
0x1684   :  { %3703 = vrot.lane.b32.xlu1 %v3650_v19, %s4441_s9 }
0x1685   :  { %4376 = vrcp.f32 %v3657_v10  ;;  %v3670_v49 = vand.u32 2147483648, %v3657_v10  ;;  %vm3664_vm9 = vweird.f32 %v3657_v10  ;;  %v3668_v43 = vand.u32 2147483647, %v3657_v10 }
0x1686   :  { %4378 = vpow2.f32 %v4064_v21 }
0x1687   :  { %v3671_v56 = vor.u32 1.1754944e-38, %v3670_v49  ;;  %vm3669_vm11 = vcmp.eq.f32.partialorder %v3668_v43, 8.507059e+37 }
0x168b   :  { %v4377_v41 = vpop.eup %4376 }
0x168c   :  { %v3660_v28 = vmul.f32 %v4377_v41, %v3657_v10  ;;  %vm3665_vm0 = vweird.f32 %v4377_v41  ;;  %v4379_v29 = vpop.eup %4378 }
0x168d   :  { %vm3666_vm10 = vmor %vm3664_vm9, %vm3665_vm0  ;;  %v3658_v14 = vadd.f32 1.0, %v4379_v29 }
0x168e   :  { %v3661_v16 = vsub.f32 1.0, %v3660_v28 }
0x168f   :  { %4380 = vrcp.f32 %v3658_v14  ;;  %v3685_v36 = vand.u32 2147483648, %v3658_v14  ;;  %vm3679_vm13 = vweird.f32 %v3658_v14  ;;  %v3683_v50 = vand.u32 2147483647, %v3658_v14 }
0x1690   :  { %v3662_v4 = vmul.f32 %v4377_v41, %v3661_v16 }
0x1691   :  { %v3686_v45 = vor.u32 1.1754944e-38, %v3685_v36  ;;  %vm3684_vm1 = vcmp.eq.f32.partialorder %v3683_v50, 8.507059e+37 }
0x1692   :  { %v3663_v61 = vadd.f32 %v4377_v41, %v3662_v4 }
0x1694   :  { %v3667_v63 = vsel %vm3666_vm10, %v4377_v41, %v3663_v61 }
0x1695   :  { %v3672_v40 = vsel %vm3669_vm11, %v3671_v56, %v3667_v63  ;;  %v4381_v2 = vpop.eup %4380 }
0x1696   :  { %v3697_v22 = vsub.f32 1.0, %v3672_v40  ;;  %v3695_v38 = vmul.f32 %v3690_v53, %v3672_v40  ;;  %v3675_v48 = vmul.f32 %v4381_v2, %v3658_v14  ;;  %vm3680_vm12 = vweird.f32 %v4381_v2 }
0x1697   :  { %vm3681_vm14 = vmor %vm3679_vm13, %vm3680_vm12  ;;  %v4070_v14 = vsel %vm3808_vm6, 1.0, %v4440_v34  ;;  %v4069_v40 = vsel %vm3807_vm15, 1.0, %v4440_v34 }
0x1698   :  { %v3676_v6 = vsub.f32 1.0, %v3675_v48 }
0x169a   :  { %v3677_v52 = vmul.f32 %v4381_v2, %v3676_v6 }
0x169c   :  { %v3678_v60 = vadd.f32 %v4381_v2, %v3677_v52 }
0x169e   :  { %v3682_v58 = vsel %vm3681_vm14, %v4381_v2, %v3678_v60 }
0x169f   :  { %v3687_v37 = vsel %vm3684_vm1, %v3686_v45, %v3682_v58 }
0x16a0   :  { %v3698_v39 = vsub.f32 1.0, %v3687_v37  ;;  %v3696_v25 = vmul.f32 %v3692_v13, %v3687_v37 }
0x16d6   :  { %v3702_v18 = vpop.permute.xlu2 %3701 }
0x16d7   :  { %v3707_v23 = vmul.f32 %v3702_v18, %v3697_v22  ;;  %v4397_v22 = vld [vmem:[%s6134_s3 + $0x8] sm:$0xff]  ;;  %v4398_v18 = vld [vmem:[%s6134_s3] sm:$0xff]  ;;  %s4451_s3 = smov [#allocation6]  }
0x16d8   :  { %v3814_v53 = vmul.f32 %v4397_v22, %v4070_v14  ;;  %s3876_s12 = sshll.u32 %s4451_s3, 4  ;;  %s3877_s12 = int_to_ptr.vmem [resolvable:$true] %s3876_s12 }
0x16d9   :  { %v3709_v7 = vadd.f32 %v3707_v23, %v3695_v38  ;;  %v3813_v38 = vmul.f32 %v4398_v18, %v4069_v40 }
0x16da   :  { %v3833_v23 = vsel %vm3819_vm7, %v3814_v53, 0.0 }
0x16db   :  { %3725 = vrot.lane.b32.xlu2 %v3709_v7, %s4441_s9  ;;  %v3832_v7 = vsel %vm3819_vm7, %v3813_v38, 0.0 }
0x16dc   :  { %v3834_v46 = vadd.f32 %v3833_v23, %v3832_v7 }
0x16f6   :  { %v3704_v15 = vpop.permute.xlu1 %3703 }
0x16f7   :  { %v3708_v9 = vmul.f32 %v3704_v15, %v3698_v39 }
0x16f9   :  { %v3710_v12 = vadd.f32 %v3708_v9, %v3696_v25 }
0x16fb   :  { %3727 = vrot.lane.b32.xlu0 %v3710_v12, %s4441_s9 }
0x1703   :  { %3788 = vperm.xlu0 %4114, %v3759_v5  }
0x170b   :  { %3791 = vperm.xlu0 %4114, %v3760_v33  }
0x1735   :  { %v3726_v8 = vpop.permute.xlu2 %3725 }
0x1736   :  { %4065 = vmatmul.msk.f32.vlgmr.msra.gmra.mxu1 %vm3619_vm4, %v3726_v8 }
0x176d   :  { %v3728_v11 = vpop.permute.xlu0 %3727 }
0x176e   :  { %4066 = vmatmul.msk.f32.gmra.mxu1 %vm3619_vm4, %v3728_v11 }
0x1775   :  { %v3789_v62 = vpop.permute.xlu0 %3788 }
0x1776   :  { %vm3793_vm3 = vcmp.eq.s32.totalorder %v3786_v47, %v3789_v62 }
0x1777   :  { %v4067_v55 = vsel %vm3793_vm3, 1.0, %v4440_v34 }
0x177d   :  { %v3792_v61 = vpop.permute.xlu0 %3791 }
0x177e   :  { %vm3794_vm5 = vcmp.eq.s32.totalorder %v3786_v47, %v3792_v61 }
0x177f   :  { %v4068_v29 = vsel %vm3794_vm5, 1.0, %v4440_v34 }
0x17b3   :  { %v3750_v26 = vpop.f32.mrf.mxu1 }
0x17b4   :  { %v3751_v3 = vadd.f32 %v4117_v54, %v3750_v26 }
0x17b6   :  { %3757 = vst.msk [vmem:[#allocation6] sm:$0xff] %vm3756_vm2, %v3751_v3  ;;  %v3761_v32 = vsel %vm3756_vm2, %v3751_v3, -inf  ;;  %v3799_v24 = vmul.f32 %v4067_v55, %v3751_v3 }
0x17b7   :  { %3762 = vmax.xlane.f32.xlu1 %v3761_v32 }
0x17b8   :  { %v3801_v51 = vsel %vm3756_vm2, %v3799_v24, 0.0 }
0x17bf   :  { %3802 = vadd.xlane.f32.xlu1 %v3801_v51 }
0x17eb   :  { %v3753_v59 = vpop.f32.mrf.mxu1 }
0x17ec   :  { %v3754_v20 = vadd.f32 %v4117_v54, %v3753_v59 }
0x17ee   :  { %3758 = vst.msk [vmem:[#allocation6 + $0x8] sm:$0xff] %vm3756_vm2, %v3754_v20  ;;  %v3764_v19 = vsel %vm3756_vm2, %v3754_v20, -inf  ;;  %v3800_v63 = vmul.f32 %v4068_v29, %v3754_v20 }
0x17ef   :  { %3765 = vmax.xlane.f32.xlu2 %v3764_v19  ;;  %3884 = dma.vmem_to_hbm [thread:$0]  %s3877_s12, 256, %s3879_s30, [#allocation4], %s4452_s18, %s4452_s18, %s4453_s19  }
0x17f0   :  { %v3804_v56 = vsel %vm3756_vm2, %v3800_v63, 0.0 }
0x182a   :  { %v3763_v57 = vpop.xlane.xlu1 %3762 }
0x182b   :  { %v3767_v27 = vsub.f32 %v3751_v3, %v3763_v57 }
0x182d   :  { %v3769_v10 = vmul.f32 1.442695, %v3767_v27 }
0x182f   :  { %4382 = vpow2.f32 %v3769_v10 }
0x1832   :  { %v3803_v30 = vpop.xlane.xlu1 %3802 }
0x1835   :  { %v4383_v41 = vpop.eup %4382 }
0x1836   :  { %v3773_v28 = vsel %vm3756_vm2, %v4383_v41, 0.0 }
0x1837   :  { %3774 = vadd.xlane.f32.xlu0 %v3773_v28 }
0x1862   :  { %v3766_v16 = vpop.xlane.xlu2 %3765 }
0x1863   :  { %v3768_v21 = vsub.f32 %v3754_v20, %v3766_v16 }
0x1865   :  { %v3771_v4 = vmul.f32 1.442695, %v3768_v21 }
0x1867   :  { %4384 = vpow2.f32 %v3771_v4 }
0x186d   :  { %v4385_v49 = vpop.eup %4384 }
0x186e   :  { %v3776_v43 = vsel %vm3756_vm2, %v4385_v49, 0.0 }
0x186f   :  { %3777 = vadd.xlane.f32.xlu2 %v3776_v43 }
0x1877   :  { %3805 = vadd.xlane.f32.xlu2 %v3804_v56 }
0x187f   :  { %3835 = vadd.xlane.f32.xlu2 %v3834_v46 }
0x18aa   :  { %v3775_v1 = vpop.xlane.xlu0 %3774 }
0x18ab   :  { %4386 = vlog2.f32 %v3775_v1 }
0x18b1   :  { %v4387_v34 = vpop.eup %4386 }
0x18b2   :  { %v3780_v2 = vmul.f32 0.6931472, %v4387_v34 }
0x18b4   :  { %v3783_v48 = vadd.f32 %v3780_v2, %v3763_v57 }
0x18b6   :  { %v3815_v6 = vsub.f32 %v3783_v48, %v3803_v30 }
0x18b8   :  { %v3817_v60 = vmul.f32 %v3815_v6, %v3813_v38 }
0x18ba   :  { %v3820_v58 = vsel %vm3819_vm7, %v3817_v60, 0.0 }
0x18e2   :  { %v3778_v35 = vpop.xlane.xlu2 %3777 }
0x18e3   :  { %4388 = vlog2.f32 %v3778_v35 }
0x18e9   :  { %v4389_v17 = vpop.eup %4388 }
0x18ea   :  { %v3782_v44 = vmul.f32 0.6931472, %v4389_v17  ;;  %v3806_v52 = vpop.xlane.xlu2 %3805 }
0x18ec   :  { %v3784_v42 = vadd.f32 %v3782_v44, %v3766_v16 }
0x18ee   :  { %v3816_v31 = vsub.f32 %v3784_v42, %v3806_v52 }
0x18f0   :  { %v3818_v36 = vmul.f32 %v3816_v31, %v3814_v53 }
0x18f2   :  { %v3821_v50 = vsel %vm3819_vm7, %v3818_v36, 0.0  ;;  %v3836_v37 = vpop.xlane.xlu2 %3835 }
0x18f3   :  { %v3822_v45 = vadd.f32 %v3821_v50, %v3820_v58  ;;  %v3837_v39 = vrot.slane %v3836_v37, 4 }
0x18f5   :  { %3823 = vadd.xlane.f32.xlu1 %v3822_v45  ;;  %v3838_v13 = vadd.f32 %v3837_v39, %v3836_v37 }
0x18f7   :  { %v3839_v15 = vrot.slane %v3838_v13, 2 }
0x18f9   :  { %v3840_v5 = vadd.f32 %v3839_v15, %v3838_v13 }
0x18fb   :  { %v3841_v11 = vrot.slane %v3840_v5, 1 }
0x18fd   :  { %v3842_v54 = vadd.f32 %v3841_v11, %v3840_v5 }
0x1968   :  { %v3824_v25 = vpop.xlane.xlu1 %3823 }
0x1969   :  { %v3825_v9 = vrot.slane %v3824_v25, 4 }
0x196b   :  { %v3826_v12 = vadd.f32 %v3825_v9, %v3824_v25 }
0x196d   :  { %v3827_v33 = vrot.slane %v3826_v12, 2 }
0x196f   :  { %v3828_v8 = vadd.f32 %v3827_v33, %v3826_v12 }
0x1971   :  { %v3829_v0 = vrot.slane %v3828_v8, 1 }
0x1973   :  { %v3830_v47 = vadd.f32 %v3829_v0, %v3828_v8 }
0x1975   :  { %4075 = vpush %v3830_v47 }
0x1976   :  { %4077 = vpush %v3842_v54 }
0x19a6   :  { %s4076_s11 = spop %4075 }
0x19a7   :  { %s4078_s1 = spop %4077 }
0x19a8   :  { %v3844_v62 = vstv %s4078_s1 }
0x19a9   :  { %4390 = vrcp.f32 %v3844_v62  ;;  %v3856_v55 = vand.u32 2147483648, %v3844_v62  ;;  %v3854_v51 = vand.u32 2147483647, %v3844_v62  ;;  %vm3850_vm4 = vweird.f32 %v3844_v62 }
0x19ab   :  { %v3857_v20 = vor.u32 1.1754944e-38, %v3856_v55  ;;  %vm3855_vm9 = vcmp.eq.f32.partialorder %v3854_v51, 8.507059e+37 }
0x19af   :  { %v4391_v26 = vpop.eup %4390 }
0x19b0   :  { %v3846_v3 = vmul.f32 %v4391_v26, %v3844_v62  ;;  %vm3851_vm8 = vweird.f32 %v4391_v26 }
0x19b1   :  { %vm3852_vm0 = vmor %vm3850_vm4, %vm3851_vm8 }
0x19b2   :  { %v3847_v32 = vsub.f32 1.0, %v3846_v3 }
0x19b4   :  { %v3848_v24 = vmul.f32 %v4391_v26, %v3847_v32 }
0x19b6   :  { %v3849_v59 = vadd.f32 %v4391_v26, %v3848_v24 }
0x19b8   :  { %v3853_v19 = vsel %vm3852_vm0, %v4391_v26, %v3849_v59 }
0x19b9   :  { %v3858_v57 = vsel %vm3855_vm9, %v3857_v20, %v3853_v19 }
0x19ba   :  { %4079 = vpush %v3858_v57 }
0x19eb   :  { %s4080_s21 = spop %4079 }
0x19ec   :  { %s3860_s22 = smul.f32 %s4080_s21, %s4076_s11 }
0x19ee   :  { %3862 = sst [smem:[#allocation3]] %s3860_s22 }
0x19ef   :  { %3871 = dma.smem_to_hbm %s4454_s23, 16, %s3869_s20, [#allocation5]  }
0x19f0   :  { %4435 = dma.done.wait [#allocation5], 16  }
0x19f1   :  { %4436 = vsyncadd [#allocation5], 4294967280 }
0x19f2   :  { %4437 = dma.done.wait [#allocation4], 256  }
0x19f3   :  { %4438 = vsyncadd [#allocation4], 4294967040 }
0x19f4   :  { %3893 = sfence }
0x19f5   :  { %3894 = vsyncpa [#allocation4], 1 }
0x19f6   :  { %3895 = vsyncpa [#allocation5], 1 }

</bundles_post_ra>
